<compile_context>
chip_gen: v7x
topology: tpu7x:2x2x1
jax: 0.10.0
libtpu: 0.0.40
codegen_flags: <defaults>
</compile_context>

<pallas_src>
import functools
from itertools import product

import jax
import jax.numpy as jnp
from jax.experimental import pallas as pl
from jax.experimental.pallas import tpu as pltpu


# ----------------------------------------------------------------------------
# Pallas kernel (batch_block batch elements per grid step)
# ----------------------------------------------------------------------------
def _ns_kernel(nb_ref, vox_ref, wt_ref, b_ref, out_ref, comb_ref, *, D, H, W, N, C, Bblk):
    """nb_ref  : (Bblk, 3, K)    grid_sample coords (rows x, y, z), K = 27*N, k-major
       vox_ref : (Bblk, C, DHW)  voxel features in native channels-major layout
       wt_ref  : (C, 27*C)       fused head weight, wt[o, k*C + c] = W_all[k, c, o]
       b_ref   : (1, C)          fused head bias
       out_ref : (Bblk, N, C)
       comb_ref: (27*C, N)       VMEM scratch for the gather-result relayout
    """
    K = 27 * N
    DHW = D * H * W
    HW = H * W

    # Hoisted across the batch-block loop.
    dhw_iota = jax.lax.broadcasted_iota(jnp.int32, (DHW, K), 0)   # voxel row id per sublane
    wt = wt_ref[...]
    bias = b_ref[...]

    for bb in range(Bblk):
        nb = nb_ref[bb]                         # (3, K) -- lane-dense coordinate math
        gx = nb[0:1, :]
        gy = nb[1:2, :]
        gz = nb[2:3, :]

        # align_corners=True unnormalization + padding_mode='border' clamping
        fx = jnp.clip((gx + 1.0) * (0.5 * (W - 1)), 0.0, float(W - 1))
        fy = jnp.clip((gy + 1.0) * (0.5 * (H - 1)), 0.0, float(H - 1))
        fz = jnp.clip((gz + 1.0) * (0.5 * (D - 1)), 0.0, float(D - 1))

        x0f = jnp.floor(fx)
        y0f = jnp.floor(fy)
        z0f = jnp.floor(fz)
        tx = fx - x0f                           # exactly 0.0 whenever x0 is at the border
        ty = fy - y0f
        tz = fz - z0f
        x0 = x0f.astype(jnp.int32)              # int32 indices: exact for any DHW
        y0 = y0f.astype(jnp.int32)
        z0 = z0f.astype(jnp.int32)

        # Fused trilinear-interpolation matrix G_T (DHW, K); one MXU matmul performs the
        # whole grid_sample gather.  8 corners, 2 VPU ops per element each (eq + select);
        # where-replacement in decreasing bit order is exact (see header comment).
        G = jnp.zeros((DHW, K), jnp.float32)
        for corner in range(7, -1, -1):         # (1,1,1) ... (0,0,0): all-zero corner last
            bx = corner & 1
            by = (corner >> 1) & 1
            bz = (corner >> 2) & 1
            xi = jnp.minimum(x0 + bx, W - 1)
            yi = jnp.minimum(y0 + by, H - 1)
            zi = jnp.minimum(z0 + bz, D - 1)
            flat = zi * HW + yi * W + xi                        # (1, K) int32
            w = ((tx if bx else 1.0 - tx) *
                 (ty if by else 1.0 - ty) *
                 (tz if bz else 1.0 - tz))                      # (1, K)
            G = jnp.where(dhw_iota == flat, w, G)

        # Gather: (C, DHW) @ (DHW, K) -> (C, K); lane-dense (K = 216 lanes), native vox.
        featsT = jnp.dot(vox_ref[bb], G, preferred_element_type=jnp.float32)

        # Relayout (C, 27*N) k-major -> (27*C, N) via 27 sublane-aligned stores so the
        # fused head is ONE matmul instead of 27 tiny per-neighbour dots.
        for k in range(27):
            comb_ref[k * C:(k + 1) * C, :] = featsT[:, k * N:(k + 1) * N]

        outT = jnp.dot(wt, comb_ref[...], preferred_element_type=jnp.float32)  # (C, N)
        out_ref[bb] = outT.T + bias


# ----------------------------------------------------------------------------
# Wrapper: exact algebraic fusion of all Linear / Conv layers (no activations between)
# ----------------------------------------------------------------------------
def _fuse_params(params):
    (w1t, b1, w2t, b2, wconv, bconv, wc1t, bc1, wc2t, bc2) = params
    # feature_diff_1 -> feature_diff_2
    w12 = w1t @ w2t                          # (C, C)
    b12 = b1 @ w2t + b2                      # (1, C)
    # feature_center_1 -> feature_center_2
    wc12 = wc1t @ wc2t                       # (C, C)
    bc12 = bc1 @ wc2t + bc2                  # (1, C)
    # Conv2d(C, C, (1, 27)) reduction: out_conv = sum_k d_k @ wconv[k] + bconv
    wconv_sum = jnp.sum(wconv, axis=0)       # (C, C)
    # total = sum_k feats_k @ (w12 @ wconv[k])
    #         + center @ (wc12 - w12 @ wconv_sum)           (folded into k == 13)
    #         + (bc12 + b12 @ wconv_sum + bconv)
    w_all = jnp.einsum('cm,kmo->kco', w12, wconv)            # (27, C, C)
    w_all = w_all.at[13].add(wc12 - w12 @ wconv_sum)
    b_all = bc12 + b12 @ wconv_sum + bconv                   # (1, C)
    return w_all, b_all


def neighbourhood_sampling(voxel_features, vertices, shift, params, *, batch_block=1):
    """voxel_features: (B, C, D, H, W) f32; vertices: (B, N, 3) in [-1, 1]; shift: (27, 3).

    batch_block=1 keeps the batch axis on the ('parallel') grid for v7x megacore;
    on single-TC v5e/v6e pass batch_block=B (or a divisor) to amortize per-step overhead.
    """
    B, C, D, H, W = voxel_features.shape
    N = vertices.shape[1]
    K = 27 * N
    DHW = D * H * W
    assert B % batch_block == 0, "batch_block must divide B"

    # k-major neighbourhood grid (matches the torch layout), transposed so the in-kernel
    # coordinate math runs lane-dense on (1, K) rows.
    nb = (vertices[:, None, :, :] + shift[None, :, None, :]).reshape(B, K, 3)
    nb_t = jnp.transpose(nb, (0, 2, 1))                       # (B, 3, K)
    # Native channels-major voxel layout -- NO HBM transpose (flat = z*H*W + y*W + x).
    vox_flat = voxel_features.reshape(B, C, DHW)              # (B, C, DHW)

    w_all, b_all = _fuse_params(params)                       # (27, C, C), (1, C)
    # Flatten the fused head to one (C_out, 27*C_in) matrix: wt[o, k*C + c] = w_all[k, c, o]
    wt = jnp.transpose(w_all, (2, 0, 1)).reshape(C, 27 * C)

    kernel = functools.partial(_ns_kernel, D=D, H=H, W=W, N=N, C=C, Bblk=batch_block)

    return pl.pallas_call(
        kernel,
        out_shape=jax.ShapeDtypeStruct((B, N, C), jnp.float32),
        grid=(B // batch_block,),
        in_specs=[
            pl.BlockSpec((batch_block, 3, K), lambda b: (b, 0, 0)),
            pl.BlockSpec((batch_block, C, DHW), lambda b: (b, 0, 0)),
            pl.BlockSpec((C, 27 * C), lambda b: (0, 0)),
            pl.BlockSpec((1, C), lambda b: (0, 0)),
        ],
        out_specs=pl.BlockSpec((batch_block, N, C), lambda b: (b, 0, 0)),
        scratch_shapes=[pltpu.VMEM((27 * C, N), jnp.float32)],
        compiler_params=pltpu.CompilerParams(dimension_semantics=("parallel",)),
    )(nb_t, vox_flat, wt, b_all)


# ----------------------------------------------------------------------------
# Pure-JAX reference (unfused weights, PyTorch grid_sample semantics) for verification
# ----------------------------------------------------------------------------
def reference_forward(voxel, vertices, shift, params):
    (w1t, b1, w2t, b2, wconv, bconv, wc1t, bc1, wc2t, bc2) = params
    B, C, D, H, W = voxel.shape
    nb = vertices[:, None, :, :] + shift[None, :, None, :]     # (B, 27, N, 3)
    gx, gy, gz = nb[..., 0], nb[..., 1], nb[..., 2]
    fx = jnp.clip((gx + 1.0) * 0.5 * (W - 1), 0.0, W - 1.0)
    fy = jnp.clip((gy + 1.0) * 0.5 * (H - 1), 0.0, H - 1.0)
    fz = jnp.clip((gz + 1.0) * 0.5 * (D - 1), 0.0, D - 1.0)
    x0, y0, z0 = jnp.floor(fx), jnp.floor(fy), jnp.floor(fz)
    tx, ty, tz = fx - x0, fy - y0, fz - z0
    vox_t = voxel.transpose(0, 2, 3, 4, 1)                     # (B, D, H, W, C)
    bidx = jnp.arange(B)[:, None, None]

    def fetch(zi, yi, xi):
        zi = jnp.clip(zi, 0, D - 1).astype(jnp.int32)
        yi = jnp.clip(yi, 0, H - 1).astype(jnp.int32)
        xi = jnp.clip(xi, 0, W - 1).astype(jnp.int32)
        return vox_t[bidx, zi, yi, xi]                         # (B, 27, N, C)

    feats = jnp.zeros(nb.shape[:3] + (C,), jnp.float32)
    for dx in (0, 1):
        wx = tx if dx else (1.0 - tx)
        for dy in (0, 1):
            wy = ty if dy else (1.0 - ty)
            for dz in (0, 1):
                wz = tz if dz else (1.0 - tz)
                feats = feats + (wx * wy * wz)[..., None] * fetch(z0 + dz, y0 + dy, x0 + dx)

    center = feats[:, 13]                                      # (B, N, C)
    diff = feats - center[:, None]                             # (B, 27, N, C)
    d = diff @ w1t + b1
    d = d @ w2t + b2
    conv_out = jnp.einsum('bknc,kco->bno', d, wconv) + bconv   # (B, N, C)
    c = center @ wc1t + bc1
    c = c @ wc2t + bc2
    return c + conv_out


# ----------------------------------------------------------------------------
if __name__ == "__main__":
    B, C, D, H, W, N = 2, 8, 8, 8, 8, 8        # features_count = C = 8, 8 vertices
    steps, step = 2, 1                         # shift scale = 2**(steps+1-step)/size

    key = jax.random.PRNGKey(0)
    ks = jax.random.split(key, 13)

    voxel_features = jax.random.normal(ks[0], (B, C, D, H, W), jnp.float32)
    vertices = jax.random.uniform(ks[1], (B, N, 3), jnp.float32, minval=-1.0, maxval=1.0)

    scale = jnp.array([2.0 ** (steps + 1 - step) / W,
                       2.0 ** (steps + 1 - step) / H,
                       2.0 ** (steps + 1 - step) / D], jnp.float32)
    shift = jnp.array(list(product((-1, 0, 1), repeat=3)), jnp.float32) * scale[None, :]  # (27, 3)

    def make_linear(kw, kb):
        w = 0.1 * jax.random.normal(kw, (C, C), jnp.float32)      # torch (out, in)
        b = 0.1 * jax.random.normal(kb, (1, C), jnp.float32)
        return w.T, b                                             # pass transposed: y = x @ W.T + b

    w1t, b1 = make_linear(ks[2], ks[3])      # feature_diff_1
    w2t, b2 = make_linear(ks[4], ks[5])      # feature_diff_2
    wc1t, bc1 = make_linear(ks[6], ks[7])    # feature_center_1
    wc2t, bc2 = make_linear(ks[8], ks[9])    # feature_center_2

    conv_w = 0.1 * jax.random.normal(ks[10], (C, C, 1, 27), jnp.float32)  # torch Conv2d weight
    bconv = 0.1 * jax.random.normal(ks[11], (1, C), jnp.float32)
    # rearrange to (27, C_in, C_out) so conv == sum_k  d_k @ wconv[k]
    wconv = jnp.transpose(conv_w[:, :, 0, :], (2, 1, 0))

    params = (w1t, b1, w2t, b2, wconv, bconv, wc1t, bc1, wc2t, bc2)

    ref = reference_forward(voxel_features, vertices, shift, params)

    # v7x-friendly default: one batch element per ('parallel') grid step.
    out1 = neighbourhood_sampling(voxel_features, vertices, shift, params)
    out1 = jax.block_until_ready(out1)
    # v5e/v6e-friendly variant: fold the whole batch into one grid step.
    out2 = neighbourhood_sampling(voxel_features, vertices, shift, params, batch_block=B)
    out2 = jax.block_until_ready(out2)

    assert out1.shape == (B, N, C) and out2.shape == (B, N, C)
    assert bool(jnp.allclose(out1, ref, atol=2e-3, rtol=2e-3)), (
        f"batch_block=1 max abs diff {float(jnp.max(jnp.abs(out1 - ref)))}")
    assert bool(jnp.allclose(out2, ref, atol=2e-3, rtol=2e-3)), (
        f"batch_block=B max abs diff {float(jnp.max(jnp.abs(out2 - ref)))}")

    print("KERNEL_OK")
</pallas_src>

<mosaic_0001>
module attributes {stable_mosaic.version = 11 : i64} {
  func.func @_ns_kernel(%arg0: i32, %arg1: memref<1x3x216xf32, #tpu.memory_space<vmem>>, %arg2: memref<1x8x512xf32, #tpu.memory_space<vmem>>, %arg3: memref<8x216xf32, #tpu.memory_space<vmem>>, %arg4: memref<1x8xf32, #tpu.memory_space<vmem>>, %arg5: memref<1x8x8xf32, #tpu.memory_space<vmem>>, %arg6: memref<216x8xf32, #tpu.memory_space<vmem>>) attributes {dimension_semantics = [#tpu.dimension_semantics<parallel>], iteration_bounds = array<i64: 2>, scalar_prefetch = 0 : i64, scratch_operands = 1 : i64, tpu.core_type = #tpu.core_type<tc>, window_params = [{transform_indices = @transform_0, window_bounds = array<i64: 1, 3, 216>}, {transform_indices = @transform_1, window_bounds = array<i64: 1, 8, 512>}, {pipeline_mode = #tpu.pipeline_mode<synchronous>, transform_indices = @transform_2, window_bounds = array<i64: 8, 216>}, {pipeline_mode = #tpu.pipeline_mode<synchronous>, transform_indices = @transform_3, window_bounds = array<i64: 1, 8>}, {transform_indices = @transform_4, window_bounds = array<i64: 1, 8, 8>}]} {
    %0 = tpu.iota {dimensions = array<i32: 0>} : vector<512x216xi32>
    %c0 = arith.constant 0 : index
    %c0_0 = arith.constant 0 : index
    %1 = vector.load %arg3[%c0, %c0_0] : memref<8x216xf32, #tpu.memory_space<vmem>>, vector<8x216xf32>
    %c0_1 = arith.constant 0 : index
    %c0_2 = arith.constant 0 : index
    %2 = vector.load %arg4[%c0_1, %c0_2] : memref<1x8xf32, #tpu.memory_space<vmem>>, vector<1x8xf32>
    %c0_3 = arith.constant 0 : index
    %c0_4 = arith.constant 0 : index
    %c0_5 = arith.constant 0 : index
    %3 = vector.load %arg1[%c0_3, %c0_4, %c0_5] : memref<1x3x216xf32, #tpu.memory_space<vmem>>, vector<1x3x216xf32>
    %4 = vector.shape_cast %3 : vector<1x3x216xf32> to vector<3x216xf32>
    %5 = vector.extract_strided_slice %4 {offsets = [0, 0], sizes = [1, 216], strides = [1, 1]} : vector<3x216xf32> to vector<1x216xf32>
    %6 = vector.extract_strided_slice %4 {offsets = [1, 0], sizes = [1, 216], strides = [1, 1]} : vector<3x216xf32> to vector<1x216xf32>
    %7 = vector.extract_strided_slice %4 {offsets = [2, 0], sizes = [1, 216], strides = [1, 1]} : vector<3x216xf32> to vector<1x216xf32>
    %cst = arith.constant 1.000000e+00 : f32
    %8 = vector.broadcast %cst : f32 to vector<1x216xf32>
    %9 = arith.addf %5, %8 : vector<1x216xf32>
    %cst_6 = arith.constant 3.500000e+00 : f32
    %10 = vector.broadcast %cst_6 : f32 to vector<1x216xf32>
    %11 = arith.mulf %9, %10 : vector<1x216xf32>
    %cst_7 = arith.constant 0.000000e+00 : f32
    %cst_8 = arith.constant 7.000000e+00 : f32
    %12 = vector.broadcast %cst_7 : f32 to vector<1x216xf32>
    %13 = arith.maximumf %12, %11 : vector<1x216xf32>
    %14 = vector.broadcast %cst_8 : f32 to vector<1x216xf32>
    %15 = arith.minimumf %14, %13 : vector<1x216xf32>
    %cst_9 = arith.constant 1.000000e+00 : f32
    %16 = vector.broadcast %cst_9 : f32 to vector<1x216xf32>
    %17 = arith.addf %6, %16 : vector<1x216xf32>
    %cst_10 = arith.constant 3.500000e+00 : f32
    %18 = vector.broadcast %cst_10 : f32 to vector<1x216xf32>
    %19 = arith.mulf %17, %18 : vector<1x216xf32>
    %cst_11 = arith.constant 0.000000e+00 : f32
    %cst_12 = arith.constant 7.000000e+00 : f32
    %20 = vector.broadcast %cst_11 : f32 to vector<1x216xf32>
    %21 = arith.maximumf %20, %19 : vector<1x216xf32>
    %22 = vector.broadcast %cst_12 : f32 to vector<1x216xf32>
    %23 = arith.minimumf %22, %21 : vector<1x216xf32>
    %cst_13 = arith.constant 1.000000e+00 : f32
    %24 = vector.broadcast %cst_13 : f32 to vector<1x216xf32>
    %25 = arith.addf %7, %24 : vector<1x216xf32>
    %cst_14 = arith.constant 3.500000e+00 : f32
    %26 = vector.broadcast %cst_14 : f32 to vector<1x216xf32>
    %27 = arith.mulf %25, %26 : vector<1x216xf32>
    %cst_15 = arith.constant 0.000000e+00 : f32
    %cst_16 = arith.constant 7.000000e+00 : f32
    %28 = vector.broadcast %cst_15 : f32 to vector<1x216xf32>
    %29 = arith.maximumf %28, %27 : vector<1x216xf32>
    %30 = vector.broadcast %cst_16 : f32 to vector<1x216xf32>
    %31 = arith.minimumf %30, %29 : vector<1x216xf32>
    %32 = math.floor %15 : vector<1x216xf32>
    %33 = math.floor %23 : vector<1x216xf32>
    %34 = math.floor %31 : vector<1x216xf32>
    %35 = arith.subf %15, %32 : vector<1x216xf32>
    %36 = arith.subf %23, %33 : vector<1x216xf32>
    %37 = arith.subf %31, %34 : vector<1x216xf32>
    %38 = arith.fptosi %32 : vector<1x216xf32> to vector<1x216xi32>
    %39 = arith.fptosi %33 : vector<1x216xf32> to vector<1x216xi32>
    %40 = arith.fptosi %34 : vector<1x216xf32> to vector<1x216xi32>
    %cst_17 = arith.constant 0.000000e+00 : f32
    %41 = vector.broadcast %cst_17 : f32 to vector<512x216xf32>
    %c1_i32 = arith.constant 1 : i32
    %42 = vector.broadcast %c1_i32 : i32 to vector<1x216xi32>
    %43 = arith.addi %38, %42 : vector<1x216xi32>
    %c7_i32 = arith.constant 7 : i32
    %44 = vector.broadcast %c7_i32 : i32 to vector<1x216xi32>
    %45 = arith.minsi %43, %44 : vector<1x216xi32>
    %c1_i32_18 = arith.constant 1 : i32
    %46 = vector.broadcast %c1_i32_18 : i32 to vector<1x216xi32>
    %47 = arith.addi %39, %46 : vector<1x216xi32>
    %c7_i32_19 = arith.constant 7 : i32
    %48 = vector.broadcast %c7_i32_19 : i32 to vector<1x216xi32>
    %49 = arith.minsi %47, %48 : vector<1x216xi32>
    %c1_i32_20 = arith.constant 1 : i32
    %50 = vector.broadcast %c1_i32_20 : i32 to vector<1x216xi32>
    %51 = arith.addi %40, %50 : vector<1x216xi32>
    %c7_i32_21 = arith.constant 7 : i32
    %52 = vector.broadcast %c7_i32_21 : i32 to vector<1x216xi32>
    %53 = arith.minsi %51, %52 : vector<1x216xi32>
    %c64_i32 = arith.constant 64 : i32
    %54 = vector.broadcast %c64_i32 : i32 to vector<1x216xi32>
    %55 = arith.muli %53, %54 : vector<1x216xi32>
    %c8_i32 = arith.constant 8 : i32
    %56 = vector.broadcast %c8_i32 : i32 to vector<1x216xi32>
    %57 = arith.muli %49, %56 : vector<1x216xi32>
    %58 = arith.addi %55, %57 : vector<1x216xi32>
    %59 = arith.addi %58, %45 : vector<1x216xi32>
    %60 = arith.mulf %35, %36 : vector<1x216xf32>
    %61 = arith.mulf %60, %37 : vector<1x216xf32>
    %62 = vector.broadcast %59 : vector<1x216xi32> to vector<512x216xi32>
    %63 = arith.cmpi eq, %0, %62 : vector<512x216xi32>
    %64 = vector.shape_cast %61 : vector<1x216xf32> to vector<1x216xf32>
    %65 = vector.broadcast %64 : vector<1x216xf32> to vector<512x216xf32>
    %66 = arith.select %63, %65, %41 : vector<512x216xi1>, vector<512x216xf32>
    %c0_i32 = arith.constant 0 : i32
    %67 = vector.broadcast %c0_i32 : i32 to vector<1x216xi32>
    %68 = arith.addi %38, %67 : vector<1x216xi32>
    %c7_i32_22 = arith.constant 7 : i32
    %69 = vector.broadcast %c7_i32_22 : i32 to vector<1x216xi32>
    %70 = arith.minsi %68, %69 : vector<1x216xi32>
    %c1_i32_23 = arith.constant 1 : i32
    %71 = vector.broadcast %c1_i32_23 : i32 to vector<1x216xi32>
    %72 = arith.addi %39, %71 : vector<1x216xi32>
    %c7_i32_24 = arith.constant 7 : i32
    %73 = vector.broadcast %c7_i32_24 : i32 to vector<1x216xi32>
    %74 = arith.minsi %72, %73 : vector<1x216xi32>
    %c1_i32_25 = arith.constant 1 : i32
    %75 = vector.broadcast %c1_i32_25 : i32 to vector<1x216xi32>
    %76 = arith.addi %40, %75 : vector<1x216xi32>
    %c7_i32_26 = arith.constant 7 : i32
    %77 = vector.broadcast %c7_i32_26 : i32 to vector<1x216xi32>
    %78 = arith.minsi %76, %77 : vector<1x216xi32>
    %c64_i32_27 = arith.constant 64 : i32
    %79 = vector.broadcast %c64_i32_27 : i32 to vector<1x216xi32>
    %80 = arith.muli %78, %79 : vector<1x216xi32>
    %c8_i32_28 = arith.constant 8 : i32
    %81 = vector.broadcast %c8_i32_28 : i32 to vector<1x216xi32>
    %82 = arith.muli %74, %81 : vector<1x216xi32>
    %83 = arith.addi %80, %82 : vector<1x216xi32>
    %84 = arith.addi %83, %70 : vector<1x216xi32>
    %cst_29 = arith.constant 1.000000e+00 : f32
    %85 = vector.broadcast %cst_29 : f32 to vector<1x216xf32>
    %86 = arith.subf %85, %35 : vector<1x216xf32>
    %87 = arith.mulf %86, %36 : vector<1x216xf32>
    %88 = arith.mulf %87, %37 : vector<1x216xf32>
    %89 = vector.broadcast %84 : vector<1x216xi32> to vector<512x216xi32>
    %90 = arith.cmpi eq, %0, %89 : vector<512x216xi32>
    %91 = vector.shape_cast %88 : vector<1x216xf32> to vector<1x216xf32>
    %92 = vector.broadcast %91 : vector<1x216xf32> to vector<512x216xf32>
    %93 = arith.select %90, %92, %66 : vector<512x216xi1>, vector<512x216xf32>
    %c1_i32_30 = arith.constant 1 : i32
    %94 = vector.broadcast %c1_i32_30 : i32 to vector<1x216xi32>
    %95 = arith.addi %38, %94 : vector<1x216xi32>
    %c7_i32_31 = arith.constant 7 : i32
    %96 = vector.broadcast %c7_i32_31 : i32 to vector<1x216xi32>
    %97 = arith.minsi %95, %96 : vector<1x216xi32>
    %c0_i32_32 = arith.constant 0 : i32
    %98 = vector.broadcast %c0_i32_32 : i32 to vector<1x216xi32>
    %99 = arith.addi %39, %98 : vector<1x216xi32>
    %c7_i32_33 = arith.constant 7 : i32
    %100 = vector.broadcast %c7_i32_33 : i32 to vector<1x216xi32>
    %101 = arith.minsi %99, %100 : vector<1x216xi32>
    %c1_i32_34 = arith.constant 1 : i32
    %102 = vector.broadcast %c1_i32_34 : i32 to vector<1x216xi32>
    %103 = arith.addi %40, %102 : vector<1x216xi32>
    %c7_i32_35 = arith.constant 7 : i32
    %104 = vector.broadcast %c7_i32_35 : i32 to vector<1x216xi32>
    %105 = arith.minsi %103, %104 : vector<1x216xi32>
    %c64_i32_36 = arith.constant 64 : i32
    %106 = vector.broadcast %c64_i32_36 : i32 to vector<1x216xi32>
    %107 = arith.muli %105, %106 : vector<1x216xi32>
    %c8_i32_37 = arith.constant 8 : i32
    %108 = vector.broadcast %c8_i32_37 : i32 to vector<1x216xi32>
    %109 = arith.muli %101, %108 : vector<1x216xi32>
    %110 = arith.addi %107, %109 : vector<1x216xi32>
    %111 = arith.addi %110, %97 : vector<1x216xi32>
    %cst_38 = arith.constant 1.000000e+00 : f32
    %112 = vector.broadcast %cst_38 : f32 to vector<1x216xf32>
    %113 = arith.subf %112, %36 : vector<1x216xf32>
    %114 = arith.mulf %35, %113 : vector<1x216xf32>
    %115 = arith.mulf %114, %37 : vector<1x216xf32>
    %116 = vector.broadcast %111 : vector<1x216xi32> to vector<512x216xi32>
    %117 = arith.cmpi eq, %0, %116 : vector<512x216xi32>
    %118 = vector.shape_cast %115 : vector<1x216xf32> to vector<1x216xf32>
    %119 = vector.broadcast %118 : vector<1x216xf32> to vector<512x216xf32>
    %120 = arith.select %117, %119, %93 : vector<512x216xi1>, vector<512x216xf32>
    %c0_i32_39 = arith.constant 0 : i32
    %121 = vector.broadcast %c0_i32_39 : i32 to vector<1x216xi32>
    %122 = arith.addi %38, %121 : vector<1x216xi32>
    %c7_i32_40 = arith.constant 7 : i32
    %123 = vector.broadcast %c7_i32_40 : i32 to vector<1x216xi32>
    %124 = arith.minsi %122, %123 : vector<1x216xi32>
    %c0_i32_41 = arith.constant 0 : i32
    %125 = vector.broadcast %c0_i32_41 : i32 to vector<1x216xi32>
    %126 = arith.addi %39, %125 : vector<1x216xi32>
    %c7_i32_42 = arith.constant 7 : i32
    %127 = vector.broadcast %c7_i32_42 : i32 to vector<1x216xi32>
    %128 = arith.minsi %126, %127 : vector<1x216xi32>
    %c1_i32_43 = arith.constant 1 : i32
    %129 = vector.broadcast %c1_i32_43 : i32 to vector<1x216xi32>
    %130 = arith.addi %40, %129 : vector<1x216xi32>
    %c7_i32_44 = arith.constant 7 : i32
    %131 = vector.broadcast %c7_i32_44 : i32 to vector<1x216xi32>
    %132 = arith.minsi %130, %131 : vector<1x216xi32>
    %c64_i32_45 = arith.constant 64 : i32
    %133 = vector.broadcast %c64_i32_45 : i32 to vector<1x216xi32>
    %134 = arith.muli %132, %133 : vector<1x216xi32>
    %c8_i32_46 = arith.constant 8 : i32
    %135 = vector.broadcast %c8_i32_46 : i32 to vector<1x216xi32>
    %136 = arith.muli %128, %135 : vector<1x216xi32>
    %137 = arith.addi %134, %136 : vector<1x216xi32>
    %138 = arith.addi %137, %124 : vector<1x216xi32>
    %cst_47 = arith.constant 1.000000e+00 : f32
    %139 = vector.broadcast %cst_47 : f32 to vector<1x216xf32>
    %140 = arith.subf %139, %35 : vector<1x216xf32>
    %cst_48 = arith.constant 1.000000e+00 : f32
    %141 = vector.broadcast %cst_48 : f32 to vector<1x216xf32>
    %142 = arith.subf %141, %36 : vector<1x216xf32>
    %143 = arith.mulf %140, %142 : vector<1x216xf32>
    %144 = arith.mulf %143, %37 : vector<1x216xf32>
    %145 = vector.broadcast %138 : vector<1x216xi32> to vector<512x216xi32>
    %146 = arith.cmpi eq, %0, %145 : vector<512x216xi32>
    %147 = vector.shape_cast %144 : vector<1x216xf32> to vector<1x216xf32>
    %148 = vector.broadcast %147 : vector<1x216xf32> to vector<512x216xf32>
    %149 = arith.select %146, %148, %120 : vector<512x216xi1>, vector<512x216xf32>
    %c1_i32_49 = arith.constant 1 : i32
    %150 = vector.broadcast %c1_i32_49 : i32 to vector<1x216xi32>
    %151 = arith.addi %38, %150 : vector<1x216xi32>
    %c7_i32_50 = arith.constant 7 : i32
    %152 = vector.broadcast %c7_i32_50 : i32 to vector<1x216xi32>
    %153 = arith.minsi %151, %152 : vector<1x216xi32>
    %c1_i32_51 = arith.constant 1 : i32
    %154 = vector.broadcast %c1_i32_51 : i32 to vector<1x216xi32>
    %155 = arith.addi %39, %154 : vector<1x216xi32>
    %c7_i32_52 = arith.constant 7 : i32
    %156 = vector.broadcast %c7_i32_52 : i32 to vector<1x216xi32>
    %157 = arith.minsi %155, %156 : vector<1x216xi32>
    %c0_i32_53 = arith.constant 0 : i32
    %158 = vector.broadcast %c0_i32_53 : i32 to vector<1x216xi32>
    %159 = arith.addi %40, %158 : vector<1x216xi32>
    %c7_i32_54 = arith.constant 7 : i32
    %160 = vector.broadcast %c7_i32_54 : i32 to vector<1x216xi32>
    %161 = arith.minsi %159, %160 : vector<1x216xi32>
    %c64_i32_55 = arith.constant 64 : i32
    %162 = vector.broadcast %c64_i32_55 : i32 to vector<1x216xi32>
    %163 = arith.muli %161, %162 : vector<1x216xi32>
    %c8_i32_56 = arith.constant 8 : i32
    %164 = vector.broadcast %c8_i32_56 : i32 to vector<1x216xi32>
    %165 = arith.muli %157, %164 : vector<1x216xi32>
    %166 = arith.addi %163, %165 : vector<1x216xi32>
    %167 = arith.addi %166, %153 : vector<1x216xi32>
    %168 = arith.mulf %35, %36 : vector<1x216xf32>
    %cst_57 = arith.constant 1.000000e+00 : f32
    %169 = vector.broadcast %cst_57 : f32 to vector<1x216xf32>
    %170 = arith.subf %169, %37 : vector<1x216xf32>
    %171 = arith.mulf %168, %170 : vector<1x216xf32>
    %172 = vector.broadcast %167 : vector<1x216xi32> to vector<512x216xi32>
    %173 = arith.cmpi eq, %0, %172 : vector<512x216xi32>
    %174 = vector.shape_cast %171 : vector<1x216xf32> to vector<1x216xf32>
    %175 = vector.broadcast %174 : vector<1x216xf32> to vector<512x216xf32>
    %176 = arith.select %173, %175, %149 : vector<512x216xi1>, vector<512x216xf32>
    %c0_i32_58 = arith.constant 0 : i32
    %177 = vector.broadcast %c0_i32_58 : i32 to vector<1x216xi32>
    %178 = arith.addi %38, %177 : vector<1x216xi32>
    %c7_i32_59 = arith.constant 7 : i32
    %179 = vector.broadcast %c7_i32_59 : i32 to vector<1x216xi32>
    %180 = arith.minsi %178, %179 : vector<1x216xi32>
    %c1_i32_60 = arith.constant 1 : i32
    %181 = vector.broadcast %c1_i32_60 : i32 to vector<1x216xi32>
    %182 = arith.addi %39, %181 : vector<1x216xi32>
    %c7_i32_61 = arith.constant 7 : i32
    %183 = vector.broadcast %c7_i32_61 : i32 to vector<1x216xi32>
    %184 = arith.minsi %182, %183 : vector<1x216xi32>
    %c0_i32_62 = arith.constant 0 : i32
    %185 = vector.broadcast %c0_i32_62 : i32 to vector<1x216xi32>
    %186 = arith.addi %40, %185 : vector<1x216xi32>
    %c7_i32_63 = arith.constant 7 : i32
    %187 = vector.broadcast %c7_i32_63 : i32 to vector<1x216xi32>
    %188 = arith.minsi %186, %187 : vector<1x216xi32>
    %c64_i32_64 = arith.constant 64 : i32
    %189 = vector.broadcast %c64_i32_64 : i32 to vector<1x216xi32>
    %190 = arith.muli %188, %189 : vector<1x216xi32>
    %c8_i32_65 = arith.constant 8 : i32
    %191 = vector.broadcast %c8_i32_65 : i32 to vector<1x216xi32>
    %192 = arith.muli %184, %191 : vector<1x216xi32>
    %193 = arith.addi %190, %192 : vector<1x216xi32>
    %194 = arith.addi %193, %180 : vector<1x216xi32>
    %cst_66 = arith.constant 1.000000e+00 : f32
    %195 = vector.broadcast %cst_66 : f32 to vector<1x216xf32>
    %196 = arith.subf %195, %35 : vector<1x216xf32>
    %197 = arith.mulf %196, %36 : vector<1x216xf32>
    %cst_67 = arith.constant 1.000000e+00 : f32
    %198 = vector.broadcast %cst_67 : f32 to vector<1x216xf32>
    %199 = arith.subf %198, %37 : vector<1x216xf32>
    %200 = arith.mulf %197, %199 : vector<1x216xf32>
    %201 = vector.broadcast %194 : vector<1x216xi32> to vector<512x216xi32>
    %202 = arith.cmpi eq, %0, %201 : vector<512x216xi32>
    %203 = vector.shape_cast %200 : vector<1x216xf32> to vector<1x216xf32>
    %204 = vector.broadcast %203 : vector<1x216xf32> to vector<512x216xf32>
    %205 = arith.select %202, %204, %176 : vector<512x216xi1>, vector<512x216xf32>
    %c1_i32_68 = arith.constant 1 : i32
    %206 = vector.broadcast %c1_i32_68 : i32 to vector<1x216xi32>
    %207 = arith.addi %38, %206 : vector<1x216xi32>
    %c7_i32_69 = arith.constant 7 : i32
    %208 = vector.broadcast %c7_i32_69 : i32 to vector<1x216xi32>
    %209 = arith.minsi %207, %208 : vector<1x216xi32>
    %c0_i32_70 = arith.constant 0 : i32
    %210 = vector.broadcast %c0_i32_70 : i32 to vector<1x216xi32>
    %211 = arith.addi %39, %210 : vector<1x216xi32>
    %c7_i32_71 = arith.constant 7 : i32
    %212 = vector.broadcast %c7_i32_71 : i32 to vector<1x216xi32>
    %213 = arith.minsi %211, %212 : vector<1x216xi32>
    %c0_i32_72 = arith.constant 0 : i32
    %214 = vector.broadcast %c0_i32_72 : i32 to vector<1x216xi32>
    %215 = arith.addi %40, %214 : vector<1x216xi32>
    %c7_i32_73 = arith.constant 7 : i32
    %216 = vector.broadcast %c7_i32_73 : i32 to vector<1x216xi32>
    %217 = arith.minsi %215, %216 : vector<1x216xi32>
    %c64_i32_74 = arith.constant 64 : i32
    %218 = vector.broadcast %c64_i32_74 : i32 to vector<1x216xi32>
    %219 = arith.muli %217, %218 : vector<1x216xi32>
    %c8_i32_75 = arith.constant 8 : i32
    %220 = vector.broadcast %c8_i32_75 : i32 to vector<1x216xi32>
    %221 = arith.muli %213, %220 : vector<1x216xi32>
    %222 = arith.addi %219, %221 : vector<1x216xi32>
    %223 = arith.addi %222, %209 : vector<1x216xi32>
    %cst_76 = arith.constant 1.000000e+00 : f32
    %224 = vector.broadcast %cst_76 : f32 to vector<1x216xf32>
    %225 = arith.subf %224, %36 : vector<1x216xf32>
    %226 = arith.mulf %35, %225 : vector<1x216xf32>
    %cst_77 = arith.constant 1.000000e+00 : f32
    %227 = vector.broadcast %cst_77 : f32 to vector<1x216xf32>
    %228 = arith.subf %227, %37 : vector<1x216xf32>
    %229 = arith.mulf %226, %228 : vector<1x216xf32>
    %230 = vector.broadcast %223 : vector<1x216xi32> to vector<512x216xi32>
    %231 = arith.cmpi eq, %0, %230 : vector<512x216xi32>
    %232 = vector.shape_cast %229 : vector<1x216xf32> to vector<1x216xf32>
    %233 = vector.broadcast %232 : vector<1x216xf32> to vector<512x216xf32>
    %234 = arith.select %231, %233, %205 : vector<512x216xi1>, vector<512x216xf32>
    %c0_i32_78 = arith.constant 0 : i32
    %235 = vector.broadcast %c0_i32_78 : i32 to vector<1x216xi32>
    %236 = arith.addi %38, %235 : vector<1x216xi32>
    %c7_i32_79 = arith.constant 7 : i32
    %237 = vector.broadcast %c7_i32_79 : i32 to vector<1x216xi32>
    %238 = arith.minsi %236, %237 : vector<1x216xi32>
    %c0_i32_80 = arith.constant 0 : i32
    %239 = vector.broadcast %c0_i32_80 : i32 to vector<1x216xi32>
    %240 = arith.addi %39, %239 : vector<1x216xi32>
    %c7_i32_81 = arith.constant 7 : i32
    %241 = vector.broadcast %c7_i32_81 : i32 to vector<1x216xi32>
    %242 = arith.minsi %240, %241 : vector<1x216xi32>
    %c0_i32_82 = arith.constant 0 : i32
    %243 = vector.broadcast %c0_i32_82 : i32 to vector<1x216xi32>
    %244 = arith.addi %40, %243 : vector<1x216xi32>
    %c7_i32_83 = arith.constant 7 : i32
    %245 = vector.broadcast %c7_i32_83 : i32 to vector<1x216xi32>
    %246 = arith.minsi %244, %245 : vector<1x216xi32>
    %c64_i32_84 = arith.constant 64 : i32
    %247 = vector.broadcast %c64_i32_84 : i32 to vector<1x216xi32>
    %248 = arith.muli %246, %247 : vector<1x216xi32>
    %c8_i32_85 = arith.constant 8 : i32
    %249 = vector.broadcast %c8_i32_85 : i32 to vector<1x216xi32>
    %250 = arith.muli %242, %249 : vector<1x216xi32>
    %251 = arith.addi %248, %250 : vector<1x216xi32>
    %252 = arith.addi %251, %238 : vector<1x216xi32>
    %cst_86 = arith.constant 1.000000e+00 : f32
    %253 = vector.broadcast %cst_86 : f32 to vector<1x216xf32>
    %254 = arith.subf %253, %35 : vector<1x216xf32>
    %cst_87 = arith.constant 1.000000e+00 : f32
    %255 = vector.broadcast %cst_87 : f32 to vector<1x216xf32>
    %256 = arith.subf %255, %36 : vector<1x216xf32>
    %257 = arith.mulf %254, %256 : vector<1x216xf32>
    %cst_88 = arith.constant 1.000000e+00 : f32
    %258 = vector.broadcast %cst_88 : f32 to vector<1x216xf32>
    %259 = arith.subf %258, %37 : vector<1x216xf32>
    %260 = arith.mulf %257, %259 : vector<1x216xf32>
    %261 = vector.broadcast %252 : vector<1x216xi32> to vector<512x216xi32>
    %262 = arith.cmpi eq, %0, %261 : vector<512x216xi32>
    %263 = vector.shape_cast %260 : vector<1x216xf32> to vector<1x216xf32>
    %264 = vector.broadcast %263 : vector<1x216xf32> to vector<512x216xf32>
    %265 = arith.select %262, %264, %234 : vector<512x216xi1>, vector<512x216xf32>
    %c0_89 = arith.constant 0 : index
    %c0_90 = arith.constant 0 : index
    %c0_91 = arith.constant 0 : index
    %266 = vector.load %arg2[%c0_89, %c0_90, %c0_91] : memref<1x8x512xf32, #tpu.memory_space<vmem>>, vector<1x8x512xf32>
    %267 = vector.shape_cast %266 : vector<1x8x512xf32> to vector<8x512xf32>
    %cst_92 = arith.constant dense<0.000000e+00> : vector<8x216xf32>
    %268 = tpu.matmul %267, %265, %cst_92 {dimension_numbers = #tpu.dot_dimension_numbers<[1], [0], [0], [1], [0, 0, 1, 1], [], []>} : vector<8x512xf32>, vector<512x216xf32>, vector<8x216xf32> -> vector<8x216xf32>
    %269 = vector.extract_strided_slice %268 {offsets = [0, 0], sizes = [8, 8], strides = [1, 1]} : vector<8x216xf32> to vector<8x8xf32>
    %c0_93 = arith.constant 0 : index
    %c0_94 = arith.constant 0 : index
    %270 = vector.load %arg6[%c0_93, %c0_94] : memref<216x8xf32, #tpu.memory_space<vmem>>, vector<8x8xf32>
    tpu.vector_store %arg6[%c0_93, %c0_94], %269 {strides = array<i32>} : memref<216x8xf32, #tpu.memory_space<vmem>>, vector<8x8xf32>,
    %271 = vector.extract_strided_slice %268 {offsets = [0, 8], sizes = [8, 8], strides = [1, 1]} : vector<8x216xf32> to vector<8x8xf32>
    %c8 = arith.constant 8 : index
    %c0_95 = arith.constant 0 : index
    %272 = vector.load %arg6[%c8, %c0_95] : memref<216x8xf32, #tpu.memory_space<vmem>>, vector<8x8xf32>
    tpu.vector_store %arg6[%c8, %c0_95], %271 {strides = array<i32>} : memref<216x8xf32, #tpu.memory_space<vmem>>, vector<8x8xf32>,
    %273 = vector.extract_strided_slice %268 {offsets = [0, 16], sizes = [8, 8], strides = [1, 1]} : vector<8x216xf32> to vector<8x8xf32>
    %c16 = arith.constant 16 : index
    %c0_96 = arith.constant 0 : index
    %274 = vector.load %arg6[%c16, %c0_96] : memref<216x8xf32, #tpu.memory_space<vmem>>, vector<8x8xf32>
    tpu.vector_store %arg6[%c16, %c0_96], %273 {strides = array<i32>} : memref<216x8xf32, #tpu.memory_space<vmem>>, vector<8x8xf32>,
    %275 = vector.extract_strided_slice %268 {offsets = [0, 24], sizes = [8, 8], strides = [1, 1]} : vector<8x216xf32> to vector<8x8xf32>
    %c24 = arith.constant 24 : index
    %c0_97 = arith.constant 0 : index
    %276 = vector.load %arg6[%c24, %c0_97] : memref<216x8xf32, #tpu.memory_space<vmem>>, vector<8x8xf32>
    tpu.vector_store %arg6[%c24, %c0_97], %275 {strides = array<i32>} : memref<216x8xf32, #tpu.memory_space<vmem>>, vector<8x8xf32>,
    %277 = vector.extract_strided_slice %268 {offsets = [0, 32], sizes = [8, 8], strides = [1, 1]} : vector<8x216xf32> to vector<8x8xf32>
    %c32 = arith.constant 32 : index
    %c0_98 = arith.constant 0 : index
    %278 = vector.load %arg6[%c32, %c0_98] : memref<216x8xf32, #tpu.memory_space<vmem>>, vector<8x8xf32>
    tpu.vector_store %arg6[%c32, %c0_98], %277 {strides = array<i32>} : memref<216x8xf32, #tpu.memory_space<vmem>>, vector<8x8xf32>,
    %279 = vector.extract_strided_slice %268 {offsets = [0, 40], sizes = [8, 8], strides = [1, 1]} : vector<8x216xf32> to vector<8x8xf32>
    %c40 = arith.constant 40 : index
    %c0_99 = arith.constant 0 : index
    %280 = vector.load %arg6[%c40, %c0_99] : memref<216x8xf32, #tpu.memory_space<vmem>>, vector<8x8xf32>
    tpu.vector_store %arg6[%c40, %c0_99], %279 {strides = array<i32>} : memref<216x8xf32, #tpu.memory_space<vmem>>, vector<8x8xf32>,
    %281 = vector.extract_strided_slice %268 {offsets = [0, 48], sizes = [8, 8], strides = [1, 1]} : vector<8x216xf32> to vector<8x8xf32>
    %c48 = arith.constant 48 : index
    %c0_100 = arith.constant 0 : index
    %282 = vector.load %arg6[%c48, %c0_100] : memref<216x8xf32, #tpu.memory_space<vmem>>, vector<8x8xf32>
    tpu.vector_store %arg6[%c48, %c0_100], %281 {strides = array<i32>} : memref<216x8xf32, #tpu.memory_space<vmem>>, vector<8x8xf32>,
    %283 = vector.extract_strided_slice %268 {offsets = [0, 56], sizes = [8, 8], strides = [1, 1]} : vector<8x216xf32> to vector<8x8xf32>
    %c56 = arith.constant 56 : index
    %c0_101 = arith.constant 0 : index
    %284 = vector.load %arg6[%c56, %c0_101] : memref<216x8xf32, #tpu.memory_space<vmem>>, vector<8x8xf32>
    tpu.vector_store %arg6[%c56, %c0_101], %283 {strides = array<i32>} : memref<216x8xf32, #tpu.memory_space<vmem>>, vector<8x8xf32>,
    %285 = vector.extract_strided_slice %268 {offsets = [0, 64], sizes = [8, 8], strides = [1, 1]} : vector<8x216xf32> to vector<8x8xf32>
    %c64 = arith.constant 64 : index
    %c0_102 = arith.constant 0 : index
    %286 = vector.load %arg6[%c64, %c0_102] : memref<216x8xf32, #tpu.memory_space<vmem>>, vector<8x8xf32>
    tpu.vector_store %arg6[%c64, %c0_102], %285 {strides = array<i32>} : memref<216x8xf32, #tpu.memory_space<vmem>>, vector<8x8xf32>,
    %287 = vector.extract_strided_slice %268 {offsets = [0, 72], sizes = [8, 8], strides = [1, 1]} : vector<8x216xf32> to vector<8x8xf32>
    %c72 = arith.constant 72 : index
    %c0_103 = arith.constant 0 : index
    %288 = vector.load %arg6[%c72, %c0_103] : memref<216x8xf32, #tpu.memory_space<vmem>>, vector<8x8xf32>
    tpu.vector_store %arg6[%c72, %c0_103], %287 {strides = array<i32>} : memref<216x8xf32, #tpu.memory_space<vmem>>, vector<8x8xf32>,
    %289 = vector.extract_strided_slice %268 {offsets = [0, 80], sizes = [8, 8], strides = [1, 1]} : vector<8x216xf32> to vector<8x8xf32>
    %c80 = arith.constant 80 : index
    %c0_104 = arith.constant 0 : index
    %290 = vector.load %arg6[%c80, %c0_104] : memref<216x8xf32, #tpu.memory_space<vmem>>, vector<8x8xf32>
    tpu.vector_store %arg6[%c80, %c0_104], %289 {strides = array<i32>} : memref<216x8xf32, #tpu.memory_space<vmem>>, vector<8x8xf32>,
    %291 = vector.extract_strided_slice %268 {offsets = [0, 88], sizes = [8, 8], strides = [1, 1]} : vector<8x216xf32> to vector<8x8xf32>
    %c88 = arith.constant 88 : index
    %c0_105 = arith.constant 0 : index
    %292 = vector.load %arg6[%c88, %c0_105] : memref<216x8xf32, #tpu.memory_space<vmem>>, vector<8x8xf32>
    tpu.vector_store %arg6[%c88, %c0_105], %291 {strides = array<i32>} : memref<216x8xf32, #tpu.memory_space<vmem>>, vector<8x8xf32>,
    %293 = vector.extract_strided_slice %268 {offsets = [0, 96], sizes = [8, 8], strides = [1, 1]} : vector<8x216xf32> to vector<8x8xf32>
    %c96 = arith.constant 96 : index
    %c0_106 = arith.constant 0 : index
    %294 = vector.load %arg6[%c96, %c0_106] : memref<216x8xf32, #tpu.memory_space<vmem>>, vector<8x8xf32>
    tpu.vector_store %arg6[%c96, %c0_106], %293 {strides = array<i32>} : memref<216x8xf32, #tpu.memory_space<vmem>>, vector<8x8xf32>,
    %295 = vector.extract_strided_slice %268 {offsets = [0, 104], sizes = [8, 8], strides = [1, 1]} : vector<8x216xf32> to vector<8x8xf32>
    %c104 = arith.constant 104 : index
    %c0_107 = arith.constant 0 : index
    %296 = vector.load %arg6[%c104, %c0_107] : memref<216x8xf32, #tpu.memory_space<vmem>>, vector<8x8xf32>
    tpu.vector_store %arg6[%c104, %c0_107], %295 {strides = array<i32>} : memref<216x8xf32, #tpu.memory_space<vmem>>, vector<8x8xf32>,
    %297 = vector.extract_strided_slice %268 {offsets = [0, 112], sizes = [8, 8], strides = [1, 1]} : vector<8x216xf32> to vector<8x8xf32>
    %c112 = arith.constant 112 : index
    %c0_108 = arith.constant 0 : index
    %298 = vector.load %arg6[%c112, %c0_108] : memref<216x8xf32, #tpu.memory_space<vmem>>, vector<8x8xf32>
    tpu.vector_store %arg6[%c112, %c0_108], %297 {strides = array<i32>} : memref<216x8xf32, #tpu.memory_space<vmem>>, vector<8x8xf32>,
    %299 = vector.extract_strided_slice %268 {offsets = [0, 120], sizes = [8, 8], strides = [1, 1]} : vector<8x216xf32> to vector<8x8xf32>
    %c120 = arith.constant 120 : index
    %c0_109 = arith.constant 0 : index
    %300 = vector.load %arg6[%c120, %c0_109] : memref<216x8xf32, #tpu.memory_space<vmem>>, vector<8x8xf32>
    tpu.vector_store %arg6[%c120, %c0_109], %299 {strides = array<i32>} : memref<216x8xf32, #tpu.memory_space<vmem>>, vector<8x8xf32>,
    %301 = vector.extract_strided_slice %268 {offsets = [0, 128], sizes = [8, 8], strides = [1, 1]} : vector<8x216xf32> to vector<8x8xf32>
    %c128 = arith.constant 128 : index
    %c0_110 = arith.constant 0 : index
    %302 = vector.load %arg6[%c128, %c0_110] : memref<216x8xf32, #tpu.memory_space<vmem>>, vector<8x8xf32>
    tpu.vector_store %arg6[%c128, %c0_110], %301 {strides = array<i32>} : memref<216x8xf32, #tpu.memory_space<vmem>>, vector<8x8xf32>,
    %303 = vector.extract_strided_slice %268 {offsets = [0, 136], sizes = [8, 8], strides = [1, 1]} : vector<8x216xf32> to vector<8x8xf32>
    %c136 = arith.constant 136 : index
    %c0_111 = arith.constant 0 : index
    %304 = vector.load %arg6[%c136, %c0_111] : memref<216x8xf32, #tpu.memory_space<vmem>>, vector<8x8xf32>
    tpu.vector_store %arg6[%c136, %c0_111], %303 {strides = array<i32>} : memref<216x8xf32, #tpu.memory_space<vmem>>, vector<8x8xf32>,
    %305 = vector.extract_strided_slice %268 {offsets = [0, 144], sizes = [8, 8], strides = [1, 1]} : vector<8x216xf32> to vector<8x8xf32>
    %c144 = arith.constant 144 : index
    %c0_112 = arith.constant 0 : index
    %306 = vector.load %arg6[%c144, %c0_112] : memref<216x8xf32, #tpu.memory_space<vmem>>, vector<8x8xf32>
    tpu.vector_store %arg6[%c144, %c0_112], %305 {strides = array<i32>} : memref<216x8xf32, #tpu.memory_space<vmem>>, vector<8x8xf32>,
    %307 = vector.extract_strided_slice %268 {offsets = [0, 152], sizes = [8, 8], strides = [1, 1]} : vector<8x216xf32> to vector<8x8xf32>
    %c152 = arith.constant 152 : index
    %c0_113 = arith.constant 0 : index
    %308 = vector.load %arg6[%c152, %c0_113] : memref<216x8xf32, #tpu.memory_space<vmem>>, vector<8x8xf32>
    tpu.vector_store %arg6[%c152, %c0_113], %307 {strides = array<i32>} : memref<216x8xf32, #tpu.memory_space<vmem>>, vector<8x8xf32>,
    %309 = vector.extract_strided_slice %268 {offsets = [0, 160], sizes = [8, 8], strides = [1, 1]} : vector<8x216xf32> to vector<8x8xf32>
    %c160 = arith.constant 160 : index
    %c0_114 = arith.constant 0 : index
    %310 = vector.load %arg6[%c160, %c0_114] : memref<216x8xf32, #tpu.memory_space<vmem>>, vector<8x8xf32>
    tpu.vector_store %arg6[%c160, %c0_114], %309 {strides = array<i32>} : memref<216x8xf32, #tpu.memory_space<vmem>>, vector<8x8xf32>,
    %311 = vector.extract_strided_slice %268 {offsets = [0, 168], sizes = [8, 8], strides = [1, 1]} : vector<8x216xf32> to vector<8x8xf32>
    %c168 = arith.constant 168 : index
    %c0_115 = arith.constant 0 : index
    %312 = vector.load %arg6[%c168, %c0_115] : memref<216x8xf32, #tpu.memory_space<vmem>>, vector<8x8xf32>
    tpu.vector_store %arg6[%c168, %c0_115], %311 {strides = array<i32>} : memref<216x8xf32, #tpu.memory_space<vmem>>, vector<8x8xf32>,
    %313 = vector.extract_strided_slice %268 {offsets = [0, 176], sizes = [8, 8], strides = [1, 1]} : vector<8x216xf32> to vector<8x8xf32>
    %c176 = arith.constant 176 : index
    %c0_116 = arith.constant 0 : index
    %314 = vector.load %arg6[%c176, %c0_116] : memref<216x8xf32, #tpu.memory_space<vmem>>, vector<8x8xf32>
    tpu.vector_store %arg6[%c176, %c0_116], %313 {strides = array<i32>} : memref<216x8xf32, #tpu.memory_space<vmem>>, vector<8x8xf32>,
    %315 = vector.extract_strided_slice %268 {offsets = [0, 184], sizes = [8, 8], strides = [1, 1]} : vector<8x216xf32> to vector<8x8xf32>
    %c184 = arith.constant 184 : index
    %c0_117 = arith.constant 0 : index
    %316 = vector.load %arg6[%c184, %c0_117] : memref<216x8xf32, #tpu.memory_space<vmem>>, vector<8x8xf32>
    tpu.vector_store %arg6[%c184, %c0_117], %315 {strides = array<i32>} : memref<216x8xf32, #tpu.memory_space<vmem>>, vector<8x8xf32>,
    %317 = vector.extract_strided_slice %268 {offsets = [0, 192], sizes = [8, 8], strides = [1, 1]} : vector<8x216xf32> to vector<8x8xf32>
    %c192 = arith.constant 192 : index
    %c0_118 = arith.constant 0 : index
    %318 = vector.load %arg6[%c192, %c0_118] : memref<216x8xf32, #tpu.memory_space<vmem>>, vector<8x8xf32>
    tpu.vector_store %arg6[%c192, %c0_118], %317 {strides = array<i32>} : memref<216x8xf32, #tpu.memory_space<vmem>>, vector<8x8xf32>,
    %319 = vector.extract_strided_slice %268 {offsets = [0, 200], sizes = [8, 8], strides = [1, 1]} : vector<8x216xf32> to vector<8x8xf32>
    %c200 = arith.constant 200 : index
    %c0_119 = arith.constant 0 : index
    %320 = vector.load %arg6[%c200, %c0_119] : memref<216x8xf32, #tpu.memory_space<vmem>>, vector<8x8xf32>
    tpu.vector_store %arg6[%c200, %c0_119], %319 {strides = array<i32>} : memref<216x8xf32, #tpu.memory_space<vmem>>, vector<8x8xf32>,
    %321 = vector.extract_strided_slice %268 {offsets = [0, 208], sizes = [8, 8], strides = [1, 1]} : vector<8x216xf32> to vector<8x8xf32>
    %c208 = arith.constant 208 : index
    %c0_120 = arith.constant 0 : index
    %322 = vector.load %arg6[%c208, %c0_120] : memref<216x8xf32, #tpu.memory_space<vmem>>, vector<8x8xf32>
    tpu.vector_store %arg6[%c208, %c0_120], %321 {strides = array<i32>} : memref<216x8xf32, #tpu.memory_space<vmem>>, vector<8x8xf32>,
    %c0_121 = arith.constant 0 : index
    %c0_122 = arith.constant 0 : index
    %323 = vector.load %arg6[%c0_121, %c0_122] : memref<216x8xf32, #tpu.memory_space<vmem>>, vector<216x8xf32>
    %cst_123 = arith.constant dense<0.000000e+00> : vector<8x8xf32>
    %324 = tpu.matmul %1, %323, %cst_123 {dimension_numbers = #tpu.dot_dimension_numbers<[1], [0], [0], [1], [0, 0, 1, 1], [], []>} : vector<8x216xf32>, vector<216x8xf32>, vector<8x8xf32> -> vector<8x8xf32>
    %325 = tpu.transpose %324, [1, 0] : vector<8x8xf32> -> vector<8x8xf32>
    %326 = vector.broadcast %2 : vector<1x8xf32> to vector<8x8xf32>
    %327 = arith.addf %325, %326 : vector<8x8xf32>
    %c0_124 = arith.constant 0 : index
    %c0_125 = arith.constant 0 : index
    %c0_126 = arith.constant 0 : index
    %328 = vector.load %arg5[%c0_124, %c0_125, %c0_126] : memref<1x8x8xf32, #tpu.memory_space<vmem>>, vector<1x8x8xf32>
    %329 = vector.shape_cast %328 : vector<1x8x8xf32> to vector<8x8xf32>
    %330 = vector.shape_cast %327 : vector<8x8xf32> to vector<1x8x8xf32>
    tpu.vector_store %arg5[%c0_124, %c0_125, %c0_126], %330 {strides = array<i32>} : memref<1x8x8xf32, #tpu.memory_space<vmem>>, vector<1x8x8xf32>,
    return
  }
  func.func @transform_0(%arg0: i32) -> (i32, i32, i32) {
    %c0_i32 = arith.constant 0 : i32
    %c0_i32_0 = arith.constant 0 : i32
    %c0_i32_1 = arith.constant 0 : i32
    return %arg0, %c0_i32, %c0_i32_0 : i32, i32, i32
  }
  func.func @transform_1(%arg0: i32) -> (i32, i32, i32) {
    %c0_i32 = arith.constant 0 : i32
    %c0_i32_0 = arith.constant 0 : i32
    %c0_i32_1 = arith.constant 0 : i32
    return %arg0, %c0_i32, %c0_i32_0 : i32, i32, i32
  }
  func.func @transform_2(%arg0: i32) -> (i32, i32) {
    %c0_i32 = arith.constant 0 : i32
    %c0_i32_0 = arith.constant 0 : i32
    %c0_i32_1 = arith.constant 0 : i32
    return %c0_i32, %c0_i32_0 : i32, i32
  }
  func.func @transform_3(%arg0: i32) -> (i32, i32) {
    %c0_i32 = arith.constant 0 : i32
    %c0_i32_0 = arith.constant 0 : i32
    %c0_i32_1 = arith.constant 0 : i32
    return %c0_i32, %c0_i32_0 : i32, i32
  }
  func.func @transform_4(%arg0: i32) -> (i32, i32, i32) {
    %c0_i32 = arith.constant 0 : i32
    %c0_i32_0 = arith.constant 0 : i32
    %c0_i32_1 = arith.constant 0 : i32
    return %arg0, %c0_i32, %c0_i32_0 : i32, i32, i32
  }
}

</mosaic_0001>

<bundles_post_ra>
// kernel: tpu_custom_call.1
= control target key start
LH: loop header
LB: loop body
LE: loop exit
PB: predicated region body
PF: predicated region fallthrough
CT: control target
= control target key end

     0   :  { %9 = vsyncpa [#allocation4], 0  ;;  %s7345_s0 = inlined_call_operand.vmem [shape: f32[2,3,216], index: 0, kind: input, shape index: {}]   ;;  %s7346_s1 = inlined_call_operand.hbm [shape: f32[2,8,512], index: 1, kind: input, shape index: {}]   ;;  %s7347_s2 = inlined_call_operand.vmem [shape: f32[8,216], index: 2, kind: input, shape index: {}]   ;;  %s7348_s3 = inlined_call_operand.vmem [shape: f32[1,8], index: 3, kind: input, shape index: {}]   ;;  %s7349_s4 = inlined_call_operand.hbm [shape: f32[2,8,8], index: 4, kind: output, shape index: {}]  }
   0x1   :  { %11 = vsyncpa [#allocation4 + $0x1], 0 }
   0x2   :  { %12 = vsyncpa [#allocation5], 0 }
   0x3   :  { %14 = vsyncpa [#allocation5 + $0x1], 0  ;;  %s3573_s15 = smov 0   ;;  %s3575_s16 = smov 0  }
   0x4   :  { %s3577_s17 = smov 0   ;;  %s3579_s18 = smov 0  }
   0x5 LB: > { %s3594_s19 = sadd.s32 4294967295, %s3527_s18   ;;  %s3178_s20 = sadd.s32 4294967294, %s3527_s18   ;;  %s3527_s18 = sphi %s3579_s18, %s7366_s18   ;;  %s3523_s17 = sphi %s3577_s17, %s7365_s17   ;;  %s3519_s16 = sphi %s3575_s16, %s7364_s16   ;;  %s3515_s15 = sphi %s3573_s15, %s7363_s15  }
   0x6   : > { %s3598_s21 = sadd.s32 1, %s3527_s18   ;;  %s53_s22 = sadd.s32 1, %s3523_s17 }
   0x7   : > { %s50_s23 = ssub.s32 %s3527_s18, %s3598_s21  ;;  %p60_p0 = scmp.ne.s32.totalorder %s3523_s17, %s3519_s16 }
   0x8   : > { %p51_p1 = scmp.eq.s32.totalorder %s50_s23, 0  ;;  %p61_p2 = scmp.eq.s32.totalorder %s3527_s18, 0 }
   0x9   : > { %p66_p3 = scmp.ne.s32.totalorder %s3519_s16, %s3515_s15  ;;  %p67_p4 = scmp.eq.s32.totalorder %s3594_s19, 0 }
   0xa   : > { %s3610_s24 = scalar_select %p51_p1, %s3523_s17, %s53_s22  }
   0xb   : > { %p3612_p5 = por %p61_p2, %p60_p0  ;;  %p3616_p6 = por %p67_p4, %p66_p3 }
   0xc   : > { %p132_p7 = scmp.eq.s32.totalorder %s3594_s19, 1  ;;  %p138_p8 = scmp.eq.s32.totalorder %s3178_s20, 1 }
   0xd   : > { %p3380_p10 = scmp.lt.s32.totalorder %s3527_s18, 2  ;;  %s172_s29 = sand.u32 1, %s3523_s17  }
   0xe   : > { %p3623_p11 = por %p132_p7, %p60_p0  ;;  %p3627_p12 = por %p138_p8, %p66_p3 }
   0xf   : > { %s3195_s30 = sshll.u32 %s3527_s18, 9  ;;  %s3181_s5 = sshll.u32 %s172_s29, 5 }
  0x10   : > { %s7353_s27 = scalar_select %p3623_p11, 1, 0 }
  0x11   : > { %s7354_s28 = scalar_select %p3627_p12, 1, 0 }
  0x12   : > { %s3636_s8 = scalar_lea.hbm %s7346_s1, %s3195_s30  ;;  %s176_s9 = scalar_lea.vmem [#allocation3], %s3181_s5 }
  0x13   : > { %s184_s10 = sshll.u32 %s176_s9, 4  ;;  %p3640_p13 = pnand %p3380_p10, %p3612_p5  ;;  %s3644_s10 = int_to_ptr.vmem [resolvable:$true] %s184_s10 }
  0x14   : > { %s173_s12 = scalar_lea.sflag [#allocation4], %s172_s29  ;;  %s3431_s13 = scalar_lea.hbm %s3636_s8, 512 }
  0x15   : > { %p3432_p2 = scmp.ne.s32.totalorder %s3636_s8, %s3431_s13  ;;  %p3433_p3 = pneg %p3640_p13 }
  0x16   : > { %s3436_s22 = scalar_lea.hbm %s7346_s1, 1024  ;;  %p3437_p5 = scmp.lt.u32.totalorder %s3636_s8, %s7346_s1 }
  0x17   : > { %p3434_p4 = pnand %p3433_p3, %p3432_p2  ;;  %p3438_p8 = scmp.lt.u32.totalorder %s3436_s22, %s3431_s13 }
  0x18   : > { %p3440_p9 = scmp.lt.u32.totalorder %s3431_s13, %s3636_s8 }
  0x19   : > { %p3435_p7 = pneg %p3434_p4  ;;  %p3439_p10 = por %p3438_p8, %p3437_p5 }
  0x1b   : > { %p3441_p0 = por %p3440_p9, %p3439_p10 }
  0x1d   : > { %p3442_p1 = pnand %p3441_p0, %p3435_p7 }
  0x1f   : > { %3445 = shalt.err (!%p3442_p1)
}
  0x20   : > { %s3446_s29 = scalar_lea.vmem %s3644_s10, 512  ;;  %s3529_s30 = smov [#allocation3]  }
  0x21   : > { %p3447_p2 = scmp.ne.s32.totalorder %s3644_s10, %s3446_s29  ;;  %s3451_s5 = sshll.u32 %s3529_s30, 4  ;;  %s3452_s5 = int_to_ptr.vmem [resolvable:$false] %s3451_s5 }
  0x22   : > { %s3453_s6 = scalar_lea.vmem %s3452_s5, 1024  ;;  %p3454_p11 = scmp.lt.s32.totalorder %s3644_s10, %s3452_s5 }
  0x23   : > { %p3449_p4 = pnand %p3447_p2, %p3433_p3  ;;  %p3455_p5 = scmp.lt.s32.totalorder %s3453_s6, %s3446_s29 }
  0x25   : > { %p3450_p12 = pneg %p3449_p4  ;;  %p3456_p8 = por %p3455_p5, %p3454_p11 }
  0x27   : > { %p3457_p9 = pnand %p3456_p8, %p3450_p12 }
  0x29   : > { %3460 = shalt.err (!%p3457_p9)
}
  0x2a   : > { %3375 = dma.hbm_to_vmem [thread:$0]  (!%p3640_p13), %s3636_s8, 512, %s3644_s10, %s173_s12  }
  0x2b   : > { %p7356_p0 = scmp.lt.s32.totalorder %s3527_s18, 3  ;;  %p7357_p1 = scmp.ge.s32.totalorder %s3527_s18, 1 }
  0x2d   : > { %p190_p3 = pnand %p7357_p1, %p7356_p0 }
  0x2e   : > { %s3678_s7 = sand.u32 (!%p190_p3), 1, %s3519_s16  }
  0x2f   : > { %193 = sbr.rel (%p190_p3) target bundleno = 1398 (0x576), region = 36  ;;  %s3185_s9 = sshll.u32 (!%p190_p3), %s3678_s7, 5 }
  0x30   : > { %s196_s13 = scalar_lea.sflag (!%p190_p3), [#allocation4], %s3678_s7  ;;  %s3682_s14 = scalar_lea.vmem (!%p190_p3), [#allocation3], %s3185_s9 }
  0x36   : > { %3506 = dma.done.wait (%p3616_p6), %s196_s13, 512  }
  0x37   : > { %3508 = vsyncadd (%p3616_p6), %s196_s13, 4294966784  ;;  %p229_p11 = scmp.lt.s32.totalorder %s3594_s19, 1  ;;  %v234_v1 = vlaneseq  ;;  %s3531_s26 = smov 104  }
  0x38   : > { %s3532_s22 = smov 120   ;;  %s3533_s23 = smov 96  }
  0x39   : > { %s230_s8 = scalar_select %p229_p11, %s3594_s19, 1  ;;  %v3693_v4 = vshrl.u32 %v234_v1, 7 }
  0x3a   : > { %s3534_s25 = smov 112   ;;  %s3535_s29 = smov 80  }
  0x3b   : > { %s3196_s10 = sshll.u32 %s230_s8, 3  ;;  %v3696_v7 = vadd.s32 8, %v3693_v4  ;;  %v3699_v9 = vsub.s32 2, %v3693_v4  ;;  %v3702_v10 = vsub.s32 6, %v3693_v4  ;;  %v3705_v11 = vsub.s32 0, %v3693_v4  ;;  %s3536_s30 = smov 88  }
  0x3c   : > { %s233_s20 = scalar_lea.vmem %s7345_s0, %s3196_s10  ;;  %v3708_v12 = vsub.s32 4, %v3693_v4  ;;  %v3711_v13 = vadd.s32 256, %v3693_v4  ;;  %v3714_v14 = vadd.s32 264, %v3693_v4  ;;  %v3717_v15 = vadd.s32 16, %v3693_v4  ;;  %s3537_s5 = smov 64  }
  0x3d   : > { %v302_v0 = vld [vmem:[%s233_s20] sm:$0x77]  ;;  %v3720_v18 = vadd.s32 24, %v3693_v4  ;;  %v3723_v19 = vadd.s32 272, %v3693_v4  ;;  %v3726_v20 = vadd.s32 280, %v3693_v4  ;;  %v3729_v21 = vadd.s32 32, %v3693_v4 }
  0x3e   : > { %v303_v2 = vadd.f32 1.0, %v302_v0  ;;  %v3732_v22 = vadd.s32 40, %v3693_v4  ;;  %v3735_v23 = vadd.s32 288, %v3693_v4  ;;  %v3738_v28 = vadd.s32 296, %v3693_v4  ;;  %s3538_s6 = smov 72   ;;  %s3539_s9 = smov 48  }
  0x3f   : > { %v3741_v29 = vadd.s32 48, %v3693_v4  ;;  %v3744_v30 = vadd.s32 56, %v3693_v4  ;;  %v3747_v31 = vadd.s32 304, %v3693_v4  ;;  %v3752_v38 = vadd.s32 312, %v3693_v4  ;;  %s3540_s13 = smov 56   ;;  %s3542_s8 = smov 40  }
  0x40   : > { %v304_v3 = vmul.f32 3.5, %v303_v2  ;;  %s3543_s10 = smov 16   ;;  %s3544_s11 = smov 24  }
  0x41   : > { %s3545_s12 = smov 8   ;;  %p7360_p12 = scmp.ne.s32.totalorder %s7353_s27, 0 }
  0x42   : > { %v305_v5 = vmax.f32 %v304_v3, 0.0 }
  0x44   : > { %v306_v6 = vmin.f32 %v305_v5, 7.0 }
  0x46   : > { %v307_v8 = vfloor.f32 %v306_v6 }
  0x48   : > { %v308_v16 = vsub.f32 %v306_v6, %v307_v8  ;;  %v3366_v17 = vtrunc.f32 %v307_v8 }
  0x4a   : > { %v3367_v24 = vcvt.f32.s32 %v3366_v17  ;;  %v320_v25 = vrot.slane %v308_v16, 5  ;;  %v324_v26 = vrot.slane %v308_v16, 6  ;;  %v623_v27 = vsub.f32 1.0, %v308_v16 }
  0x4c   : > { %v310_v32 = vadd.s32 1, %v3367_v24  ;;  %v321_v33 = vrot.slane %v320_v25, 4  ;;  %v325_v34 = vrot.slane %v324_v26, 4  ;;  %vm619_vm0 = vcmp.lt.s32.totalorder %v3367_v24, 7 }
  0x4d   : > { %v3749_v35 = vsel %vm619_vm0, %v3367_v24, 7  ;;  %v922_v36 = vrot.slane %v623_v27, 5  ;;  %v1515_v37 = vrot.slane %v623_v27, 6 }
  0x4e   : > { %vm311_vm1 = vcmp.lt.s32.totalorder %v310_v32, 7  ;;  %v323_v39 = vmul.f32 %v321_v33, %v308_v16  ;;  %v3755_v40 = vrot.slane %v3749_v35, 6  ;;  %v624_v41 = vmul.f32 %v623_v27, %v321_v33 }
  0x4f   : > { %v312_v42 = vsel %vm311_vm1, %v310_v32, 7  ;;  %v917_v43 = vmul.u32 8, %v3749_v35  ;;  %v923_v44 = vrot.slane %v922_v36, 4  ;;  %v1512_v45 = vmul.u32 64, %v3749_v35 }
  0x50   : > { %v313_v46 = vmul.u32 64, %v312_v42  ;;  %v314_v47 = vmul.u32 8, %v312_v42  ;;  %v3759_v48 = vrot.slane %v312_v42, 6  ;;  %v3761_v49 = vmul.f32 %v325_v34, %v323_v39 }
  0x51   : > { %v3763_v50 = vmul.f32 %v624_v41, %v325_v34  ;;  %v3765_v51 = vrot.slane %v917_v43, 7  ;;  %v3767_v52 = vmul.f32 %v923_v44, %v308_v16  ;;  %v3769_v53 = vmul.f32 %v923_v44, %v623_v27 }
  0x52   : > { %v315_v54 = vrot.slane %v314_v47, 7  ;;  %v476_v55 = vrot.slane %v3761_v49, %v3705_v11  ;;  %v480_v56 = vrot.slane %v3761_v49, %v3708_v12  ;;  %v3775_v57 = vrot.slane %v1515_v37, 4 }
  0x53   : > { %v774_v58 = vrot.slane %v3763_v50, %v3705_v11  ;;  %v778_v59 = vrot.slane %v3763_v50, %v3708_v12  ;;  %v919_v60 = vadd.s32 %v3765_v51, %v313_v46  ;;  %v3783_v61 = vmul.f32 %v3767_v52, %v325_v34 }
  0x54   : > { %v316_v62 = vadd.s32 %v315_v54, %v313_v46  ;;  %v3786_v63 = vrot.slane %v480_v56, %v3705_v11  ;;  %v3789_v0 = vmul.f32 %v3769_v53, %v325_v34  ;;  %v1513_v1 = vadd.s32 %v1512_v45, %v315_v54 }
  0x55   : > { %v3794_v2 = vrot.slane %v778_v59, %v3705_v11  ;;  %v3797_v3 = vadd.s32 %v919_v60, %v3759_v48  ;;  %v1079_v6 = vrot.slane %v3783_v61, %v3708_v12  ;;  %v3810_v17 = vadd.s32 %v919_v60, %v3755_v40 }
  0x56   : > { %v3804_v8 = vadd.s32 %v3759_v48, %v316_v62  ;;  %v3807_v16 = vadd.s32 %v3755_v40, %v316_v62  ;;  %v1373_v32 = vrot.slane %v3789_v0, %v3708_v12  ;;  %v3830_v37 = vadd.s32 %v1513_v1, %v3759_v48 }
  0x57   : > { %v930_v25 = vrot.slane %v3797_v3, %v3699_v9  ;;  %v934_v26 = vrot.slane %v3797_v3, %v3702_v10  ;;  %v3819_v27 = vrot.slane %v1079_v6, %v3705_v11  ;;  %v1228_v36 = vrot.slane %v3810_v17, %v3702_v10 }
  0x58   : > { %v335_v33 = vrot.slane %v3804_v8, %v3702_v10  ;;  %v633_v34 = vrot.slane %v3807_v16, %v3702_v10  ;;  %v3836_v43 = vrot.slane %v1373_v32, %v3705_v11  ;;  %v3839_v44 = vmul.f32 %v3775_v57, %v323_v39 }
  0x59   : > { %v3833_v42 = vrot.slane %v934_v26, %v3699_v9  ;;  %v3842_v46 = vadd.s32 %v1513_v1, %v3755_v40  ;;  %v3851_v56 = vrot.slane %v1228_v36, %v3699_v9  ;;  %v1526_v59 = vrot.slane %v3830_v37, %v3702_v10 }
  0x5a   : > { %v3845_v47 = vrot.slane %v335_v33, %v3699_v9  ;;  %v3848_v54 = vrot.slane %v633_v34, %v3699_v9  ;;  %v1671_v39 = vrot.slane %v3839_v44, %v3708_v12  ;;  %v3862_v60 = vmul.f32 %v3775_v57, %v624_v41 }
  0x5b   : > { %vm944_vm2 = vcmp.eq.s32.totalorder %v3693_v4, %v3833_v42  ;;  %vm946_vm3 = vcmp.eq.s32.totalorder %v3696_v7, %v3833_v42  ;;  %vm1238_vm8 = vcmp.eq.s32.totalorder %v3693_v4, %v3851_v56  ;;  %vm1240_vm9 = vcmp.eq.s32.totalorder %v3696_v7, %v3851_v56 }
  0x5c   : > { %vm345_vm4 = vcmp.eq.s32.totalorder %v3693_v4, %v3845_v47  ;;  %vm347_vm5 = vcmp.eq.s32.totalorder %v3696_v7, %v3845_v47  ;;  %vm643_vm6 = vcmp.eq.s32.totalorder %v3693_v4, %v3848_v54  ;;  %vm645_vm7 = vcmp.eq.s32.totalorder %v3696_v7, %v3848_v54 }
  0x5d   : > { %v492_v62 = vsel %vm345_vm4, %v3786_v63, 0.0  ;;  %v494_v1 = vsel %vm347_vm5, %v3786_v63, 0.0  ;;  %v3881_v26 = vrot.slane %v1526_v59, %v3699_v9  ;;  %v3884_v32 = vrot.slane %v1671_v39, %v3705_v11 }
  0x5e   : > { %v790_v41 = vsel %vm643_vm6, %v3794_v2, %v492_v62  ;;  %v792_v6 = vsel %vm645_vm7, %v3794_v2, %v494_v1  ;;  %v1819_v36 = vrot.slane %v3842_v46, %v3702_v10  ;;  %v1964_v59 = vrot.slane %v3862_v60, %v3708_v12 }
  0x5f   : > { %v1091_v33 = vsel %vm944_vm2, %v3819_v27, %v790_v41  ;;  %v1093_v34 = vsel %vm946_vm3, %v3819_v27, %v792_v6  ;;  %vm1536_vm10 = vcmp.eq.s32.totalorder %v3693_v4, %v3881_v26  ;;  %vm1538_vm11 = vcmp.eq.s32.totalorder %v3696_v7, %v3881_v26 }
  0x60   : > { %v1385_v62 = vsel %vm1238_vm8, %v3836_v43, %v1091_v33  ;;  %v1387_v39 = vsel %vm1240_vm9, %v3836_v43, %v1093_v34  ;;  %v3907_v6 = vrot.slane %v1819_v36, %v3699_v9  ;;  %v3910_v24 = vrot.slane %v1964_v59, %v3705_v11 }
  0x61   : > { %v1683_v1 = vsel %vm1536_vm10, %v3884_v32, %v1385_v62  ;;  %v1685_v41 = vsel %vm1538_vm11, %v3884_v32, %v1387_v39  ;;  %v2103_v33 = vadd.s32 %v1512_v45, %v3765_v51  ;;  %v3917_v34 = vmul.f32 %v3775_v57, %v3767_v52 }
  0x62   : > { %v3921_v5 = vmul.f32 %v3775_v57, %v3769_v53  ;;  %vm409_vm12 = vcmp.eq.s32.totalorder %v3711_v13, %v3845_v47  ;;  %vm1829_vm13 = vcmp.eq.s32.totalorder %v3693_v4, %v3907_v6  ;;  %vm1831_vm14 = vcmp.eq.s32.totalorder %v3696_v7, %v3907_v6 }
  0x63   : > { %vm411_vm15 = vcmp.eq.s32.totalorder %v3714_v14, %v3845_v47  ;;  %v556_v35 = vsel %vm409_vm12, %v3786_v63, 0.0  ;;  %v1976_v45 = vsel %vm1829_vm13, %v3910_v24, %v1683_v1  ;;  %v1978_v51 = vsel %vm1831_vm14, %v3910_v24, %v1685_v41 }
  0x64   : > { %v3935_v52 = vadd.s32 %v2103_v33, %v3759_v48  ;;  %v2258_v53 = vrot.slane %v3917_v34, %v3708_v12  ;;  %v3940_v57 = vadd.s32 %v2103_v33, %v3755_v40  ;;  %v2551_v36 = vrot.slane %v3921_v5, %v3708_v12 }
  0x65   : > { %v558_v59 = vsel %vm411_vm15, %v3786_v63, 0.0  ;;  %vm707_vm0 = vcmp.eq.s32.totalorder %v3711_v13, %v3848_v54  ;;  %vm709_vm1 = vcmp.eq.s32.totalorder %v3714_v14, %v3848_v54  ;;  %vm1008_vm2 = vcmp.eq.s32.totalorder %v3711_v13, %v3833_v42 }
  0x66   : > { %v2113_v62 = vrot.slane %v3935_v52, %v3702_v10  ;;  %v3950_v48 = vrot.slane %v2258_v53, %v3705_v11  ;;  %v854_v40 = vsel %vm707_vm0, %v3794_v2, %v556_v35  ;;  %v2406_v39 = vrot.slane %v3940_v57, %v3702_v10 }
  0x67   : > { %v3958_v12 = vrot.slane %v2551_v36, %v3705_v11  ;;  %v856_v1 = vsel %vm709_vm1, %v3794_v2, %v558_v59  ;;  %vm1010_vm3 = vcmp.eq.s32.totalorder %v3714_v14, %v3833_v42  ;;  %v1155_v33 = vsel %vm1008_vm2, %v3819_v27, %v854_v40 }
  0x68   : > { %v3964_v41 = vrot.slane %v2113_v62, %v3699_v9  ;;  %vm1302_vm4 = vcmp.eq.s32.totalorder %v3711_v13, %v3851_v56  ;;  %v3972_v10 = vrot.slane %v2406_v39, %v3699_v9  ;;  %v1157_v35 = vsel %vm1010_vm3, %v3819_v27, %v856_v1 }
  0x69   : > { %vm1304_vm5 = vcmp.eq.s32.totalorder %v3714_v14, %v3851_v56  ;;  %v1449_v53 = vsel %vm1302_vm4, %v3836_v43, %v1155_v33  ;;  %vm1600_vm8 = vcmp.eq.s32.totalorder %v3711_v13, %v3881_v26  ;;  %vm1602_vm11 = vcmp.eq.s32.totalorder %v3714_v14, %v3881_v26 }
  0x6a   : > { %vm2123_vm6 = vcmp.eq.s32.totalorder %v3693_v4, %v3964_v41  ;;  %vm2125_vm7 = vcmp.eq.s32.totalorder %v3696_v7, %v3964_v41  ;;  %v1451_v36 = vsel %vm1304_vm5, %v3836_v43, %v1157_v35  ;;  %vm2416_vm9 = vcmp.eq.s32.totalorder %v3693_v4, %v3972_v10 }
  0x6b   : > { %v2270_v59 = vsel %vm2123_vm6, %v3950_v48, %v1976_v45  ;;  %v2272_v62 = vsel %vm2125_vm7, %v3950_v48, %v1978_v51  ;;  %vm2418_vm10 = vcmp.eq.s32.totalorder %v3696_v7, %v3972_v10  ;;  %v1747_v1 = vsel %vm1600_vm8, %v3884_v32, %v1449_v53 }
  0x6c   : > { %v2563_v40 = vsel %vm2416_vm9, %v3958_v12, %v2270_v59  ;;  %v2565_v39 = vsel %vm2418_vm10, %v3958_v12, %v2272_v62  ;;  %v1749_v45 = vsel %vm1602_vm11, %v3884_v32, %v1451_v36  ;;  %vm1893_vm12 = vcmp.eq.s32.totalorder %v3711_v13, %v3907_v6 }
  0x6d   : > { %v3197_v33 = vpack.c.bf16 %v2565_v39, %v2563_v40  ;;  %vm1895_vm13 = vcmp.eq.s32.totalorder %v3714_v14, %v3907_v6  ;;  %v2040_v51 = vsel %vm1893_vm12, %v3910_v24, %v1747_v1  ;;  %vm2187_vm14 = vcmp.eq.s32.totalorder %v3711_v13, %v3964_v41 }
  0x6e   : > { %v2042_v35 = vsel %vm1895_vm13, %v3910_v24, %v1749_v45  ;;  %vm2189_vm15 = vcmp.eq.s32.totalorder %v3714_v14, %v3964_v41  ;;  %v2334_v53 = vsel %vm2187_vm14, %v3950_v48, %v2040_v51  ;;  %vm2480_vm0 = vcmp.eq.s32.totalorder %v3711_v13, %v3972_v10 }
  0x6f   : > { %3198 = vmatprep.subr.bf16.mxu1 %v3197_v33  ;;  %v2336_v36 = vsel %vm2189_vm15, %v3950_v48, %v2042_v35  ;;  %vm2482_vm1 = vcmp.eq.s32.totalorder %v3714_v14, %v3972_v10  ;;  %v2627_v59 = vsel %vm2480_vm0, %v3958_v12, %v2334_v53  ;;  %v331_v40 = vrot.slane %v3804_v8, %v3699_v9 }
  0x70   : > { %v2629_v62 = vsel %vm2482_vm1, %v3958_v12, %v2336_v36  ;;  %v4021_v39 = vrot.slane %v476_v55, %v3705_v11  ;;  %v629_v33 = vrot.slane %v3807_v16, %v3699_v9  ;;  %v4029_v45 = vrot.slane %v774_v58, %v3705_v11 }
  0x71   : > { %v3261_v1 = vpack.c.bf16 %v2629_v62, %v2627_v59  ;;  %v4035_v8 = vrot.slane %v930_v25, %v3699_v9  ;;  %v4038_v49 = vrot.slane %v331_v40, %v3699_v9  ;;  %v7358_v55 = vrot.slane %v3783_v61, %v3705_v11 }
  0x72   : > { %v1224_v50 = vrot.slane %v3810_v17, %v3699_v9  ;;  %v7359_v58 = vrot.slane %v3789_v0, %v3705_v11  ;;  %v4055_v3 = vrot.slane %v629_v33, %v3699_v9  ;;  %v1522_v61 = vrot.slane %v3830_v37, %v3699_v9 }
  0x73   : > { %v4044_v16 = vrot.slane %v7358_v55, %v3705_v11  ;;  %3262 = vmatprep.subr.bf16.mxu0 %v3261_v1  ;;  %vm943_vm2 = vcmp.eq.s32.totalorder %v3693_v4, %v4035_v8  ;;  %vm945_vm3 = vcmp.eq.s32.totalorder %v3696_v7, %v4035_v8  ;;  %vm344_vm4 = vcmp.eq.s32.totalorder %v3693_v4, %v4038_v49 }
  0x74   : > { %v4052_v51 = vrot.slane %v7359_v58, %v3705_v11  ;;  %vm346_vm5 = vcmp.eq.s32.totalorder %v3696_v7, %v4038_v49  ;;  %v4068_v0 = vrot.slane %v1224_v50, %v3699_v9  ;;  %v1667_v17 = vrot.slane %v3839_v44, %v3705_v11 }
  0x75   : > { %v491_v25 = vsel %vm344_vm4, %v4021_v39, 0.0  ;;  %v493_v35 = vsel %vm346_vm5, %v4021_v39, 0.0  ;;  %vm642_vm6 = vcmp.eq.s32.totalorder %v3693_v4, %v4055_v3  ;;  %vm644_vm7 = vcmp.eq.s32.totalorder %v3696_v7, %v4055_v3 }
  0x76   : > { %v789_v37 = vsel %vm642_vm6, %v4029_v45, %v491_v25  ;;  %v791_v53 = vsel %vm644_vm7, %v4029_v45, %v493_v35  ;;  %vm1237_vm8 = vcmp.eq.s32.totalorder %v3693_v4, %v4068_v0  ;;  %vm1239_vm9 = vcmp.eq.s32.totalorder %v3696_v7, %v4068_v0 }
  0x77   : > { %v1090_v44 = vsel %vm943_vm2, %v4044_v16, %v789_v37  ;;  %v1092_v36 = vsel %vm945_vm3, %v4044_v16, %v791_v53  ;;  %v4087_v59 = vrot.slane %v1522_v61, %v3699_v9  ;;  %v4090_v62 = vrot.slane %v1667_v17, %v3705_v11 }
  0x78   : > { %v1384_v40 = vsel %vm1237_vm8, %v4052_v51, %v1090_v44  ;;  %v1386_v1 = vsel %vm1239_vm9, %v4052_v51, %v1092_v36  ;;  %v1815_v33 = vrot.slane %v3842_v46, %v3699_v9  ;;  %v1960_v55 = vrot.slane %v3862_v60, %v3705_v11 }
  0x79   : > { %vm1535_vm10 = vcmp.eq.s32.totalorder %v3693_v4, %v4087_v59  ;;  %vm1537_vm11 = vcmp.eq.s32.totalorder %v3696_v7, %v4087_v59  ;;  %v2109_v50 = vrot.slane %v3935_v52, %v3699_v9  ;;  %v2254_v58 = vrot.slane %v3917_v34, %v3705_v11 }
  0x7a   : > { %v1682_v61 = vsel %vm1535_vm10, %v4090_v62, %v1384_v40  ;;  %v1684_v17 = vsel %vm1537_vm11, %v4090_v62, %v1386_v1  ;;  %v4109_v46 = vrot.slane %v1815_v33, %v3699_v9  ;;  %v4112_v60 = vrot.slane %v1960_v55, %v3705_v11 }
  0x7b   : > { %v4115_v25 = vrot.slane %v2109_v50, %v3699_v9  ;;  %v4118_v35 = vrot.slane %v2254_v58, %v3705_v11  ;;  %v2402_v52 = vrot.slane %v3940_v57, %v3699_v9  ;;  %v2547_v34 = vrot.slane %v3921_v5, %v3705_v11 }
  0x7c   : > { %vm1828_vm12 = vcmp.eq.s32.totalorder %v3693_v4, %v4109_v46  ;;  %vm1830_vm13 = vcmp.eq.s32.totalorder %v3696_v7, %v4109_v46  ;;  %vm408_vm14 = vcmp.eq.s32.totalorder %v3711_v13, %v4038_v49  ;;  %vm410_vm15 = vcmp.eq.s32.totalorder %v3714_v14, %v4038_v49 }
  0x7d   : > { %v1975_v37 = vsel %vm1828_vm12, %v4112_v60, %v1682_v61  ;;  %v1977_v53 = vsel %vm1830_vm13, %v4112_v60, %v1684_v17  ;;  %vm2122_vm0 = vcmp.eq.s32.totalorder %v3693_v4, %v4115_v25  ;;  %vm2124_vm1 = vcmp.eq.s32.totalorder %v3696_v7, %v4115_v25 }
  0x7e   : > { %v2269_v5 = vsel %vm2122_vm0, %v4118_v35, %v1975_v37  ;;  %v2271_v57 = vsel %vm2124_vm1, %v4118_v35, %v1977_v53  ;;  %v4141_v44 = vrot.slane %v2402_v52, %v3699_v9  ;;  %v4144_v36 = vrot.slane %v2547_v34, %v3705_v11 }
  0x7f   : > { %v555_v40 = vsel %vm408_vm14, %v4021_v39, 0.0  ;;  %v557_v1 = vsel %vm410_vm15, %v4021_v39, 0.0  ;;  %vm706_vm2 = vcmp.eq.s32.totalorder %v3711_v13, %v4055_v3  ;;  %vm708_vm3 = vcmp.eq.s32.totalorder %v3714_v14, %v4055_v3 }
  0x80   : > { %vm2415_vm4 = vcmp.eq.s32.totalorder %v3693_v4, %v4141_v44  ;;  %vm2417_vm5 = vcmp.eq.s32.totalorder %v3696_v7, %v4141_v44  ;;  %v853_v9 = vsel %vm706_vm2, %v4029_v45, %v555_v40  ;;  %v855_v11 = vsel %vm708_vm3, %v4029_v45, %v557_v1 }
  0x81   : > { %v2562_v33 = vsel %vm2415_vm4, %v4144_v36, %v2269_v5  ;;  %v2564_v55 = vsel %vm2417_vm5, %v4144_v36, %v2271_v57  ;;  %vm1007_vm6 = vcmp.eq.s32.totalorder %v3711_v13, %v4035_v8  ;;  %vm1009_vm7 = vcmp.eq.s32.totalorder %v3714_v14, %v4035_v8 }
  0x82   : > { %v3199_v50 = vpack.c.bf16 %v2564_v55, %v2562_v33  ;;  %v1154_v58 = vsel %vm1007_vm6, %v4044_v16, %v853_v9  ;;  %v1156_v61 = vsel %vm1009_vm7, %v4044_v16, %v855_v11  ;;  %vm1301_vm8 = vcmp.eq.s32.totalorder %v3711_v13, %v4068_v0 }
  0x83   : > { %vm1303_vm9 = vcmp.eq.s32.totalorder %v3714_v14, %v4068_v0  ;;  %v1448_v7 = vsel %vm1301_vm8, %v4052_v51, %v1154_v58  ;;  %vm1599_vm10 = vcmp.eq.s32.totalorder %v3711_v13, %v4087_v59  ;;  %vm1601_vm11 = vcmp.eq.s32.totalorder %v3714_v14, %v4087_v59 }
  0x84   : > { %3200 = vmatpush1.bf16.msra.mxu1 %v3199_v50  ;;  %v1450_v17 = vsel %vm1303_vm9, %v4052_v51, %v1156_v61  ;;  %v1746_v52 = vsel %vm1599_vm10, %v4090_v62, %v1448_v7  ;;  %vm1892_vm12 = vcmp.eq.s32.totalorder %v3711_v13, %v4109_v46  ;;  %vm1894_vm13 = vcmp.eq.s32.totalorder %v3714_v14, %v4109_v46 }
  0x85   : > { %v1748_v34 = vsel %vm1601_vm11, %v4090_v62, %v1450_v17  ;;  %v2039_v37 = vsel %vm1892_vm12, %v4112_v60, %v1746_v52  ;;  %vm2186_vm14 = vcmp.eq.s32.totalorder %v3711_v13, %v4115_v25  ;;  %vm2188_vm15 = vcmp.eq.s32.totalorder %v3714_v14, %v4115_v25 }
  0x86   : > { %v2041_v53 = vsel %vm1894_vm13, %v4112_v60, %v1748_v34  ;;  %v2333_v5 = vsel %vm2186_vm14, %v4118_v35, %v2039_v37  ;;  %vm2479_vm0 = vcmp.eq.s32.totalorder %v3711_v13, %v4141_v44  ;;  %vm2481_vm1 = vcmp.eq.s32.totalorder %v3714_v14, %v4141_v44 }
  0x87   : > { %v2335_v57 = vsel %vm2188_vm15, %v4118_v35, %v2041_v53  ;;  %v2626_v40 = vsel %vm2479_vm0, %v4144_v36, %v2333_v5  ;;  %vm349_vm2 = vcmp.eq.s32.totalorder %v3717_v15, %v3845_v47  ;;  %vm351_vm3 = vcmp.eq.s32.totalorder %v3720_v18, %v3845_v47 }
  0x88   : > { %v2628_v1 = vsel %vm2481_vm1, %v4144_v36, %v2335_v57  ;;  %v496_v9 = vsel %vm349_vm2, %v3786_v63, 0.0  ;;  %v498_v11 = vsel %vm351_vm3, %v3786_v63, 0.0  ;;  %vm647_vm4 = vcmp.eq.s32.totalorder %v3717_v15, %v3848_v54 }
  0x89   : > { %v3263_v13 = vpack.c.bf16 %v2628_v1, %v2626_v40  ;;  %vm649_vm5 = vcmp.eq.s32.totalorder %v3720_v18, %v3848_v54  ;;  %v794_v14 = vsel %vm647_vm4, %v3794_v2, %v496_v9  ;;  %vm948_vm6 = vcmp.eq.s32.totalorder %v3717_v15, %v3833_v42 }
  0x8a   : > { %v796_v33 = vsel %vm649_vm5, %v3794_v2, %v498_v11  ;;  %vm950_vm7 = vcmp.eq.s32.totalorder %v3720_v18, %v3833_v42  ;;  %v1095_v55 = vsel %vm948_vm6, %v3819_v27, %v794_v14  ;;  %vm1242_vm8 = vcmp.eq.s32.totalorder %v3717_v15, %v3851_v56 }
  0x8b   : > { %3264 = vmatpush1.bf16.msra.mxu0 %v3263_v13  ;;  %v1097_v50 = vsel %vm950_vm7, %v3819_v27, %v796_v33  ;;  %vm1244_vm9 = vcmp.eq.s32.totalorder %v3720_v18, %v3851_v56  ;;  %v1389_v58 = vsel %vm1242_vm8, %v3836_v43, %v1095_v55  ;;  %vm1540_vm10 = vcmp.eq.s32.totalorder %v3717_v15, %v3881_v26 }
  0x8c   : > { %v1391_v61 = vsel %vm1244_vm9, %v3836_v43, %v1097_v50  ;;  %vm1542_vm11 = vcmp.eq.s32.totalorder %v3720_v18, %v3881_v26  ;;  %v1687_v7 = vsel %vm1540_vm10, %v3884_v32, %v1389_v58  ;;  %vm1833_vm12 = vcmp.eq.s32.totalorder %v3717_v15, %v3907_v6 }
  0x8d   : > { %v1689_v17 = vsel %vm1542_vm11, %v3884_v32, %v1391_v61  ;;  %vm1835_vm13 = vcmp.eq.s32.totalorder %v3720_v18, %v3907_v6  ;;  %v1980_v52 = vsel %vm1833_vm12, %v3910_v24, %v1687_v7  ;;  %vm2127_vm14 = vcmp.eq.s32.totalorder %v3717_v15, %v3964_v41 }
  0x8e   : > { %v1982_v34 = vsel %vm1835_vm13, %v3910_v24, %v1689_v17  ;;  %vm2129_vm15 = vcmp.eq.s32.totalorder %v3720_v18, %v3964_v41  ;;  %v2274_v37 = vsel %vm2127_vm14, %v3950_v48, %v1980_v52  ;;  %vm2420_vm0 = vcmp.eq.s32.totalorder %v3717_v15, %v3972_v10 }
  0x8f   : > { %v2276_v53 = vsel %vm2129_vm15, %v3950_v48, %v1982_v34  ;;  %vm2422_vm1 = vcmp.eq.s32.totalorder %v3720_v18, %v3972_v10  ;;  %v2567_v5 = vsel %vm2420_vm0, %v3958_v12, %v2274_v37  ;;  %vm413_vm2 = vcmp.eq.s32.totalorder %v3723_v19, %v3845_v47 }
  0x90   : > { %v2569_v57 = vsel %vm2422_vm1, %v3958_v12, %v2276_v53  ;;  %vm415_vm3 = vcmp.eq.s32.totalorder %v3726_v20, %v3845_v47  ;;  %v560_v40 = vsel %vm413_vm2, %v3786_v63, 0.0  ;;  %vm711_vm4 = vcmp.eq.s32.totalorder %v3723_v19, %v3848_v54 }
  0x91   : > { %v3201_v1 = vpack.c.bf16 %v2569_v57, %v2567_v5  ;;  %v562_v9 = vsel %vm415_vm3, %v3786_v63, 0.0  ;;  %vm713_vm5 = vcmp.eq.s32.totalorder %v3726_v20, %v3848_v54  ;;  %v858_v11 = vsel %vm711_vm4, %v3794_v2, %v560_v40 }
  0x92   : > { %v860_v13 = vsel %vm713_vm5, %v3794_v2, %v562_v9  ;;  %vm1012_vm6 = vcmp.eq.s32.totalorder %v3723_v19, %v3833_v42  ;;  %vm1014_vm7 = vcmp.eq.s32.totalorder %v3726_v20, %v3833_v42  ;;  %vm1306_vm8 = vcmp.eq.s32.totalorder %v3723_v19, %v3851_v56 }
  0x93   : > { %3202 = vmatprep.subr.bf16.mxu1 %v3201_v1  ;;  %v1159_v14 = vsel %vm1012_vm6, %v3819_v27, %v858_v11  ;;  %v1161_v33 = vsel %vm1014_vm7, %v3819_v27, %v860_v13  ;;  %vm1308_vm9 = vcmp.eq.s32.totalorder %v3726_v20, %v3851_v56  ;;  %vm1604_vm10 = vcmp.eq.s32.totalorder %v3723_v19, %v3881_v26 }
  0x94   : > { %v1453_v55 = vsel %vm1306_vm8, %v3836_v43, %v1159_v14  ;;  %v1455_v50 = vsel %vm1308_vm9, %v3836_v43, %v1161_v33  ;;  %vm1606_vm11 = vcmp.eq.s32.totalorder %v3726_v20, %v3881_v26  ;;  %vm1897_vm12 = vcmp.eq.s32.totalorder %v3723_v19, %v3907_v6 }
  0x95   : > { %v1751_v58 = vsel %vm1604_vm10, %v3884_v32, %v1453_v55  ;;  %v1753_v61 = vsel %vm1606_vm11, %v3884_v32, %v1455_v50  ;;  %vm1899_vm13 = vcmp.eq.s32.totalorder %v3726_v20, %v3907_v6  ;;  %vm2191_vm14 = vcmp.eq.s32.totalorder %v3723_v19, %v3964_v41 }
  0x96   : > { %v2044_v7 = vsel %vm1897_vm12, %v3910_v24, %v1751_v58  ;;  %v2046_v17 = vsel %vm1899_vm13, %v3910_v24, %v1753_v61  ;;  %vm2193_vm15 = vcmp.eq.s32.totalorder %v3726_v20, %v3964_v41  ;;  %vm2484_vm0 = vcmp.eq.s32.totalorder %v3723_v19, %v3972_v10 }
  0x97   : > { %v2338_v52 = vsel %vm2191_vm14, %v3950_v48, %v2044_v7  ;;  %v2340_v34 = vsel %vm2193_vm15, %v3950_v48, %v2046_v17  ;;  %vm2486_vm1 = vcmp.eq.s32.totalorder %v3726_v20, %v3972_v10  ;;  %vm348_vm2 = vcmp.eq.s32.totalorder %v3717_v15, %v4038_v49 }
  0x98   : > { %v2631_v37 = vsel %vm2484_vm0, %v3958_v12, %v2338_v52  ;;  %v2633_v53 = vsel %vm2486_vm1, %v3958_v12, %v2340_v34  ;;  %vm350_vm3 = vcmp.eq.s32.totalorder %v3720_v18, %v4038_v49  ;;  %v495_v5 = vsel %vm348_vm2, %v4021_v39, 0.0 }
  0x99   : > { %v3265_v57 = vpack.c.bf16 %v2633_v53, %v2631_v37  ;;  %v497_v40 = vsel %vm350_vm3, %v4021_v39, 0.0  ;;  %vm646_vm4 = vcmp.eq.s32.totalorder %v3717_v15, %v4055_v3  ;;  %vm648_vm5 = vcmp.eq.s32.totalorder %v3720_v18, %v4055_v3 }
  0x9a   : > { %v793_v1 = vsel %vm646_vm4, %v4029_v45, %v495_v5  ;;  %v795_v9 = vsel %vm648_vm5, %v4029_v45, %v497_v40  ;;  %vm947_vm6 = vcmp.eq.s32.totalorder %v3717_v15, %v4035_v8  ;;  %vm949_vm7 = vcmp.eq.s32.totalorder %v3720_v18, %v4035_v8 }
  0x9b   : > { %3266 = vmatprep.subr.bf16.mxu0 %v3265_v57  ;;  %v1094_v11 = vsel %vm947_vm6, %v4044_v16, %v793_v1  ;;  %v1096_v13 = vsel %vm949_vm7, %v4044_v16, %v795_v9  ;;  %vm1241_vm8 = vcmp.eq.s32.totalorder %v3717_v15, %v4068_v0  ;;  %vm1243_vm9 = vcmp.eq.s32.totalorder %v3720_v18, %v4068_v0 }
  0x9c   : > { %v1388_v14 = vsel %vm1241_vm8, %v4052_v51, %v1094_v11  ;;  %v1390_v33 = vsel %vm1243_vm9, %v4052_v51, %v1096_v13  ;;  %vm1539_vm10 = vcmp.eq.s32.totalorder %v3717_v15, %v4087_v59  ;;  %vm1541_vm11 = vcmp.eq.s32.totalorder %v3720_v18, %v4087_v59 }
  0x9d   : > { %v1686_v55 = vsel %vm1539_vm10, %v4090_v62, %v1388_v14  ;;  %v1688_v50 = vsel %vm1541_vm11, %v4090_v62, %v1390_v33  ;;  %vm1832_vm12 = vcmp.eq.s32.totalorder %v3717_v15, %v4109_v46  ;;  %vm1834_vm13 = vcmp.eq.s32.totalorder %v3720_v18, %v4109_v46 }
  0x9e   : > { %v1979_v58 = vsel %vm1832_vm12, %v4112_v60, %v1686_v55  ;;  %v1981_v61 = vsel %vm1834_vm13, %v4112_v60, %v1688_v50  ;;  %vm2126_vm14 = vcmp.eq.s32.totalorder %v3717_v15, %v4115_v25  ;;  %vm2128_vm15 = vcmp.eq.s32.totalorder %v3720_v18, %v4115_v25 }
  0x9f   : > { %v2273_v7 = vsel %vm2126_vm14, %v4118_v35, %v1979_v58  ;;  %v2275_v17 = vsel %vm2128_vm15, %v4118_v35, %v1981_v61  ;;  %vm2419_vm0 = vcmp.eq.s32.totalorder %v3717_v15, %v4141_v44  ;;  %vm2421_vm1 = vcmp.eq.s32.totalorder %v3720_v18, %v4141_v44 }
  0xa0   : > { %v2566_v52 = vsel %vm2419_vm0, %v4144_v36, %v2273_v7  ;;  %v2568_v34 = vsel %vm2421_vm1, %v4144_v36, %v2275_v17  ;;  %vm412_vm2 = vcmp.eq.s32.totalorder %v3723_v19, %v4038_v49  ;;  %vm414_vm3 = vcmp.eq.s32.totalorder %v3726_v20, %v4038_v49 }
  0xa1   : > { %v3203_v37 = vpack.c.bf16 %v2568_v34, %v2566_v52  ;;  %v559_v53 = vsel %vm412_vm2, %v4021_v39, 0.0  ;;  %v561_v5 = vsel %vm414_vm3, %v4021_v39, 0.0  ;;  %vm710_vm4 = vcmp.eq.s32.totalorder %v3723_v19, %v4055_v3 }
  0xa2   : > { %vm712_vm5 = vcmp.eq.s32.totalorder %v3726_v20, %v4055_v3  ;;  %v857_v15 = vsel %vm710_vm4, %v4029_v45, %v559_v53  ;;  %vm1011_vm6 = vcmp.eq.s32.totalorder %v3723_v19, %v4035_v8  ;;  %vm1013_vm7 = vcmp.eq.s32.totalorder %v3726_v20, %v4035_v8 }
  0xa3   : > { %3204 = vmatpush1.bf16.msra.mxu1 %v3203_v37  ;;  %v859_v18 = vsel %vm712_vm5, %v4029_v45, %v561_v5  ;;  %v1158_v57 = vsel %vm1011_vm6, %v4044_v16, %v857_v15  ;;  %vm1305_vm8 = vcmp.eq.s32.totalorder %v3723_v19, %v4068_v0  ;;  %vm1307_vm9 = vcmp.eq.s32.totalorder %v3726_v20, %v4068_v0 }
  0xa4   : > { %v1160_v40 = vsel %vm1013_vm7, %v4044_v16, %v859_v18  ;;  %v1452_v1 = vsel %vm1305_vm8, %v4052_v51, %v1158_v57  ;;  %vm1603_vm10 = vcmp.eq.s32.totalorder %v3723_v19, %v4087_v59  ;;  %vm1605_vm11 = vcmp.eq.s32.totalorder %v3726_v20, %v4087_v59 }
  0xa5   : > { %v1454_v9 = vsel %vm1307_vm9, %v4052_v51, %v1160_v40  ;;  %v1750_v11 = vsel %vm1603_vm10, %v4090_v62, %v1452_v1  ;;  %vm1896_vm12 = vcmp.eq.s32.totalorder %v3723_v19, %v4109_v46  ;;  %vm1898_vm13 = vcmp.eq.s32.totalorder %v3726_v20, %v4109_v46 }
  0xa6   : > { %v1752_v13 = vsel %vm1605_vm11, %v4090_v62, %v1454_v9  ;;  %v2043_v14 = vsel %vm1896_vm12, %v4112_v60, %v1750_v11  ;;  %vm2190_vm14 = vcmp.eq.s32.totalorder %v3723_v19, %v4115_v25  ;;  %vm2192_vm15 = vcmp.eq.s32.totalorder %v3726_v20, %v4115_v25 }
  0xa7   : > { %v2045_v33 = vsel %vm1898_vm13, %v4112_v60, %v1752_v13  ;;  %v2337_v55 = vsel %vm2190_vm14, %v4118_v35, %v2043_v14  ;;  %vm2483_vm0 = vcmp.eq.s32.totalorder %v3723_v19, %v4141_v44  ;;  %vm2485_vm1 = vcmp.eq.s32.totalorder %v3726_v20, %v4141_v44 }
  0xa8   : > { %v2339_v50 = vsel %vm2192_vm15, %v4118_v35, %v2045_v33  ;;  %v2630_v58 = vsel %vm2483_vm0, %v4144_v36, %v2337_v55  ;;  %vm353_vm2 = vcmp.eq.s32.totalorder %v3729_v21, %v3845_v47  ;;  %vm355_vm3 = vcmp.eq.s32.totalorder %v3732_v22, %v3845_v47 }
  0xa9   : > { %v2632_v61 = vsel %vm2485_vm1, %v4144_v36, %v2339_v50  ;;  %v500_v7 = vsel %vm353_vm2, %v3786_v63, 0.0  ;;  %v502_v17 = vsel %vm355_vm3, %v3786_v63, 0.0  ;;  %vm651_vm4 = vcmp.eq.s32.totalorder %v3729_v21, %v3848_v54 }
  0xaa   : > { %v3267_v19 = vpack.c.bf16 %v2632_v61, %v2630_v58  ;;  %vm653_vm5 = vcmp.eq.s32.totalorder %v3732_v22, %v3848_v54  ;;  %v798_v20 = vsel %vm651_vm4, %v3794_v2, %v500_v7  ;;  %vm952_vm6 = vcmp.eq.s32.totalorder %v3729_v21, %v3833_v42 }
  0xab   : > { %v800_v52 = vsel %vm653_vm5, %v3794_v2, %v502_v17  ;;  %vm954_vm7 = vcmp.eq.s32.totalorder %v3732_v22, %v3833_v42  ;;  %v1099_v34 = vsel %vm952_vm6, %v3819_v27, %v798_v20  ;;  %vm1246_vm8 = vcmp.eq.s32.totalorder %v3729_v21, %v3851_v56 }
  0xac   : > { %3268 = vmatpush1.bf16.msra.mxu0 %v3267_v19  ;;  %v1101_v37 = vsel %vm954_vm7, %v3819_v27, %v800_v52  ;;  %vm1248_vm9 = vcmp.eq.s32.totalorder %v3732_v22, %v3851_v56  ;;  %v1393_v53 = vsel %vm1246_vm8, %v3836_v43, %v1099_v34  ;;  %vm1544_vm10 = vcmp.eq.s32.totalorder %v3729_v21, %v3881_v26 }
  0xad   : > { %v1395_v5 = vsel %vm1248_vm9, %v3836_v43, %v1101_v37  ;;  %vm1546_vm11 = vcmp.eq.s32.totalorder %v3732_v22, %v3881_v26  ;;  %v1691_v15 = vsel %vm1544_vm10, %v3884_v32, %v1393_v53  ;;  %vm1837_vm12 = vcmp.eq.s32.totalorder %v3729_v21, %v3907_v6 }
  0xae   : > { %v1693_v18 = vsel %vm1546_vm11, %v3884_v32, %v1395_v5  ;;  %vm1839_vm13 = vcmp.eq.s32.totalorder %v3732_v22, %v3907_v6  ;;  %v1984_v57 = vsel %vm1837_vm12, %v3910_v24, %v1691_v15  ;;  %vm2131_vm14 = vcmp.eq.s32.totalorder %v3729_v21, %v3964_v41 }
  0xaf   : > { %v1986_v40 = vsel %vm1839_vm13, %v3910_v24, %v1693_v18  ;;  %vm2133_vm15 = vcmp.eq.s32.totalorder %v3732_v22, %v3964_v41  ;;  %v2278_v1 = vsel %vm2131_vm14, %v3950_v48, %v1984_v57  ;;  %vm2424_vm0 = vcmp.eq.s32.totalorder %v3729_v21, %v3972_v10 }
  0xb0   : > { %v2280_v9 = vsel %vm2133_vm15, %v3950_v48, %v1986_v40  ;;  %vm2426_vm1 = vcmp.eq.s32.totalorder %v3732_v22, %v3972_v10  ;;  %v2571_v11 = vsel %vm2424_vm0, %v3958_v12, %v2278_v1  ;;  %vm417_vm2 = vcmp.eq.s32.totalorder %v3735_v23, %v3845_v47 }
  0xb1   : > { %v2573_v13 = vsel %vm2426_vm1, %v3958_v12, %v2280_v9  ;;  %vm419_vm3 = vcmp.eq.s32.totalorder %v3738_v28, %v3845_v47  ;;  %v564_v14 = vsel %vm417_vm2, %v3786_v63, 0.0  ;;  %vm715_vm4 = vcmp.eq.s32.totalorder %v3735_v23, %v3848_v54 }
  0xb2   : > { %v3205_v33 = vpack.c.bf16 %v2573_v13, %v2571_v11  ;;  %v566_v55 = vsel %vm419_vm3, %v3786_v63, 0.0  ;;  %vm717_vm5 = vcmp.eq.s32.totalorder %v3738_v28, %v3848_v54  ;;  %v862_v50 = vsel %vm715_vm4, %v3794_v2, %v564_v14 }
  0xb3   : > { %v864_v58 = vsel %vm717_vm5, %v3794_v2, %v566_v55  ;;  %vm1016_vm6 = vcmp.eq.s32.totalorder %v3735_v23, %v3833_v42  ;;  %vm1018_vm7 = vcmp.eq.s32.totalorder %v3738_v28, %v3833_v42  ;;  %vm1310_vm8 = vcmp.eq.s32.totalorder %v3735_v23, %v3851_v56 }
  0xb4   : > { %3206 = vmatprep.subr.bf16.mxu1 %v3205_v33  ;;  %v1163_v61 = vsel %vm1016_vm6, %v3819_v27, %v862_v50  ;;  %v1165_v7 = vsel %vm1018_vm7, %v3819_v27, %v864_v58  ;;  %vm1312_vm9 = vcmp.eq.s32.totalorder %v3738_v28, %v3851_v56  ;;  %vm1608_vm10 = vcmp.eq.s32.totalorder %v3735_v23, %v3881_v26 }
  0xb5   : > { %v1457_v17 = vsel %vm1310_vm8, %v3836_v43, %v1163_v61  ;;  %v1459_v19 = vsel %vm1312_vm9, %v3836_v43, %v1165_v7  ;;  %vm1610_vm11 = vcmp.eq.s32.totalorder %v3738_v28, %v3881_v26  ;;  %vm1901_vm12 = vcmp.eq.s32.totalorder %v3735_v23, %v3907_v6 }
  0xb6   : > { %v1755_v20 = vsel %vm1608_vm10, %v3884_v32, %v1457_v17  ;;  %v1757_v52 = vsel %vm1610_vm11, %v3884_v32, %v1459_v19  ;;  %vm1903_vm13 = vcmp.eq.s32.totalorder %v3738_v28, %v3907_v6  ;;  %vm2195_vm14 = vcmp.eq.s32.totalorder %v3735_v23, %v3964_v41 }
  0xb7   : > { %v2048_v34 = vsel %vm1901_vm12, %v3910_v24, %v1755_v20  ;;  %v2050_v37 = vsel %vm1903_vm13, %v3910_v24, %v1757_v52  ;;  %vm2197_vm15 = vcmp.eq.s32.totalorder %v3738_v28, %v3964_v41  ;;  %vm2488_vm0 = vcmp.eq.s32.totalorder %v3735_v23, %v3972_v10 }
  0xb8   : > { %v2342_v53 = vsel %vm2195_vm14, %v3950_v48, %v2048_v34  ;;  %v2344_v5 = vsel %vm2197_vm15, %v3950_v48, %v2050_v37  ;;  %vm2490_vm1 = vcmp.eq.s32.totalorder %v3738_v28, %v3972_v10  ;;  %vm352_vm2 = vcmp.eq.s32.totalorder %v3729_v21, %v4038_v49 }
  0xb9   : > { %v2635_v15 = vsel %vm2488_vm0, %v3958_v12, %v2342_v53  ;;  %v2637_v18 = vsel %vm2490_vm1, %v3958_v12, %v2344_v5  ;;  %vm354_vm3 = vcmp.eq.s32.totalorder %v3732_v22, %v4038_v49  ;;  %v499_v57 = vsel %vm352_vm2, %v4021_v39, 0.0 }
  0xba   : > { %v3269_v40 = vpack.c.bf16 %v2637_v18, %v2635_v15  ;;  %v501_v1 = vsel %vm354_vm3, %v4021_v39, 0.0  ;;  %vm650_vm4 = vcmp.eq.s32.totalorder %v3729_v21, %v4055_v3  ;;  %vm652_vm5 = vcmp.eq.s32.totalorder %v3732_v22, %v4055_v3 }
  0xbb   : > { %v797_v9 = vsel %vm650_vm4, %v4029_v45, %v499_v57  ;;  %v799_v11 = vsel %vm652_vm5, %v4029_v45, %v501_v1  ;;  %vm951_vm6 = vcmp.eq.s32.totalorder %v3729_v21, %v4035_v8  ;;  %vm953_vm7 = vcmp.eq.s32.totalorder %v3732_v22, %v4035_v8 }
  0xbc   : > { %3270 = vmatprep.subr.bf16.mxu0 %v3269_v40  ;;  %v1098_v13 = vsel %vm951_vm6, %v4044_v16, %v797_v9  ;;  %v1100_v14 = vsel %vm953_vm7, %v4044_v16, %v799_v11  ;;  %vm1245_vm8 = vcmp.eq.s32.totalorder %v3729_v21, %v4068_v0  ;;  %vm1247_vm9 = vcmp.eq.s32.totalorder %v3732_v22, %v4068_v0 }
  0xbd   : > { %v1392_v33 = vsel %vm1245_vm8, %v4052_v51, %v1098_v13  ;;  %v1394_v55 = vsel %vm1247_vm9, %v4052_v51, %v1100_v14  ;;  %vm1543_vm10 = vcmp.eq.s32.totalorder %v3729_v21, %v4087_v59  ;;  %vm1545_vm11 = vcmp.eq.s32.totalorder %v3732_v22, %v4087_v59 }
  0xbe   : > { %v1690_v50 = vsel %vm1543_vm10, %v4090_v62, %v1392_v33  ;;  %v1692_v58 = vsel %vm1545_vm11, %v4090_v62, %v1394_v55  ;;  %vm1836_vm12 = vcmp.eq.s32.totalorder %v3729_v21, %v4109_v46  ;;  %vm1838_vm13 = vcmp.eq.s32.totalorder %v3732_v22, %v4109_v46 }
  0xbf   : > { %v1983_v61 = vsel %vm1836_vm12, %v4112_v60, %v1690_v50  ;;  %v1985_v7 = vsel %vm1838_vm13, %v4112_v60, %v1692_v58  ;;  %vm2130_vm14 = vcmp.eq.s32.totalorder %v3729_v21, %v4115_v25  ;;  %vm2132_vm15 = vcmp.eq.s32.totalorder %v3732_v22, %v4115_v25 }
  0xc0   : > { %v2277_v17 = vsel %vm2130_vm14, %v4118_v35, %v1983_v61  ;;  %v2279_v19 = vsel %vm2132_vm15, %v4118_v35, %v1985_v7  ;;  %vm2423_vm0 = vcmp.eq.s32.totalorder %v3729_v21, %v4141_v44  ;;  %vm2425_vm1 = vcmp.eq.s32.totalorder %v3732_v22, %v4141_v44 }
  0xc1   : > { %v2570_v20 = vsel %vm2423_vm0, %v4144_v36, %v2277_v17  ;;  %v2572_v52 = vsel %vm2425_vm1, %v4144_v36, %v2279_v19  ;;  %vm416_vm2 = vcmp.eq.s32.totalorder %v3735_v23, %v4038_v49  ;;  %vm418_vm3 = vcmp.eq.s32.totalorder %v3738_v28, %v4038_v49 }
  0xc2   : > { %v3207_v34 = vpack.c.bf16 %v2572_v52, %v2570_v20  ;;  %v563_v37 = vsel %vm416_vm2, %v4021_v39, 0.0  ;;  %v565_v53 = vsel %vm418_vm3, %v4021_v39, 0.0  ;;  %vm714_vm4 = vcmp.eq.s32.totalorder %v3735_v23, %v4055_v3 }
  0xc3   : > { %vm716_vm5 = vcmp.eq.s32.totalorder %v3738_v28, %v4055_v3  ;;  %v861_v21 = vsel %vm714_vm4, %v4029_v45, %v563_v37  ;;  %vm1015_vm6 = vcmp.eq.s32.totalorder %v3735_v23, %v4035_v8  ;;  %vm1017_vm7 = vcmp.eq.s32.totalorder %v3738_v28, %v4035_v8 }
  0xc4   : > { %3208 = vmatpush1.bf16.msra.mxu1 %v3207_v34  ;;  %v863_v22 = vsel %vm716_vm5, %v4029_v45, %v565_v53  ;;  %v1162_v5 = vsel %vm1015_vm6, %v4044_v16, %v861_v21  ;;  %vm1309_vm8 = vcmp.eq.s32.totalorder %v3735_v23, %v4068_v0  ;;  %vm1311_vm9 = vcmp.eq.s32.totalorder %v3738_v28, %v4068_v0 }
  0xc5   : > { %v1164_v15 = vsel %vm1017_vm7, %v4044_v16, %v863_v22  ;;  %v1456_v18 = vsel %vm1309_vm8, %v4052_v51, %v1162_v5  ;;  %vm1607_vm10 = vcmp.eq.s32.totalorder %v3735_v23, %v4087_v59  ;;  %vm1609_vm11 = vcmp.eq.s32.totalorder %v3738_v28, %v4087_v59 }
  0xc6   : > { %v1458_v57 = vsel %vm1311_vm9, %v4052_v51, %v1164_v15  ;;  %v1754_v40 = vsel %vm1607_vm10, %v4090_v62, %v1456_v18  ;;  %vm1900_vm12 = vcmp.eq.s32.totalorder %v3735_v23, %v4109_v46  ;;  %vm1902_vm13 = vcmp.eq.s32.totalorder %v3738_v28, %v4109_v46 }
  0xc7   : > { %v1756_v1 = vsel %vm1609_vm11, %v4090_v62, %v1458_v57  ;;  %v2047_v9 = vsel %vm1900_vm12, %v4112_v60, %v1754_v40  ;;  %vm2194_vm14 = vcmp.eq.s32.totalorder %v3735_v23, %v4115_v25  ;;  %vm2196_vm15 = vcmp.eq.s32.totalorder %v3738_v28, %v4115_v25 }
  0xc8   : > { %v2049_v11 = vsel %vm1902_vm13, %v4112_v60, %v1756_v1  ;;  %v2341_v13 = vsel %vm2194_vm14, %v4118_v35, %v2047_v9  ;;  %vm2487_vm0 = vcmp.eq.s32.totalorder %v3735_v23, %v4141_v44  ;;  %vm2489_vm1 = vcmp.eq.s32.totalorder %v3738_v28, %v4141_v44 }
  0xc9   : > { %v2343_v14 = vsel %vm2196_vm15, %v4118_v35, %v2049_v11  ;;  %v2634_v33 = vsel %vm2487_vm0, %v4144_v36, %v2341_v13  ;;  %vm357_vm2 = vcmp.eq.s32.totalorder %v3741_v29, %v3845_v47  ;;  %vm359_vm3 = vcmp.eq.s32.totalorder %v3744_v30, %v3845_v47 }
  0xca   : > { %v2636_v55 = vsel %vm2489_vm1, %v4144_v36, %v2343_v14  ;;  %v504_v50 = vsel %vm357_vm2, %v3786_v63, 0.0  ;;  %v506_v58 = vsel %vm359_vm3, %v3786_v63, 0.0  ;;  %vm655_vm4 = vcmp.eq.s32.totalorder %v3741_v29, %v3848_v54 }
  0xcb   : > { %v3271_v23 = vpack.c.bf16 %v2636_v55, %v2634_v33  ;;  %vm657_vm5 = vcmp.eq.s32.totalorder %v3744_v30, %v3848_v54  ;;  %v802_v28 = vsel %vm655_vm4, %v3794_v2, %v504_v50  ;;  %vm956_vm6 = vcmp.eq.s32.totalorder %v3741_v29, %v3833_v42 }
  0xcc   : > { %v804_v61 = vsel %vm657_vm5, %v3794_v2, %v506_v58  ;;  %vm958_vm7 = vcmp.eq.s32.totalorder %v3744_v30, %v3833_v42  ;;  %v1103_v7 = vsel %vm956_vm6, %v3819_v27, %v802_v28  ;;  %vm1250_vm8 = vcmp.eq.s32.totalorder %v3741_v29, %v3851_v56 }
  0xcd   : > { %3272 = vmatpush1.bf16.msra.mxu0 %v3271_v23  ;;  %v1105_v17 = vsel %vm958_vm7, %v3819_v27, %v804_v61  ;;  %vm1252_vm9 = vcmp.eq.s32.totalorder %v3744_v30, %v3851_v56  ;;  %v1397_v19 = vsel %vm1250_vm8, %v3836_v43, %v1103_v7  ;;  %vm1548_vm10 = vcmp.eq.s32.totalorder %v3741_v29, %v3881_v26 }
  0xce   : > { %v1399_v20 = vsel %vm1252_vm9, %v3836_v43, %v1105_v17  ;;  %vm1550_vm11 = vcmp.eq.s32.totalorder %v3744_v30, %v3881_v26  ;;  %v1695_v52 = vsel %vm1548_vm10, %v3884_v32, %v1397_v19  ;;  %vm1841_vm12 = vcmp.eq.s32.totalorder %v3741_v29, %v3907_v6 }
  0xcf   : > { %v1697_v34 = vsel %vm1550_vm11, %v3884_v32, %v1399_v20  ;;  %vm1843_vm13 = vcmp.eq.s32.totalorder %v3744_v30, %v3907_v6  ;;  %v1988_v37 = vsel %vm1841_vm12, %v3910_v24, %v1695_v52  ;;  %vm2135_vm14 = vcmp.eq.s32.totalorder %v3741_v29, %v3964_v41 }
  0xd0   : > { %v1990_v53 = vsel %vm1843_vm13, %v3910_v24, %v1697_v34  ;;  %vm2137_vm15 = vcmp.eq.s32.totalorder %v3744_v30, %v3964_v41  ;;  %v2282_v21 = vsel %vm2135_vm14, %v3950_v48, %v1988_v37  ;;  %vm2428_vm0 = vcmp.eq.s32.totalorder %v3741_v29, %v3972_v10 }
  0xd1   : > { %v2284_v22 = vsel %vm2137_vm15, %v3950_v48, %v1990_v53  ;;  %vm2430_vm1 = vcmp.eq.s32.totalorder %v3744_v30, %v3972_v10  ;;  %v2575_v5 = vsel %vm2428_vm0, %v3958_v12, %v2282_v21  ;;  %vm421_vm2 = vcmp.eq.s32.totalorder %v3747_v31, %v3845_v47 }
  0xd2   : > { %v2577_v15 = vsel %vm2430_vm1, %v3958_v12, %v2284_v22  ;;  %vm423_vm3 = vcmp.eq.s32.totalorder %v3752_v38, %v3845_v47  ;;  %v568_v18 = vsel %vm421_vm2, %v3786_v63, 0.0  ;;  %vm719_vm4 = vcmp.eq.s32.totalorder %v3747_v31, %v3848_v54 }
  0xd3   : > { %v3209_v57 = vpack.c.bf16 %v2577_v15, %v2575_v5  ;;  %v570_v40 = vsel %vm423_vm3, %v3786_v63, 0.0  ;;  %vm721_vm5 = vcmp.eq.s32.totalorder %v3752_v38, %v3848_v54  ;;  %v866_v1 = vsel %vm719_vm4, %v3794_v2, %v568_v18 }
  0xd4   : > { %v868_v9 = vsel %vm721_vm5, %v3794_v2, %v570_v40  ;;  %vm1020_vm6 = vcmp.eq.s32.totalorder %v3747_v31, %v3833_v42  ;;  %vm1022_vm7 = vcmp.eq.s32.totalorder %v3752_v38, %v3833_v42  ;;  %vm1314_vm8 = vcmp.eq.s32.totalorder %v3747_v31, %v3851_v56 }
  0xd5   : > { %3210 = vmatprep.subr.bf16.mxu1 %v3209_v57  ;;  %v1167_v11 = vsel %vm1020_vm6, %v3819_v27, %v866_v1  ;;  %v1169_v13 = vsel %vm1022_vm7, %v3819_v27, %v868_v9  ;;  %vm1316_vm9 = vcmp.eq.s32.totalorder %v3752_v38, %v3851_v56  ;;  %vm1612_vm10 = vcmp.eq.s32.totalorder %v3747_v31, %v3881_v26 }
  0xd6   : > { %v1461_v14 = vsel %vm1314_vm8, %v3836_v43, %v1167_v11  ;;  %v1463_v33 = vsel %vm1316_vm9, %v3836_v43, %v1169_v13  ;;  %vm1614_vm11 = vcmp.eq.s32.totalorder %v3752_v38, %v3881_v26  ;;  %vm1905_vm12 = vcmp.eq.s32.totalorder %v3747_v31, %v3907_v6 }
  0xd7   : > { %v1759_v55 = vsel %vm1612_vm10, %v3884_v32, %v1461_v14  ;;  %v1761_v50 = vsel %vm1614_vm11, %v3884_v32, %v1463_v33  ;;  %vm1907_vm13 = vcmp.eq.s32.totalorder %v3752_v38, %v3907_v6  ;;  %vm2199_vm14 = vcmp.eq.s32.totalorder %v3747_v31, %v3964_v41 }
  0xd8   : > { %v2052_v58 = vsel %vm1905_vm12, %v3910_v24, %v1759_v55  ;;  %v2054_v23 = vsel %vm1907_vm13, %v3910_v24, %v1761_v50  ;;  %vm2201_vm15 = vcmp.eq.s32.totalorder %v3752_v38, %v3964_v41  ;;  %vm2492_vm0 = vcmp.eq.s32.totalorder %v3747_v31, %v3972_v10 }
  0xd9   : > { %v2346_v28 = vsel %vm2199_vm14, %v3950_v48, %v2052_v58  ;;  %v2348_v61 = vsel %vm2201_vm15, %v3950_v48, %v2054_v23  ;;  %vm2494_vm1 = vcmp.eq.s32.totalorder %v3752_v38, %v3972_v10  ;;  %vm356_vm2 = vcmp.eq.s32.totalorder %v3741_v29, %v4038_v49 }
  0xda   : > { %v2639_v7 = vsel %vm2492_vm0, %v3958_v12, %v2346_v28  ;;  %v2641_v17 = vsel %vm2494_vm1, %v3958_v12, %v2348_v61  ;;  %vm358_vm3 = vcmp.eq.s32.totalorder %v3744_v30, %v4038_v49  ;;  %v503_v19 = vsel %vm356_vm2, %v4021_v39, 0.0 }
  0xdb   : > { %v3273_v20 = vpack.c.bf16 %v2641_v17, %v2639_v7  ;;  %v505_v52 = vsel %vm358_vm3, %v4021_v39, 0.0  ;;  %vm654_vm4 = vcmp.eq.s32.totalorder %v3741_v29, %v4055_v3  ;;  %vm656_vm5 = vcmp.eq.s32.totalorder %v3744_v30, %v4055_v3 }
  0xdc   : > { %v801_v34 = vsel %vm654_vm4, %v4029_v45, %v503_v19  ;;  %v803_v37 = vsel %vm656_vm5, %v4029_v45, %v505_v52  ;;  %vm955_vm6 = vcmp.eq.s32.totalorder %v3741_v29, %v4035_v8  ;;  %vm957_vm7 = vcmp.eq.s32.totalorder %v3744_v30, %v4035_v8 }
  0xdd   : > { %3274 = vmatprep.subr.bf16.mxu0 %v3273_v20  ;;  %v1102_v53 = vsel %vm955_vm6, %v4044_v16, %v801_v34  ;;  %v1104_v21 = vsel %vm957_vm7, %v4044_v16, %v803_v37  ;;  %vm1249_vm8 = vcmp.eq.s32.totalorder %v3741_v29, %v4068_v0  ;;  %vm1251_vm9 = vcmp.eq.s32.totalorder %v3744_v30, %v4068_v0 }
  0xde   : > { %v1396_v22 = vsel %vm1249_vm8, %v4052_v51, %v1102_v53  ;;  %v1398_v5 = vsel %vm1251_vm9, %v4052_v51, %v1104_v21  ;;  %vm1547_vm10 = vcmp.eq.s32.totalorder %v3741_v29, %v4087_v59  ;;  %vm1549_vm11 = vcmp.eq.s32.totalorder %v3744_v30, %v4087_v59 }
  0xdf   : > { %v1694_v15 = vsel %vm1547_vm10, %v4090_v62, %v1396_v22  ;;  %v1696_v18 = vsel %vm1549_vm11, %v4090_v62, %v1398_v5  ;;  %vm1840_vm12 = vcmp.eq.s32.totalorder %v3741_v29, %v4109_v46  ;;  %vm1842_vm13 = vcmp.eq.s32.totalorder %v3744_v30, %v4109_v46 }
  0xe0   : > { %v1987_v57 = vsel %vm1840_vm12, %v4112_v60, %v1694_v15  ;;  %v1989_v40 = vsel %vm1842_vm13, %v4112_v60, %v1696_v18  ;;  %vm2134_vm14 = vcmp.eq.s32.totalorder %v3741_v29, %v4115_v25  ;;  %vm2136_vm15 = vcmp.eq.s32.totalorder %v3744_v30, %v4115_v25 }
  0xe1   : > { %v2281_v1 = vsel %vm2134_vm14, %v4118_v35, %v1987_v57  ;;  %v2283_v9 = vsel %vm2136_vm15, %v4118_v35, %v1989_v40  ;;  %vm2427_vm0 = vcmp.eq.s32.totalorder %v3741_v29, %v4141_v44  ;;  %vm2429_vm1 = vcmp.eq.s32.totalorder %v3744_v30, %v4141_v44 }
  0xe2   : > { %v2574_v11 = vsel %vm2427_vm0, %v4144_v36, %v2281_v1  ;;  %v2576_v13 = vsel %vm2429_vm1, %v4144_v36, %v2283_v9  ;;  %vm420_vm2 = vcmp.eq.s32.totalorder %v3747_v31, %v4038_v49  ;;  %vm422_vm3 = vcmp.eq.s32.totalorder %v3752_v38, %v4038_v49 }
  0xe3   : > { %v3211_v14 = vpack.c.bf16 %v2576_v13, %v2574_v11  ;;  %v567_v33 = vsel %vm420_vm2, %v4021_v39, 0.0  ;;  %v569_v55 = vsel %vm422_vm3, %v4021_v39, 0.0  ;;  %vm718_vm4 = vcmp.eq.s32.totalorder %v3747_v31, %v4055_v3 }
  0xe4   : > { %vm720_vm5 = vcmp.eq.s32.totalorder %v3752_v38, %v4055_v3  ;;  %v865_v29 = vsel %vm718_vm4, %v4029_v45, %v567_v33  ;;  %vm1019_vm6 = vcmp.eq.s32.totalorder %v3747_v31, %v4035_v8  ;;  %vm1021_vm7 = vcmp.eq.s32.totalorder %v3752_v38, %v4035_v8 }
  0xe5   : > { %3212 = vmatpush1.bf16.msra.mxu1 %v3211_v14  ;;  %v867_v30 = vsel %vm720_vm5, %v4029_v45, %v569_v55  ;;  %v1166_v50 = vsel %vm1019_vm6, %v4044_v16, %v865_v29  ;;  %vm1313_vm8 = vcmp.eq.s32.totalorder %v3747_v31, %v4068_v0  ;;  %vm1315_vm9 = vcmp.eq.s32.totalorder %v3752_v38, %v4068_v0 }
  0xe6   : > { %v1168_v58 = vsel %vm1021_vm7, %v4044_v16, %v867_v30  ;;  %v1460_v23 = vsel %vm1313_vm8, %v4052_v51, %v1166_v50  ;;  %vm1611_vm10 = vcmp.eq.s32.totalorder %v3747_v31, %v4087_v59  ;;  %vm1613_vm11 = vcmp.eq.s32.totalorder %v3752_v38, %v4087_v59 }
  0xe7   : > { %v1462_v28 = vsel %vm1315_vm9, %v4052_v51, %v1168_v58  ;;  %v1758_v61 = vsel %vm1611_vm10, %v4090_v62, %v1460_v23  ;;  %vm1904_vm12 = vcmp.eq.s32.totalorder %v3747_v31, %v4109_v46  ;;  %vm1906_vm13 = vcmp.eq.s32.totalorder %v3752_v38, %v4109_v46 }
  0xe8   : > { %v1760_v7 = vsel %vm1613_vm11, %v4090_v62, %v1462_v28  ;;  %v2051_v17 = vsel %vm1904_vm12, %v4112_v60, %v1758_v61  ;;  %vm2198_vm14 = vcmp.eq.s32.totalorder %v3747_v31, %v4115_v25  ;;  %vm2200_vm15 = vcmp.eq.s32.totalorder %v3752_v38, %v4115_v25 }
  0xe9   : > { %v2053_v19 = vsel %vm1906_vm13, %v4112_v60, %v1760_v7  ;;  %v2345_v20 = vsel %vm2198_vm14, %v4118_v35, %v2051_v17  ;;  %vm2491_vm0 = vcmp.eq.s32.totalorder %v3747_v31, %v4141_v44  ;;  %vm2493_vm1 = vcmp.eq.s32.totalorder %v3752_v38, %v4141_v44 }
  0xea   : > { %v2347_v52 = vsel %vm2200_vm15, %v4118_v35, %v2053_v19  ;;  %v2638_v34 = vsel %vm2491_vm0, %v4144_v36, %v2345_v20  ;;  %v4772_v37 = vadd.s32 64, %v3693_v4  ;;  %v4775_v53 = vadd.s32 72, %v3693_v4 }
  0xeb   : > { %v2640_v21 = vsel %vm2493_vm1, %v4144_v36, %v2347_v52  ;;  %v4779_v22 = vadd.s32 320, %v3693_v4  ;;  %v4782_v31 = vadd.s32 328, %v3693_v4  ;;  %v4785_v38 = vadd.s32 80, %v3693_v4 }
  0xec   : > { %v3275_v5 = vpack.c.bf16 %v2640_v21, %v2638_v34  ;;  %vm361_vm2 = vcmp.eq.s32.totalorder %v4772_v37, %v3845_v47  ;;  %vm363_vm3 = vcmp.eq.s32.totalorder %v4775_v53, %v3845_v47  ;;  %vm659_vm4 = vcmp.eq.s32.totalorder %v4772_v37, %v3848_v54 }
  0xed   : > { %v508_v15 = vsel %vm361_vm2, %v3786_v63, 0.0  ;;  %v510_v18 = vsel %vm363_vm3, %v3786_v63, 0.0  ;;  %vm661_vm5 = vcmp.eq.s32.totalorder %v4775_v53, %v3848_v54  ;;  %vm960_vm6 = vcmp.eq.s32.totalorder %v4772_v37, %v3833_v42 }
  0xee   : > { %3276 = vmatpush1.bf16.msra.mxu0 %v3275_v5  ;;  %v806_v57 = vsel %vm659_vm4, %v3794_v2, %v508_v15  ;;  %v808_v40 = vsel %vm661_vm5, %v3794_v2, %v510_v18  ;;  %vm962_vm7 = vcmp.eq.s32.totalorder %v4775_v53, %v3833_v42  ;;  %vm1254_vm8 = vcmp.eq.s32.totalorder %v4772_v37, %v3851_v56 }
  0xef   : > { %v1107_v1 = vsel %vm960_vm6, %v3819_v27, %v806_v57  ;;  %v1109_v9 = vsel %vm962_vm7, %v3819_v27, %v808_v40  ;;  %vm1256_vm9 = vcmp.eq.s32.totalorder %v4775_v53, %v3851_v56  ;;  %vm1552_vm10 = vcmp.eq.s32.totalorder %v4772_v37, %v3881_v26 }
  0xf0   : > { %v1401_v11 = vsel %vm1254_vm8, %v3836_v43, %v1107_v1  ;;  %v1403_v13 = vsel %vm1256_vm9, %v3836_v43, %v1109_v9  ;;  %vm1554_vm11 = vcmp.eq.s32.totalorder %v4775_v53, %v3881_v26  ;;  %vm1845_vm12 = vcmp.eq.s32.totalorder %v4772_v37, %v3907_v6 }
  0xf1   : > { %v1699_v14 = vsel %vm1552_vm10, %v3884_v32, %v1401_v11  ;;  %v1701_v33 = vsel %vm1554_vm11, %v3884_v32, %v1403_v13  ;;  %vm1847_vm13 = vcmp.eq.s32.totalorder %v4775_v53, %v3907_v6  ;;  %vm2139_vm14 = vcmp.eq.s32.totalorder %v4772_v37, %v3964_v41 }
  0xf2   : > { %v1992_v55 = vsel %vm1845_vm12, %v3910_v24, %v1699_v14  ;;  %v1994_v29 = vsel %vm1847_vm13, %v3910_v24, %v1701_v33  ;;  %vm2141_vm15 = vcmp.eq.s32.totalorder %v4775_v53, %v3964_v41  ;;  %vm2432_vm0 = vcmp.eq.s32.totalorder %v4772_v37, %v3972_v10 }
  0xf3   : > { %v2286_v30 = vsel %vm2139_vm14, %v3950_v48, %v1992_v55  ;;  %v2288_v50 = vsel %vm2141_vm15, %v3950_v48, %v1994_v29  ;;  %vm2434_vm1 = vcmp.eq.s32.totalorder %v4775_v53, %v3972_v10  ;;  %vm425_vm2 = vcmp.eq.s32.totalorder %v4779_v22, %v3845_v47 }
  0xf4   : > { %v2579_v58 = vsel %vm2432_vm0, %v3958_v12, %v2286_v30  ;;  %v2581_v23 = vsel %vm2434_vm1, %v3958_v12, %v2288_v50  ;;  %vm427_vm3 = vcmp.eq.s32.totalorder %v4782_v31, %v3845_v47  ;;  %v572_v28 = vsel %vm425_vm2, %v3786_v63, 0.0 }
  0xf5   : > { %v3213_v61 = vpack.c.bf16 %v2581_v23, %v2579_v58  ;;  %v574_v7 = vsel %vm427_vm3, %v3786_v63, 0.0  ;;  %vm723_vm4 = vcmp.eq.s32.totalorder %v4779_v22, %v3848_v54  ;;  %vm725_vm5 = vcmp.eq.s32.totalorder %v4782_v31, %v3848_v54 }
  0xf6   : > { %v870_v17 = vsel %vm723_vm4, %v3794_v2, %v572_v28  ;;  %v872_v19 = vsel %vm725_vm5, %v3794_v2, %v574_v7  ;;  %vm1024_vm6 = vcmp.eq.s32.totalorder %v4779_v22, %v3833_v42  ;;  %vm1026_vm7 = vcmp.eq.s32.totalorder %v4782_v31, %v3833_v42 }
  0xf7   : > { %3214 = vmatprep.subr.bf16.mxu1 %v3213_v61  ;;  %v1171_v20 = vsel %vm1024_vm6, %v3819_v27, %v870_v17  ;;  %v1173_v52 = vsel %vm1026_vm7, %v3819_v27, %v872_v19  ;;  %vm1318_vm8 = vcmp.eq.s32.totalorder %v4779_v22, %v3851_v56  ;;  %vm1320_vm9 = vcmp.eq.s32.totalorder %v4782_v31, %v3851_v56 }
  0xf8   : > { %v1465_v34 = vsel %vm1318_vm8, %v3836_v43, %v1171_v20  ;;  %v1467_v21 = vsel %vm1320_vm9, %v3836_v43, %v1173_v52  ;;  %vm1616_vm10 = vcmp.eq.s32.totalorder %v4779_v22, %v3881_v26  ;;  %vm1618_vm11 = vcmp.eq.s32.totalorder %v4782_v31, %v3881_v26 }
  0xf9   : > { %v1763_v5 = vsel %vm1616_vm10, %v3884_v32, %v1465_v34  ;;  %v1765_v15 = vsel %vm1618_vm11, %v3884_v32, %v1467_v21  ;;  %vm1909_vm12 = vcmp.eq.s32.totalorder %v4779_v22, %v3907_v6  ;;  %vm1911_vm13 = vcmp.eq.s32.totalorder %v4782_v31, %v3907_v6 }
  0xfa   : > { %v2056_v18 = vsel %vm1909_vm12, %v3910_v24, %v1763_v5  ;;  %v2058_v57 = vsel %vm1911_vm13, %v3910_v24, %v1765_v15  ;;  %vm2203_vm14 = vcmp.eq.s32.totalorder %v4779_v22, %v3964_v41  ;;  %vm2205_vm15 = vcmp.eq.s32.totalorder %v4782_v31, %v3964_v41 }
  0xfb   : > { %v2350_v40 = vsel %vm2203_vm14, %v3950_v48, %v2056_v18  ;;  %v2352_v1 = vsel %vm2205_vm15, %v3950_v48, %v2058_v57  ;;  %vm2496_vm0 = vcmp.eq.s32.totalorder %v4779_v22, %v3972_v10  ;;  %vm2498_vm1 = vcmp.eq.s32.totalorder %v4782_v31, %v3972_v10 }
  0xfc   : > { %v2643_v9 = vsel %vm2496_vm0, %v3958_v12, %v2350_v40  ;;  %v2645_v11 = vsel %vm2498_vm1, %v3958_v12, %v2352_v1  ;;  %vm360_vm2 = vcmp.eq.s32.totalorder %v4772_v37, %v4038_v49  ;;  %vm362_vm3 = vcmp.eq.s32.totalorder %v4775_v53, %v4038_v49 }
  0xfd   : > { %v3277_v13 = vpack.c.bf16 %v2645_v11, %v2643_v9  ;;  %v507_v14 = vsel %vm360_vm2, %v4021_v39, 0.0  ;;  %v509_v33 = vsel %vm362_vm3, %v4021_v39, 0.0  ;;  %vm658_vm4 = vcmp.eq.s32.totalorder %v4772_v37, %v4055_v3 }
  0xfe   : > { %vm660_vm5 = vcmp.eq.s32.totalorder %v4775_v53, %v4055_v3  ;;  %v805_v55 = vsel %vm658_vm4, %v4029_v45, %v507_v14  ;;  %vm959_vm6 = vcmp.eq.s32.totalorder %v4772_v37, %v4035_v8  ;;  %vm961_vm7 = vcmp.eq.s32.totalorder %v4775_v53, %v4035_v8 }
  0xff   : > { %3278 = vmatprep.subr.bf16.mxu0 %v3277_v13  ;;  %v807_v29 = vsel %vm660_vm5, %v4029_v45, %v509_v33  ;;  %v1106_v30 = vsel %vm959_vm6, %v4044_v16, %v805_v55  ;;  %vm1253_vm8 = vcmp.eq.s32.totalorder %v4772_v37, %v4068_v0  ;;  %vm1255_vm9 = vcmp.eq.s32.totalorder %v4775_v53, %v4068_v0 }
 0x100   : > { %v1108_v50 = vsel %vm961_vm7, %v4044_v16, %v807_v29  ;;  %v1400_v58 = vsel %vm1253_vm8, %v4052_v51, %v1106_v30  ;;  %vm1551_vm10 = vcmp.eq.s32.totalorder %v4772_v37, %v4087_v59  ;;  %vm1553_vm11 = vcmp.eq.s32.totalorder %v4775_v53, %v4087_v59 }
 0x101   : > { %v1402_v23 = vsel %vm1255_vm9, %v4052_v51, %v1108_v50  ;;  %v1698_v28 = vsel %vm1551_vm10, %v4090_v62, %v1400_v58  ;;  %vm1844_vm12 = vcmp.eq.s32.totalorder %v4772_v37, %v4109_v46  ;;  %vm1846_vm13 = vcmp.eq.s32.totalorder %v4775_v53, %v4109_v46 }
 0x102   : > { %v1700_v61 = vsel %vm1553_vm11, %v4090_v62, %v1402_v23  ;;  %v1991_v7 = vsel %vm1844_vm12, %v4112_v60, %v1698_v28  ;;  %vm2138_vm14 = vcmp.eq.s32.totalorder %v4772_v37, %v4115_v25  ;;  %vm2140_vm15 = vcmp.eq.s32.totalorder %v4775_v53, %v4115_v25 }
 0x103   : > { %v1993_v17 = vsel %vm1846_vm13, %v4112_v60, %v1700_v61  ;;  %v2285_v19 = vsel %vm2138_vm14, %v4118_v35, %v1991_v7  ;;  %vm2431_vm0 = vcmp.eq.s32.totalorder %v4772_v37, %v4141_v44  ;;  %vm2433_vm1 = vcmp.eq.s32.totalorder %v4775_v53, %v4141_v44 }
 0x104   : > { %v2287_v20 = vsel %vm2140_vm15, %v4118_v35, %v1993_v17  ;;  %v2578_v52 = vsel %vm2431_vm0, %v4144_v36, %v2285_v19  ;;  %vm424_vm2 = vcmp.eq.s32.totalorder %v4779_v22, %v4038_v49  ;;  %vm426_vm3 = vcmp.eq.s32.totalorder %v4782_v31, %v4038_v49 }
 0x105   : > { %v2580_v34 = vsel %vm2433_vm1, %v4144_v36, %v2287_v20  ;;  %v571_v21 = vsel %vm424_vm2, %v4021_v39, 0.0  ;;  %v573_v5 = vsel %vm426_vm3, %v4021_v39, 0.0  ;;  %vm722_vm4 = vcmp.eq.s32.totalorder %v4779_v22, %v4055_v3 }
 0x106   : > { %v3215_v37 = vpack.c.bf16 %v2580_v34, %v2578_v52  ;;  %vm724_vm5 = vcmp.eq.s32.totalorder %v4782_v31, %v4055_v3  ;;  %v869_v53 = vsel %vm722_vm4, %v4029_v45, %v571_v21  ;;  %vm1023_vm6 = vcmp.eq.s32.totalorder %v4779_v22, %v4035_v8 }
 0x107   : > { %v871_v15 = vsel %vm724_vm5, %v4029_v45, %v573_v5  ;;  %vm1025_vm7 = vcmp.eq.s32.totalorder %v4782_v31, %v4035_v8  ;;  %v1170_v18 = vsel %vm1023_vm6, %v4044_v16, %v869_v53  ;;  %vm1317_vm8 = vcmp.eq.s32.totalorder %v4779_v22, %v4068_v0 }
 0x108   : > { %3216 = vmatpush1.bf16.msra.mxu1 %v3215_v37  ;;  %v1172_v57 = vsel %vm1025_vm7, %v4044_v16, %v871_v15  ;;  %vm1319_vm9 = vcmp.eq.s32.totalorder %v4782_v31, %v4068_v0  ;;  %v1464_v40 = vsel %vm1317_vm8, %v4052_v51, %v1170_v18  ;;  %vm1615_vm10 = vcmp.eq.s32.totalorder %v4779_v22, %v4087_v59 }
 0x109   : > { %v1466_v1 = vsel %vm1319_vm9, %v4052_v51, %v1172_v57  ;;  %vm1617_vm11 = vcmp.eq.s32.totalorder %v4782_v31, %v4087_v59  ;;  %v1762_v9 = vsel %vm1615_vm10, %v4090_v62, %v1464_v40  ;;  %vm1908_vm12 = vcmp.eq.s32.totalorder %v4779_v22, %v4109_v46 }
 0x10a   : > { %v1764_v11 = vsel %vm1617_vm11, %v4090_v62, %v1466_v1  ;;  %vm1910_vm13 = vcmp.eq.s32.totalorder %v4782_v31, %v4109_v46  ;;  %v2055_v13 = vsel %vm1908_vm12, %v4112_v60, %v1762_v9  ;;  %vm2202_vm14 = vcmp.eq.s32.totalorder %v4779_v22, %v4115_v25 }
 0x10b   : > { %v2057_v14 = vsel %vm1910_vm13, %v4112_v60, %v1764_v11  ;;  %vm2204_vm15 = vcmp.eq.s32.totalorder %v4782_v31, %v4115_v25  ;;  %v2349_v33 = vsel %vm2202_vm14, %v4118_v35, %v2055_v13  ;;  %vm2495_vm0 = vcmp.eq.s32.totalorder %v4779_v22, %v4141_v44 }
 0x10c   : > { %v2351_v55 = vsel %vm2204_vm15, %v4118_v35, %v2057_v14  ;;  %vm2497_vm1 = vcmp.eq.s32.totalorder %v4782_v31, %v4141_v44  ;;  %v2642_v29 = vsel %vm2495_vm0, %v4144_v36, %v2349_v33  ;;  %v4979_v30 = vadd.s32 88, %v3693_v4 }
 0x10d   : > { %v2644_v50 = vsel %vm2497_vm1, %v4144_v36, %v2351_v55  ;;  %vm365_vm2 = vcmp.eq.s32.totalorder %v4785_v38, %v3845_v47  ;;  %vm663_vm3 = vcmp.eq.s32.totalorder %v4785_v38, %v3848_v54  ;;  %vm964_vm4 = vcmp.eq.s32.totalorder %v4785_v38, %v3833_v42 }
 0x10e   : > { %v3279_v22 = vpack.c.bf16 %v2644_v50, %v2642_v29  ;;  %vm367_vm5 = vcmp.eq.s32.totalorder %v4979_v30, %v3845_v47  ;;  %v512_v31 = vsel %vm365_vm2, %v3786_v63, 0.0  ;;  %vm665_vm6 = vcmp.eq.s32.totalorder %v4979_v30, %v3848_v54 }
 0x10f   : > { %v514_v58 = vsel %vm367_vm5, %v3786_v63, 0.0  ;;  %v810_v23 = vsel %vm663_vm3, %v3794_v2, %v512_v31  ;;  %vm966_vm7 = vcmp.eq.s32.totalorder %v4979_v30, %v3833_v42  ;;  %vm1258_vm8 = vcmp.eq.s32.totalorder %v4785_v38, %v3851_v56 }
 0x110   : > { %3280 = vmatpush1.bf16.msra.mxu0 %v3279_v22  ;;  %v812_v28 = vsel %vm665_vm6, %v3794_v2, %v514_v58  ;;  %v1111_v61 = vsel %vm964_vm4, %v3819_v27, %v810_v23  ;;  %vm1260_vm9 = vcmp.eq.s32.totalorder %v4979_v30, %v3851_v56  ;;  %vm1556_vm10 = vcmp.eq.s32.totalorder %v4785_v38, %v3881_v26 }
 0x111   : > { %v1113_v7 = vsel %vm966_vm7, %v3819_v27, %v812_v28  ;;  %v1405_v17 = vsel %vm1258_vm8, %v3836_v43, %v1111_v61  ;;  %vm1558_vm11 = vcmp.eq.s32.totalorder %v4979_v30, %v3881_v26  ;;  %vm1849_vm12 = vcmp.eq.s32.totalorder %v4785_v38, %v3907_v6 }
 0x112   : > { %v1407_v19 = vsel %vm1260_vm9, %v3836_v43, %v1113_v7  ;;  %v1703_v20 = vsel %vm1556_vm10, %v3884_v32, %v1405_v17  ;;  %vm1851_vm13 = vcmp.eq.s32.totalorder %v4979_v30, %v3907_v6  ;;  %vm2143_vm14 = vcmp.eq.s32.totalorder %v4785_v38, %v3964_v41 }
 0x113   : > { %v1705_v52 = vsel %vm1558_vm11, %v3884_v32, %v1407_v19  ;;  %v1996_v34 = vsel %vm1849_vm12, %v3910_v24, %v1703_v20  ;;  %vm2145_vm15 = vcmp.eq.s32.totalorder %v4979_v30, %v3964_v41  ;;  %vm2436_vm0 = vcmp.eq.s32.totalorder %v4785_v38, %v3972_v10 }
 0x114   : > { %v1998_v21 = vsel %vm1851_vm13, %v3910_v24, %v1705_v52  ;;  %v2290_v5 = vsel %vm2143_vm14, %v3950_v48, %v1996_v34  ;;  %vm2438_vm1 = vcmp.eq.s32.totalorder %v4979_v30, %v3972_v10  ;;  %v5028_v37 = vadd.s32 336, %v3693_v4 }
 0x115   : > { %v2292_v53 = vsel %vm2145_vm15, %v3950_v48, %v1998_v21  ;;  %v2583_v15 = vsel %vm2436_vm0, %v3958_v12, %v2290_v5  ;;  %v5033_v18 = vadd.s32 344, %v3693_v4  ;;  %vm364_vm2 = vcmp.eq.s32.totalorder %v4785_v38, %v4038_v49 }
 0x116   : > { %v2585_v57 = vsel %vm2438_vm1, %v3958_v12, %v2292_v53  ;;  %vm429_vm3 = vcmp.eq.s32.totalorder %v5028_v37, %v3845_v47  ;;  %vm727_vm4 = vcmp.eq.s32.totalorder %v5028_v37, %v3848_v54  ;;  %vm1028_vm5 = vcmp.eq.s32.totalorder %v5028_v37, %v3833_v42 }
 0x117   : > { %v3217_v40 = vpack.c.bf16 %v2585_v57, %v2583_v15  ;;  %vm431_vm6 = vcmp.eq.s32.totalorder %v5033_v18, %v3845_v47  ;;  %v576_v1 = vsel %vm429_vm3, %v3786_v63, 0.0  ;;  %vm729_vm7 = vcmp.eq.s32.totalorder %v5033_v18, %v3848_v54 }
 0x118   : > { %v578_v9 = vsel %vm431_vm6, %v3786_v63, 0.0  ;;  %v874_v11 = vsel %vm727_vm4, %v3794_v2, %v576_v1  ;;  %vm1030_vm8 = vcmp.eq.s32.totalorder %v5033_v18, %v3833_v42  ;;  %vm1322_vm9 = vcmp.eq.s32.totalorder %v5028_v37, %v3851_v56 }
 0x119   : > { %3218 = vmatprep.subr.bf16.mxu1 %v3217_v40  ;;  %v876_v13 = vsel %vm729_vm7, %v3794_v2, %v578_v9  ;;  %v1175_v14 = vsel %vm1028_vm5, %v3819_v27, %v874_v11  ;;  %vm1324_vm10 = vcmp.eq.s32.totalorder %v5033_v18, %v3851_v56  ;;  %vm1620_vm11 = vcmp.eq.s32.totalorder %v5028_v37, %v3881_v26 }
 0x11a   : > { %v1177_v33 = vsel %vm1030_vm8, %v3819_v27, %v876_v13  ;;  %v1469_v55 = vsel %vm1322_vm9, %v3836_v43, %v1175_v14  ;;  %vm1622_vm12 = vcmp.eq.s32.totalorder %v5033_v18, %v3881_v26  ;;  %vm1913_vm13 = vcmp.eq.s32.totalorder %v5028_v37, %v3907_v6 }
 0x11b   : > { %v1471_v29 = vsel %vm1324_vm10, %v3836_v43, %v1177_v33  ;;  %v1767_v50 = vsel %vm1620_vm11, %v3884_v32, %v1469_v55  ;;  %vm1915_vm14 = vcmp.eq.s32.totalorder %v5033_v18, %v3907_v6  ;;  %vm2207_vm15 = vcmp.eq.s32.totalorder %v5028_v37, %v3964_v41 }
 0x11c   : > { %v1769_v22 = vsel %vm1622_vm12, %v3884_v32, %v1471_v29  ;;  %v2060_v31 = vsel %vm1913_vm13, %v3910_v24, %v1767_v50  ;;  %vm2209_vm0 = vcmp.eq.s32.totalorder %v5033_v18, %v3964_v41  ;;  %vm2500_vm1 = vcmp.eq.s32.totalorder %v5028_v37, %v3972_v10 }
 0x11d   : > { %v2062_v58 = vsel %vm1915_vm14, %v3910_v24, %v1769_v22  ;;  %v2354_v23 = vsel %vm2207_vm15, %v3950_v48, %v2060_v31  ;;  %vm2502_vm3 = vcmp.eq.s32.totalorder %v5033_v18, %v3972_v10  ;;  %vm366_vm4 = vcmp.eq.s32.totalorder %v4979_v30, %v4038_v49 }
 0x11e   : > { %v2356_v28 = vsel %vm2209_vm0, %v3950_v48, %v2062_v58  ;;  %v2647_v61 = vsel %vm2500_vm1, %v3958_v12, %v2354_v23  ;;  %v511_v7 = vsel %vm364_vm2, %v4021_v39, 0.0  ;;  %v513_v17 = vsel %vm366_vm4, %v4021_v39, 0.0 }
 0x11f   : > { %v2649_v19 = vsel %vm2502_vm3, %v3958_v12, %v2356_v28  ;;  %vm662_vm5 = vcmp.eq.s32.totalorder %v4785_v38, %v4055_v3  ;;  %vm664_vm6 = vcmp.eq.s32.totalorder %v4979_v30, %v4055_v3  ;;  %vm963_vm7 = vcmp.eq.s32.totalorder %v4785_v38, %v4035_v8 }
 0x120   : > { %v3281_v20 = vpack.c.bf16 %v2649_v19, %v2647_v61  ;;  %v809_v52 = vsel %vm662_vm5, %v4029_v45, %v511_v7  ;;  %v811_v34 = vsel %vm664_vm6, %v4029_v45, %v513_v17  ;;  %vm965_vm2 = vcmp.eq.s32.totalorder %v4979_v30, %v4035_v8 }
 0x121   : > { %v1110_v21 = vsel %vm963_vm7, %v4044_v16, %v809_v52  ;;  %v1112_v5 = vsel %vm965_vm2, %v4044_v16, %v811_v34  ;;  %vm1257_vm8 = vcmp.eq.s32.totalorder %v4785_v38, %v4068_v0  ;;  %vm1259_vm9 = vcmp.eq.s32.totalorder %v4979_v30, %v4068_v0 }
 0x122   : > { %3282 = vmatprep.subr.bf16.mxu0 %v3281_v20  ;;  %v1404_v53 = vsel %vm1257_vm8, %v4052_v51, %v1110_v21  ;;  %v1406_v15 = vsel %vm1259_vm9, %v4052_v51, %v1112_v5  ;;  %vm1555_vm10 = vcmp.eq.s32.totalorder %v4785_v38, %v4087_v59  ;;  %vm1557_vm11 = vcmp.eq.s32.totalorder %v4979_v30, %v4087_v59 }
 0x123   : > { %v1702_v57 = vsel %vm1555_vm10, %v4090_v62, %v1404_v53  ;;  %v1704_v40 = vsel %vm1557_vm11, %v4090_v62, %v1406_v15  ;;  %vm1848_vm12 = vcmp.eq.s32.totalorder %v4785_v38, %v4109_v46  ;;  %vm1850_vm13 = vcmp.eq.s32.totalorder %v4979_v30, %v4109_v46 }
 0x124   : > { %v1995_v1 = vsel %vm1848_vm12, %v4112_v60, %v1702_v57  ;;  %v1997_v9 = vsel %vm1850_vm13, %v4112_v60, %v1704_v40  ;;  %vm2142_vm14 = vcmp.eq.s32.totalorder %v4785_v38, %v4115_v25  ;;  %vm2144_vm15 = vcmp.eq.s32.totalorder %v4979_v30, %v4115_v25 }
 0x125   : > { %v2289_v11 = vsel %vm2142_vm14, %v4118_v35, %v1995_v1  ;;  %v2291_v13 = vsel %vm2144_vm15, %v4118_v35, %v1997_v9  ;;  %vm2435_vm0 = vcmp.eq.s32.totalorder %v4785_v38, %v4141_v44  ;;  %vm2437_vm1 = vcmp.eq.s32.totalorder %v4979_v30, %v4141_v44 }
 0x126   : > { %v2582_v14 = vsel %vm2435_vm0, %v4144_v36, %v2289_v11  ;;  %v2584_v33 = vsel %vm2437_vm1, %v4144_v36, %v2291_v13  ;;  %vm428_vm3 = vcmp.eq.s32.totalorder %v5028_v37, %v4038_v49  ;;  %vm430_vm4 = vcmp.eq.s32.totalorder %v5033_v18, %v4038_v49 }
 0x127   : > { %v3219_v55 = vpack.c.bf16 %v2584_v33, %v2582_v14  ;;  %v575_v29 = vsel %vm428_vm3, %v4021_v39, 0.0  ;;  %v577_v50 = vsel %vm430_vm4, %v4021_v39, 0.0  ;;  %vm726_vm5 = vcmp.eq.s32.totalorder %v5028_v37, %v4055_v3 }
 0x128   : > { %vm728_vm6 = vcmp.eq.s32.totalorder %v5033_v18, %v4055_v3  ;;  %v873_v38 = vsel %vm726_vm5, %v4029_v45, %v575_v29  ;;  %vm1027_vm7 = vcmp.eq.s32.totalorder %v5028_v37, %v4035_v8  ;;  %vm1029_vm2 = vcmp.eq.s32.totalorder %v5033_v18, %v4035_v8 }
 0x129   : > { %3220 = vmatpush1.bf16.msra.mxu1 %v3219_v55  ;;  %v875_v30 = vsel %vm728_vm6, %v4029_v45, %v577_v50  ;;  %v1174_v22 = vsel %vm1027_vm7, %v4044_v16, %v873_v38  ;;  %vm1321_vm8 = vcmp.eq.s32.totalorder %v5028_v37, %v4068_v0  ;;  %vm1323_vm9 = vcmp.eq.s32.totalorder %v5033_v18, %v4068_v0 }
 0x12a   : > { %v1176_v31 = vsel %vm1029_vm2, %v4044_v16, %v875_v30  ;;  %v1468_v58 = vsel %vm1321_vm8, %v4052_v51, %v1174_v22  ;;  %vm1619_vm10 = vcmp.eq.s32.totalorder %v5028_v37, %v4087_v59  ;;  %vm1621_vm11 = vcmp.eq.s32.totalorder %v5033_v18, %v4087_v59 }
 0x12b   : > { %v1470_v23 = vsel %vm1323_vm9, %v4052_v51, %v1176_v31  ;;  %v1766_v28 = vsel %vm1619_vm10, %v4090_v62, %v1468_v58  ;;  %vm1912_vm12 = vcmp.eq.s32.totalorder %v5028_v37, %v4109_v46  ;;  %vm1914_vm13 = vcmp.eq.s32.totalorder %v5033_v18, %v4109_v46 }
 0x12c   : > { %v1768_v61 = vsel %vm1621_vm11, %v4090_v62, %v1470_v23  ;;  %v2059_v7 = vsel %vm1912_vm12, %v4112_v60, %v1766_v28  ;;  %vm2206_vm14 = vcmp.eq.s32.totalorder %v5028_v37, %v4115_v25  ;;  %vm2208_vm15 = vcmp.eq.s32.totalorder %v5033_v18, %v4115_v25 }
 0x12d   : > { %v2061_v17 = vsel %vm1914_vm13, %v4112_v60, %v1768_v61  ;;  %v2353_v19 = vsel %vm2206_vm14, %v4118_v35, %v2059_v7  ;;  %vm2499_vm0 = vcmp.eq.s32.totalorder %v5028_v37, %v4141_v44  ;;  %vm2501_vm1 = vcmp.eq.s32.totalorder %v5033_v18, %v4141_v44 }
 0x12e   : > { %v2355_v20 = vsel %vm2208_vm15, %v4118_v35, %v2061_v17  ;;  %v2646_v52 = vsel %vm2499_vm0, %v4144_v36, %v2353_v19  ;;  %v5183_v34 = vadd.s32 96, %v3693_v4  ;;  %v5186_v21 = vadd.s32 104, %v3693_v4 }
 0x12f   : > { %v2648_v5 = vsel %vm2501_vm1, %v4144_v36, %v2355_v20  ;;  %v5190_v53 = vadd.s32 352, %v3693_v4  ;;  %v5193_v37 = vadd.s32 360, %v3693_v4  ;;  %v5196_v18 = vadd.s32 112, %v3693_v4 }
 0x130   : > { %v3283_v15 = vpack.c.bf16 %v2648_v5, %v2646_v52  ;;  %vm369_vm3 = vcmp.eq.s32.totalorder %v5183_v34, %v3845_v47  ;;  %vm371_vm4 = vcmp.eq.s32.totalorder %v5186_v21, %v3845_v47  ;;  %vm667_vm5 = vcmp.eq.s32.totalorder %v5183_v34, %v3848_v54 }
 0x131   : > { %v516_v57 = vsel %vm369_vm3, %v3786_v63, 0.0  ;;  %v518_v40 = vsel %vm371_vm4, %v3786_v63, 0.0  ;;  %vm669_vm6 = vcmp.eq.s32.totalorder %v5186_v21, %v3848_v54  ;;  %vm968_vm7 = vcmp.eq.s32.totalorder %v5183_v34, %v3833_v42 }
 0x132   : > { %3284 = vmatpush1.bf16.msra.mxu0 %v3283_v15  ;;  %v814_v1 = vsel %vm667_vm5, %v3794_v2, %v516_v57  ;;  %v816_v9 = vsel %vm669_vm6, %v3794_v2, %v518_v40  ;;  %vm970_vm2 = vcmp.eq.s32.totalorder %v5186_v21, %v3833_v42  ;;  %vm1262_vm8 = vcmp.eq.s32.totalorder %v5183_v34, %v3851_v56 }
 0x133   : > { %v1115_v11 = vsel %vm968_vm7, %v3819_v27, %v814_v1  ;;  %v1117_v13 = vsel %vm970_vm2, %v3819_v27, %v816_v9  ;;  %vm1264_vm9 = vcmp.eq.s32.totalorder %v5186_v21, %v3851_v56  ;;  %vm1560_vm10 = vcmp.eq.s32.totalorder %v5183_v34, %v3881_v26 }
 0x134   : > { %v1409_v14 = vsel %vm1262_vm8, %v3836_v43, %v1115_v11  ;;  %v1411_v33 = vsel %vm1264_vm9, %v3836_v43, %v1117_v13  ;;  %vm1562_vm11 = vcmp.eq.s32.totalorder %v5186_v21, %v3881_v26  ;;  %vm1853_vm12 = vcmp.eq.s32.totalorder %v5183_v34, %v3907_v6 }
 0x135   : > { %v1707_v55 = vsel %vm1560_vm10, %v3884_v32, %v1409_v14  ;;  %v1709_v29 = vsel %vm1562_vm11, %v3884_v32, %v1411_v33  ;;  %vm1855_vm13 = vcmp.eq.s32.totalorder %v5186_v21, %v3907_v6  ;;  %vm2147_vm14 = vcmp.eq.s32.totalorder %v5183_v34, %v3964_v41 }
 0x136   : > { %v2000_v50 = vsel %vm1853_vm12, %v3910_v24, %v1707_v55  ;;  %v2002_v38 = vsel %vm1855_vm13, %v3910_v24, %v1709_v29  ;;  %vm2149_vm15 = vcmp.eq.s32.totalorder %v5186_v21, %v3964_v41  ;;  %vm2440_vm0 = vcmp.eq.s32.totalorder %v5183_v34, %v3972_v10 }
 0x137   : > { %v2294_v30 = vsel %vm2147_vm14, %v3950_v48, %v2000_v50  ;;  %v2296_v22 = vsel %vm2149_vm15, %v3950_v48, %v2002_v38  ;;  %vm2442_vm1 = vcmp.eq.s32.totalorder %v5186_v21, %v3972_v10  ;;  %vm433_vm3 = vcmp.eq.s32.totalorder %v5190_v53, %v3845_v47 }
 0x138   : > { %v2587_v31 = vsel %vm2440_vm0, %v3958_v12, %v2294_v30  ;;  %v2589_v58 = vsel %vm2442_vm1, %v3958_v12, %v2296_v22  ;;  %vm435_vm4 = vcmp.eq.s32.totalorder %v5193_v37, %v3845_v47  ;;  %v580_v23 = vsel %vm433_vm3, %v3786_v63, 0.0 }
 0x139   : > { %v3221_v28 = vpack.c.bf16 %v2589_v58, %v2587_v31  ;;  %v582_v61 = vsel %vm435_vm4, %v3786_v63, 0.0  ;;  %vm731_vm5 = vcmp.eq.s32.totalorder %v5190_v53, %v3848_v54  ;;  %vm733_vm6 = vcmp.eq.s32.totalorder %v5193_v37, %v3848_v54 }
 0x13a   : > { %v878_v7 = vsel %vm731_vm5, %v3794_v2, %v580_v23  ;;  %v880_v17 = vsel %vm733_vm6, %v3794_v2, %v582_v61  ;;  %vm1032_vm7 = vcmp.eq.s32.totalorder %v5190_v53, %v3833_v42  ;;  %vm1034_vm2 = vcmp.eq.s32.totalorder %v5193_v37, %v3833_v42 }
 0x13b   : > { %3222 = vmatprep.subr.bf16.mxu1 %v3221_v28  ;;  %v1179_v19 = vsel %vm1032_vm7, %v3819_v27, %v878_v7  ;;  %v1181_v20 = vsel %vm1034_vm2, %v3819_v27, %v880_v17  ;;  %vm1326_vm8 = vcmp.eq.s32.totalorder %v5190_v53, %v3851_v56  ;;  %vm1328_vm9 = vcmp.eq.s32.totalorder %v5193_v37, %v3851_v56 }
 0x13c   : > { %v1473_v52 = vsel %vm1326_vm8, %v3836_v43, %v1179_v19  ;;  %v1475_v5 = vsel %vm1328_vm9, %v3836_v43, %v1181_v20  ;;  %vm1624_vm10 = vcmp.eq.s32.totalorder %v5190_v53, %v3881_v26  ;;  %vm1626_vm11 = vcmp.eq.s32.totalorder %v5193_v37, %v3881_v26 }
 0x13d   : > { %v1771_v15 = vsel %vm1624_vm10, %v3884_v32, %v1473_v52  ;;  %v1773_v57 = vsel %vm1626_vm11, %v3884_v32, %v1475_v5  ;;  %vm1917_vm12 = vcmp.eq.s32.totalorder %v5190_v53, %v3907_v6  ;;  %vm1919_vm13 = vcmp.eq.s32.totalorder %v5193_v37, %v3907_v6 }
 0x13e   : > { %v2064_v40 = vsel %vm1917_vm12, %v3910_v24, %v1771_v15  ;;  %v2066_v1 = vsel %vm1919_vm13, %v3910_v24, %v1773_v57  ;;  %vm2211_vm14 = vcmp.eq.s32.totalorder %v5190_v53, %v3964_v41  ;;  %vm2213_vm15 = vcmp.eq.s32.totalorder %v5193_v37, %v3964_v41 }
 0x13f   : > { %v2358_v9 = vsel %vm2211_vm14, %v3950_v48, %v2064_v40  ;;  %v2360_v11 = vsel %vm2213_vm15, %v3950_v48, %v2066_v1  ;;  %vm2504_vm0 = vcmp.eq.s32.totalorder %v5190_v53, %v3972_v10  ;;  %vm2506_vm1 = vcmp.eq.s32.totalorder %v5193_v37, %v3972_v10 }
 0x140   : > { %v2651_v13 = vsel %vm2504_vm0, %v3958_v12, %v2358_v9  ;;  %v2653_v14 = vsel %vm2506_vm1, %v3958_v12, %v2360_v11  ;;  %vm368_vm3 = vcmp.eq.s32.totalorder %v5183_v34, %v4038_v49  ;;  %vm370_vm4 = vcmp.eq.s32.totalorder %v5186_v21, %v4038_v49 }
 0x141   : > { %v3285_v33 = vpack.c.bf16 %v2653_v14, %v2651_v13  ;;  %v515_v55 = vsel %vm368_vm3, %v4021_v39, 0.0  ;;  %v517_v29 = vsel %vm370_vm4, %v4021_v39, 0.0  ;;  %vm666_vm5 = vcmp.eq.s32.totalorder %v5183_v34, %v4055_v3 }
 0x142   : > { %vm668_vm6 = vcmp.eq.s32.totalorder %v5186_v21, %v4055_v3  ;;  %v813_v50 = vsel %vm666_vm5, %v4029_v45, %v515_v55  ;;  %vm967_vm7 = vcmp.eq.s32.totalorder %v5183_v34, %v4035_v8  ;;  %vm969_vm2 = vcmp.eq.s32.totalorder %v5186_v21, %v4035_v8 }
 0x143   : > { %3286 = vmatprep.subr.bf16.mxu0 %v3285_v33  ;;  %v815_v38 = vsel %vm668_vm6, %v4029_v45, %v517_v29  ;;  %v1114_v30 = vsel %vm967_vm7, %v4044_v16, %v813_v50  ;;  %vm1261_vm8 = vcmp.eq.s32.totalorder %v5183_v34, %v4068_v0  ;;  %vm1263_vm9 = vcmp.eq.s32.totalorder %v5186_v21, %v4068_v0 }
 0x144   : > { %v1116_v22 = vsel %vm969_vm2, %v4044_v16, %v815_v38  ;;  %v1408_v31 = vsel %vm1261_vm8, %v4052_v51, %v1114_v30  ;;  %vm1559_vm10 = vcmp.eq.s32.totalorder %v5183_v34, %v4087_v59  ;;  %vm1561_vm11 = vcmp.eq.s32.totalorder %v5186_v21, %v4087_v59 }
 0x145   : > { %v1410_v58 = vsel %vm1263_vm9, %v4052_v51, %v1116_v22  ;;  %v1706_v23 = vsel %vm1559_vm10, %v4090_v62, %v1408_v31  ;;  %vm1852_vm12 = vcmp.eq.s32.totalorder %v5183_v34, %v4109_v46  ;;  %vm1854_vm13 = vcmp.eq.s32.totalorder %v5186_v21, %v4109_v46 }
 0x146   : > { %v1708_v28 = vsel %vm1561_vm11, %v4090_v62, %v1410_v58  ;;  %v1999_v61 = vsel %vm1852_vm12, %v4112_v60, %v1706_v23  ;;  %vm2146_vm14 = vcmp.eq.s32.totalorder %v5183_v34, %v4115_v25  ;;  %vm2148_vm15 = vcmp.eq.s32.totalorder %v5186_v21, %v4115_v25 }
 0x147   : > { %v2001_v7 = vsel %vm1854_vm13, %v4112_v60, %v1708_v28  ;;  %v2293_v17 = vsel %vm2146_vm14, %v4118_v35, %v1999_v61  ;;  %vm2439_vm0 = vcmp.eq.s32.totalorder %v5183_v34, %v4141_v44  ;;  %vm2441_vm1 = vcmp.eq.s32.totalorder %v5186_v21, %v4141_v44 }
 0x148   : > { %v2295_v19 = vsel %vm2148_vm15, %v4118_v35, %v2001_v7  ;;  %v2586_v20 = vsel %vm2439_vm0, %v4144_v36, %v2293_v17  ;;  %vm432_vm3 = vcmp.eq.s32.totalorder %v5190_v53, %v4038_v49  ;;  %vm434_vm4 = vcmp.eq.s32.totalorder %v5193_v37, %v4038_v49 }
 0x149   : > { %v2588_v52 = vsel %vm2441_vm1, %v4144_v36, %v2295_v19  ;;  %v579_v5 = vsel %vm432_vm3, %v4021_v39, 0.0  ;;  %v581_v15 = vsel %vm434_vm4, %v4021_v39, 0.0  ;;  %vm730_vm5 = vcmp.eq.s32.totalorder %v5190_v53, %v4055_v3 }
 0x14a   : > { %v3223_v34 = vpack.c.bf16 %v2588_v52, %v2586_v20  ;;  %vm732_vm6 = vcmp.eq.s32.totalorder %v5193_v37, %v4055_v3  ;;  %v877_v21 = vsel %vm730_vm5, %v4029_v45, %v579_v5  ;;  %vm1031_vm7 = vcmp.eq.s32.totalorder %v5190_v53, %v4035_v8 }
 0x14b   : > { %v879_v57 = vsel %vm732_vm6, %v4029_v45, %v581_v15  ;;  %vm1033_vm2 = vcmp.eq.s32.totalorder %v5193_v37, %v4035_v8  ;;  %v1178_v40 = vsel %vm1031_vm7, %v4044_v16, %v877_v21  ;;  %vm1325_vm8 = vcmp.eq.s32.totalorder %v5190_v53, %v4068_v0 }
 0x14c   : > { %3224 = vmatpush1.bf16.msra.mxu1 %v3223_v34  ;;  %v1180_v1 = vsel %vm1033_vm2, %v4044_v16, %v879_v57  ;;  %vm1327_vm9 = vcmp.eq.s32.totalorder %v5193_v37, %v4068_v0  ;;  %v1472_v9 = vsel %vm1325_vm8, %v4052_v51, %v1178_v40  ;;  %vm1623_vm10 = vcmp.eq.s32.totalorder %v5190_v53, %v4087_v59 }
 0x14d   : > { %v1474_v11 = vsel %vm1327_vm9, %v4052_v51, %v1180_v1  ;;  %vm1625_vm11 = vcmp.eq.s32.totalorder %v5193_v37, %v4087_v59  ;;  %v1770_v13 = vsel %vm1623_vm10, %v4090_v62, %v1472_v9  ;;  %vm1916_vm12 = vcmp.eq.s32.totalorder %v5190_v53, %v4109_v46 }
 0x14e   : > { %v1772_v14 = vsel %vm1625_vm11, %v4090_v62, %v1474_v11  ;;  %vm1918_vm13 = vcmp.eq.s32.totalorder %v5193_v37, %v4109_v46  ;;  %v2063_v33 = vsel %vm1916_vm12, %v4112_v60, %v1770_v13  ;;  %vm2210_vm14 = vcmp.eq.s32.totalorder %v5190_v53, %v4115_v25 }
 0x14f   : > { %v2065_v55 = vsel %vm1918_vm13, %v4112_v60, %v1772_v14  ;;  %vm2212_vm15 = vcmp.eq.s32.totalorder %v5193_v37, %v4115_v25  ;;  %v2357_v29 = vsel %vm2210_vm14, %v4118_v35, %v2063_v33  ;;  %vm2503_vm0 = vcmp.eq.s32.totalorder %v5190_v53, %v4141_v44 }
 0x150   : > { %v2359_v50 = vsel %vm2212_vm15, %v4118_v35, %v2065_v55  ;;  %vm2505_vm1 = vcmp.eq.s32.totalorder %v5193_v37, %v4141_v44  ;;  %v2650_v38 = vsel %vm2503_vm0, %v4144_v36, %v2357_v29  ;;  %v5390_v30 = vadd.s32 120, %v3693_v4 }
 0x151   : > { %v2652_v22 = vsel %vm2505_vm1, %v4144_v36, %v2359_v50  ;;  %vm373_vm3 = vcmp.eq.s32.totalorder %v5196_v18, %v3845_v47  ;;  %vm671_vm4 = vcmp.eq.s32.totalorder %v5196_v18, %v3848_v54  ;;  %vm972_vm5 = vcmp.eq.s32.totalorder %v5196_v18, %v3833_v42 }
 0x152   : > { %v3287_v53 = vpack.c.bf16 %v2652_v22, %v2650_v38  ;;  %vm375_vm6 = vcmp.eq.s32.totalorder %v5390_v30, %v3845_v47  ;;  %v520_v37 = vsel %vm373_vm3, %v3786_v63, 0.0  ;;  %vm673_vm7 = vcmp.eq.s32.totalorder %v5390_v30, %v3848_v54 }
 0x153   : > { %v522_v31 = vsel %vm375_vm6, %v3786_v63, 0.0  ;;  %v818_v58 = vsel %vm671_vm4, %v3794_v2, %v520_v37  ;;  %vm974_vm2 = vcmp.eq.s32.totalorder %v5390_v30, %v3833_v42  ;;  %vm1266_vm8 = vcmp.eq.s32.totalorder %v5196_v18, %v3851_v56 }
 0x154   : > { %3288 = vmatpush1.bf16.msra.mxu0 %v3287_v53  ;;  %v820_v23 = vsel %vm673_vm7, %v3794_v2, %v522_v31  ;;  %v1119_v28 = vsel %vm972_vm5, %v3819_v27, %v818_v58  ;;  %vm1268_vm9 = vcmp.eq.s32.totalorder %v5390_v30, %v3851_v56  ;;  %vm1564_vm10 = vcmp.eq.s32.totalorder %v5196_v18, %v3881_v26 }
 0x155   : > { %v1121_v61 = vsel %vm974_vm2, %v3819_v27, %v820_v23  ;;  %v1413_v7 = vsel %vm1266_vm8, %v3836_v43, %v1119_v28  ;;  %vm1566_vm11 = vcmp.eq.s32.totalorder %v5390_v30, %v3881_v26  ;;  %vm1857_vm12 = vcmp.eq.s32.totalorder %v5196_v18, %v3907_v6 }
 0x156   : > { %v1415_v17 = vsel %vm1268_vm9, %v3836_v43, %v1121_v61  ;;  %v1711_v19 = vsel %vm1564_vm10, %v3884_v32, %v1413_v7  ;;  %vm1859_vm13 = vcmp.eq.s32.totalorder %v5390_v30, %v3907_v6  ;;  %vm2151_vm14 = vcmp.eq.s32.totalorder %v5196_v18, %v3964_v41 }
 0x157   : > { %v1713_v20 = vsel %vm1566_vm11, %v3884_v32, %v1415_v17  ;;  %v2004_v52 = vsel %vm1857_vm12, %v3910_v24, %v1711_v19  ;;  %vm2153_vm15 = vcmp.eq.s32.totalorder %v5390_v30, %v3964_v41  ;;  %vm2444_vm0 = vcmp.eq.s32.totalorder %v5196_v18, %v3972_v10 }
 0x158   : > { %v2006_v5 = vsel %vm1859_vm13, %v3910_v24, %v1713_v20  ;;  %v2298_v15 = vsel %vm2151_vm14, %v3950_v48, %v2004_v52  ;;  %vm2446_vm1 = vcmp.eq.s32.totalorder %v5390_v30, %v3972_v10  ;;  %v5439_v34 = vadd.s32 368, %v3693_v4 }
 0x159   : > { %v2300_v21 = vsel %vm2153_vm15, %v3950_v48, %v2006_v5  ;;  %v2591_v57 = vsel %vm2444_vm0, %v3958_v12, %v2298_v15  ;;  %v5444_v40 = vadd.s32 376, %v3693_v4  ;;  %vm372_vm3 = vcmp.eq.s32.totalorder %v5196_v18, %v4038_v49 }
 0x15a   : > { %v2593_v1 = vsel %vm2446_vm1, %v3958_v12, %v2300_v21  ;;  %vm437_vm4 = vcmp.eq.s32.totalorder %v5439_v34, %v3845_v47  ;;  %vm735_vm5 = vcmp.eq.s32.totalorder %v5439_v34, %v3848_v54  ;;  %vm1036_vm6 = vcmp.eq.s32.totalorder %v5439_v34, %v3833_v42 }
 0x15b   : > { %v3225_v9 = vpack.c.bf16 %v2593_v1, %v2591_v57  ;;  %vm439_vm7 = vcmp.eq.s32.totalorder %v5444_v40, %v3845_v47  ;;  %v584_v11 = vsel %vm437_vm4, %v3786_v63, 0.0  ;;  %vm737_vm2 = vcmp.eq.s32.totalorder %v5444_v40, %v3848_v54 }
 0x15c   : > { %v586_v13 = vsel %vm439_vm7, %v3786_v63, 0.0  ;;  %v882_v14 = vsel %vm735_vm5, %v3794_v2, %v584_v11  ;;  %vm1038_vm8 = vcmp.eq.s32.totalorder %v5444_v40, %v3833_v42  ;;  %vm1330_vm9 = vcmp.eq.s32.totalorder %v5439_v34, %v3851_v56 }
 0x15d   : > { %3226 = vmatprep.subr.bf16.mxu1 %v3225_v9  ;;  %v884_v33 = vsel %vm737_vm2, %v3794_v2, %v586_v13  ;;  %v1183_v55 = vsel %vm1036_vm6, %v3819_v27, %v882_v14  ;;  %vm1332_vm10 = vcmp.eq.s32.totalorder %v5444_v40, %v3851_v56  ;;  %vm1628_vm11 = vcmp.eq.s32.totalorder %v5439_v34, %v3881_v26 }
 0x15e   : > { %v1185_v29 = vsel %vm1038_vm8, %v3819_v27, %v884_v33  ;;  %v1477_v50 = vsel %vm1330_vm9, %v3836_v43, %v1183_v55  ;;  %vm1630_vm12 = vcmp.eq.s32.totalorder %v5444_v40, %v3881_v26  ;;  %vm1921_vm13 = vcmp.eq.s32.totalorder %v5439_v34, %v3907_v6 }
 0x15f   : > { %v1479_v38 = vsel %vm1332_vm10, %v3836_v43, %v1185_v29  ;;  %v1775_v22 = vsel %vm1628_vm11, %v3884_v32, %v1477_v50  ;;  %vm1923_vm14 = vcmp.eq.s32.totalorder %v5444_v40, %v3907_v6  ;;  %vm2215_vm15 = vcmp.eq.s32.totalorder %v5439_v34, %v3964_v41 }
 0x160   : > { %v1777_v53 = vsel %vm1630_vm12, %v3884_v32, %v1479_v38  ;;  %v2068_v37 = vsel %vm1921_vm13, %v3910_v24, %v1775_v22  ;;  %vm2217_vm0 = vcmp.eq.s32.totalorder %v5444_v40, %v3964_v41  ;;  %vm2508_vm1 = vcmp.eq.s32.totalorder %v5439_v34, %v3972_v10 }
 0x161   : > { %v2070_v31 = vsel %vm1923_vm14, %v3910_v24, %v1777_v53  ;;  %v2362_v58 = vsel %vm2215_vm15, %v3950_v48, %v2068_v37  ;;  %vm2510_vm4 = vcmp.eq.s32.totalorder %v5444_v40, %v3972_v10  ;;  %vm374_vm5 = vcmp.eq.s32.totalorder %v5390_v30, %v4038_v49 }
 0x162   : > { %v2364_v23 = vsel %vm2217_vm0, %v3950_v48, %v2070_v31  ;;  %v2655_v28 = vsel %vm2508_vm1, %v3958_v12, %v2362_v58  ;;  %v519_v61 = vsel %vm372_vm3, %v4021_v39, 0.0  ;;  %v521_v7 = vsel %vm374_vm5, %v4021_v39, 0.0 }
 0x163   : > { %v2657_v17 = vsel %vm2510_vm4, %v3958_v12, %v2364_v23  ;;  %vm670_vm6 = vcmp.eq.s32.totalorder %v5196_v18, %v4055_v3  ;;  %vm672_vm7 = vcmp.eq.s32.totalorder %v5390_v30, %v4055_v3  ;;  %vm971_vm2 = vcmp.eq.s32.totalorder %v5196_v18, %v4035_v8 }
 0x164   : > { %v3289_v19 = vpack.c.bf16 %v2657_v17, %v2655_v28  ;;  %v817_v20 = vsel %vm670_vm6, %v4029_v45, %v519_v61  ;;  %v819_v52 = vsel %vm672_vm7, %v4029_v45, %v521_v7  ;;  %vm973_vm3 = vcmp.eq.s32.totalorder %v5390_v30, %v4035_v8 }
 0x165   : > { %v1118_v5 = vsel %vm971_vm2, %v4044_v16, %v817_v20  ;;  %v1120_v15 = vsel %vm973_vm3, %v4044_v16, %v819_v52  ;;  %vm1265_vm8 = vcmp.eq.s32.totalorder %v5196_v18, %v4068_v0  ;;  %vm1267_vm9 = vcmp.eq.s32.totalorder %v5390_v30, %v4068_v0 }
 0x166   : > { %3290 = vmatprep.subr.bf16.mxu0 %v3289_v19  ;;  %v1412_v21 = vsel %vm1265_vm8, %v4052_v51, %v1118_v5  ;;  %v1414_v57 = vsel %vm1267_vm9, %v4052_v51, %v1120_v15  ;;  %vm1563_vm10 = vcmp.eq.s32.totalorder %v5196_v18, %v4087_v59  ;;  %vm1565_vm11 = vcmp.eq.s32.totalorder %v5390_v30, %v4087_v59 }
 0x167   : > { %v1710_v1 = vsel %vm1563_vm10, %v4090_v62, %v1412_v21  ;;  %v1712_v9 = vsel %vm1565_vm11, %v4090_v62, %v1414_v57  ;;  %vm1856_vm12 = vcmp.eq.s32.totalorder %v5196_v18, %v4109_v46  ;;  %vm1858_vm13 = vcmp.eq.s32.totalorder %v5390_v30, %v4109_v46 }
 0x168   : > { %v2003_v11 = vsel %vm1856_vm12, %v4112_v60, %v1710_v1  ;;  %v2005_v13 = vsel %vm1858_vm13, %v4112_v60, %v1712_v9  ;;  %vm2150_vm14 = vcmp.eq.s32.totalorder %v5196_v18, %v4115_v25  ;;  %vm2152_vm15 = vcmp.eq.s32.totalorder %v5390_v30, %v4115_v25 }
 0x169   : > { %v2297_v14 = vsel %vm2150_vm14, %v4118_v35, %v2003_v11  ;;  %v2299_v33 = vsel %vm2152_vm15, %v4118_v35, %v2005_v13  ;;  %vm2443_vm0 = vcmp.eq.s32.totalorder %v5196_v18, %v4141_v44  ;;  %vm2445_vm1 = vcmp.eq.s32.totalorder %v5390_v30, %v4141_v44 }
 0x16a   : > { %v2590_v55 = vsel %vm2443_vm0, %v4144_v36, %v2297_v14  ;;  %v2592_v29 = vsel %vm2445_vm1, %v4144_v36, %v2299_v33  ;;  %vm436_vm4 = vcmp.eq.s32.totalorder %v5439_v34, %v4038_v49  ;;  %vm438_vm5 = vcmp.eq.s32.totalorder %v5444_v40, %v4038_v49 }
 0x16b   : > { %v3227_v50 = vpack.c.bf16 %v2592_v29, %v2590_v55  ;;  %v583_v38 = vsel %vm436_vm4, %v4021_v39, 0.0  ;;  %v585_v22 = vsel %vm438_vm5, %v4021_v39, 0.0  ;;  %vm734_vm6 = vcmp.eq.s32.totalorder %v5439_v34, %v4055_v3 }
 0x16c   : > { %vm736_vm7 = vcmp.eq.s32.totalorder %v5444_v40, %v4055_v3  ;;  %v881_v18 = vsel %vm734_vm6, %v4029_v45, %v583_v38  ;;  %vm1035_vm2 = vcmp.eq.s32.totalorder %v5439_v34, %v4035_v8  ;;  %vm1037_vm3 = vcmp.eq.s32.totalorder %v5444_v40, %v4035_v8 }
 0x16d   : > { %3228 = vmatpush1.bf16.msra.mxu1 %v3227_v50  ;;  %v883_v30 = vsel %vm736_vm7, %v4029_v45, %v585_v22  ;;  %v1182_v53 = vsel %vm1035_vm2, %v4044_v16, %v881_v18  ;;  %vm1329_vm8 = vcmp.eq.s32.totalorder %v5439_v34, %v4068_v0  ;;  %vm1331_vm9 = vcmp.eq.s32.totalorder %v5444_v40, %v4068_v0 }
 0x16e   : > { %v1184_v37 = vsel %vm1037_vm3, %v4044_v16, %v883_v30  ;;  %v1476_v31 = vsel %vm1329_vm8, %v4052_v51, %v1182_v53  ;;  %vm1627_vm10 = vcmp.eq.s32.totalorder %v5439_v34, %v4087_v59  ;;  %vm1629_vm11 = vcmp.eq.s32.totalorder %v5444_v40, %v4087_v59 }
 0x16f   : > { %v1478_v58 = vsel %vm1331_vm9, %v4052_v51, %v1184_v37  ;;  %v1774_v23 = vsel %vm1627_vm10, %v4090_v62, %v1476_v31  ;;  %vm1920_vm12 = vcmp.eq.s32.totalorder %v5439_v34, %v4109_v46  ;;  %vm1922_vm13 = vcmp.eq.s32.totalorder %v5444_v40, %v4109_v46 }
 0x170   : > { %v1776_v28 = vsel %vm1629_vm11, %v4090_v62, %v1478_v58  ;;  %v2067_v61 = vsel %vm1920_vm12, %v4112_v60, %v1774_v23  ;;  %vm2214_vm14 = vcmp.eq.s32.totalorder %v5439_v34, %v4115_v25  ;;  %vm2216_vm15 = vcmp.eq.s32.totalorder %v5444_v40, %v4115_v25 }
 0x171   : > { %v2069_v7 = vsel %vm1922_vm13, %v4112_v60, %v1776_v28  ;;  %v2361_v17 = vsel %vm2214_vm14, %v4118_v35, %v2067_v61  ;;  %vm2507_vm0 = vcmp.eq.s32.totalorder %v5439_v34, %v4141_v44  ;;  %vm2509_vm1 = vcmp.eq.s32.totalorder %v5444_v40, %v4141_v44 }
 0x172   : > { %v2363_v19 = vsel %vm2216_vm15, %v4118_v35, %v2069_v7  ;;  %v2654_v20 = vsel %vm2507_vm0, %v4144_v36, %v2361_v17  ;;  %v5594_v52 = vadd.s32 128, %v3693_v4  ;;  %v5597_v5 = vadd.s32 136, %v3693_v4 }
 0x173   : > { %v2656_v15 = vsel %vm2509_vm1, %v4144_v36, %v2363_v19  ;;  %v5601_v21 = vadd.s32 384, %v3693_v4  ;;  %v5604_v34 = vadd.s32 392, %v3693_v4  ;;  %v5607_v40 = vadd.s32 144, %v3693_v4 }
 0x174   : > { %v3291_v57 = vpack.c.bf16 %v2656_v15, %v2654_v20  ;;  %vm377_vm4 = vcmp.eq.s32.totalorder %v5594_v52, %v3845_v47  ;;  %vm379_vm5 = vcmp.eq.s32.totalorder %v5597_v5, %v3845_v47  ;;  %vm675_vm6 = vcmp.eq.s32.totalorder %v5594_v52, %v3848_v54 }
 0x175   : > { %v524_v1 = vsel %vm377_vm4, %v3786_v63, 0.0  ;;  %v526_v9 = vsel %vm379_vm5, %v3786_v63, 0.0  ;;  %vm677_vm7 = vcmp.eq.s32.totalorder %v5597_v5, %v3848_v54  ;;  %vm976_vm2 = vcmp.eq.s32.totalorder %v5594_v52, %v3833_v42 }
 0x176   : > { %3292 = vmatpush1.bf16.msra.mxu0 %v3291_v57  ;;  %v822_v11 = vsel %vm675_vm6, %v3794_v2, %v524_v1  ;;  %v824_v13 = vsel %vm677_vm7, %v3794_v2, %v526_v9  ;;  %vm978_vm3 = vcmp.eq.s32.totalorder %v5597_v5, %v3833_v42  ;;  %vm1270_vm8 = vcmp.eq.s32.totalorder %v5594_v52, %v3851_v56 }
 0x177   : > { %v1123_v14 = vsel %vm976_vm2, %v3819_v27, %v822_v11  ;;  %v1125_v33 = vsel %vm978_vm3, %v3819_v27, %v824_v13  ;;  %vm1272_vm9 = vcmp.eq.s32.totalorder %v5597_v5, %v3851_v56  ;;  %vm1568_vm10 = vcmp.eq.s32.totalorder %v5594_v52, %v3881_v26 }
 0x178   : > { %v1417_v55 = vsel %vm1270_vm8, %v3836_v43, %v1123_v14  ;;  %v1419_v29 = vsel %vm1272_vm9, %v3836_v43, %v1125_v33  ;;  %vm1570_vm11 = vcmp.eq.s32.totalorder %v5597_v5, %v3881_v26  ;;  %vm1861_vm12 = vcmp.eq.s32.totalorder %v5594_v52, %v3907_v6 }
 0x179   : > { %v1715_v50 = vsel %vm1568_vm10, %v3884_v32, %v1417_v55  ;;  %v1717_v38 = vsel %vm1570_vm11, %v3884_v32, %v1419_v29  ;;  %vm1863_vm13 = vcmp.eq.s32.totalorder %v5597_v5, %v3907_v6  ;;  %vm2155_vm14 = vcmp.eq.s32.totalorder %v5594_v52, %v3964_v41 }
 0x17a   : > { %v2008_v22 = vsel %vm1861_vm12, %v3910_v24, %v1715_v50  ;;  %v2010_v18 = vsel %vm1863_vm13, %v3910_v24, %v1717_v38  ;;  %vm2157_vm15 = vcmp.eq.s32.totalorder %v5597_v5, %v3964_v41  ;;  %vm2448_vm0 = vcmp.eq.s32.totalorder %v5594_v52, %v3972_v10 }
 0x17b   : > { %v2302_v30 = vsel %vm2155_vm14, %v3950_v48, %v2008_v22  ;;  %v2304_v53 = vsel %vm2157_vm15, %v3950_v48, %v2010_v18  ;;  %vm2450_vm1 = vcmp.eq.s32.totalorder %v5597_v5, %v3972_v10  ;;  %vm441_vm4 = vcmp.eq.s32.totalorder %v5601_v21, %v3845_v47 }
 0x17c   : > { %v2595_v37 = vsel %vm2448_vm0, %v3958_v12, %v2302_v30  ;;  %v2597_v31 = vsel %vm2450_vm1, %v3958_v12, %v2304_v53  ;;  %vm443_vm5 = vcmp.eq.s32.totalorder %v5604_v34, %v3845_v47  ;;  %v588_v58 = vsel %vm441_vm4, %v3786_v63, 0.0 }
 0x17d   : > { %v3229_v23 = vpack.c.bf16 %v2597_v31, %v2595_v37  ;;  %v590_v28 = vsel %vm443_vm5, %v3786_v63, 0.0  ;;  %vm739_vm6 = vcmp.eq.s32.totalorder %v5601_v21, %v3848_v54  ;;  %vm741_vm7 = vcmp.eq.s32.totalorder %v5604_v34, %v3848_v54 }
 0x17e   : > { %v886_v61 = vsel %vm739_vm6, %v3794_v2, %v588_v58  ;;  %v888_v7 = vsel %vm741_vm7, %v3794_v2, %v590_v28  ;;  %vm1040_vm2 = vcmp.eq.s32.totalorder %v5601_v21, %v3833_v42  ;;  %vm1042_vm3 = vcmp.eq.s32.totalorder %v5604_v34, %v3833_v42 }
 0x17f   : > { %3230 = vmatprep.subr.bf16.mxu1 %v3229_v23  ;;  %v1187_v17 = vsel %vm1040_vm2, %v3819_v27, %v886_v61  ;;  %v1189_v19 = vsel %vm1042_vm3, %v3819_v27, %v888_v7  ;;  %vm1334_vm8 = vcmp.eq.s32.totalorder %v5601_v21, %v3851_v56  ;;  %vm1336_vm9 = vcmp.eq.s32.totalorder %v5604_v34, %v3851_v56 }
 0x180   : > { %v1481_v20 = vsel %vm1334_vm8, %v3836_v43, %v1187_v17  ;;  %v1483_v15 = vsel %vm1336_vm9, %v3836_v43, %v1189_v19  ;;  %vm1632_vm10 = vcmp.eq.s32.totalorder %v5601_v21, %v3881_v26  ;;  %vm1634_vm11 = vcmp.eq.s32.totalorder %v5604_v34, %v3881_v26 }
 0x181   : > { %v1779_v57 = vsel %vm1632_vm10, %v3884_v32, %v1481_v20  ;;  %v1781_v1 = vsel %vm1634_vm11, %v3884_v32, %v1483_v15  ;;  %vm1925_vm12 = vcmp.eq.s32.totalorder %v5601_v21, %v3907_v6  ;;  %vm1927_vm13 = vcmp.eq.s32.totalorder %v5604_v34, %v3907_v6 }
 0x182   : > { %v2072_v9 = vsel %vm1925_vm12, %v3910_v24, %v1779_v57  ;;  %v2074_v11 = vsel %vm1927_vm13, %v3910_v24, %v1781_v1  ;;  %vm2219_vm14 = vcmp.eq.s32.totalorder %v5601_v21, %v3964_v41  ;;  %vm2221_vm15 = vcmp.eq.s32.totalorder %v5604_v34, %v3964_v41 }
 0x183   : > { %v2366_v13 = vsel %vm2219_vm14, %v3950_v48, %v2072_v9  ;;  %v2368_v14 = vsel %vm2221_vm15, %v3950_v48, %v2074_v11  ;;  %vm2512_vm0 = vcmp.eq.s32.totalorder %v5601_v21, %v3972_v10  ;;  %vm2514_vm1 = vcmp.eq.s32.totalorder %v5604_v34, %v3972_v10 }
 0x184   : > { %v2659_v33 = vsel %vm2512_vm0, %v3958_v12, %v2366_v13  ;;  %v2661_v55 = vsel %vm2514_vm1, %v3958_v12, %v2368_v14  ;;  %vm376_vm4 = vcmp.eq.s32.totalorder %v5594_v52, %v4038_v49  ;;  %vm378_vm5 = vcmp.eq.s32.totalorder %v5597_v5, %v4038_v49 }
 0x185   : > { %v3293_v29 = vpack.c.bf16 %v2661_v55, %v2659_v33  ;;  %v523_v50 = vsel %vm376_vm4, %v4021_v39, 0.0  ;;  %v525_v38 = vsel %vm378_vm5, %v4021_v39, 0.0  ;;  %vm674_vm6 = vcmp.eq.s32.totalorder %v5594_v52, %v4055_v3 }
 0x186   : > { %vm676_vm7 = vcmp.eq.s32.totalorder %v5597_v5, %v4055_v3  ;;  %v821_v22 = vsel %vm674_vm6, %v4029_v45, %v523_v50  ;;  %vm975_vm2 = vcmp.eq.s32.totalorder %v5594_v52, %v4035_v8  ;;  %vm977_vm3 = vcmp.eq.s32.totalorder %v5597_v5, %v4035_v8 }
 0x187   : > { %3294 = vmatprep.subr.bf16.mxu0 %v3293_v29  ;;  %v823_v18 = vsel %vm676_vm7, %v4029_v45, %v525_v38  ;;  %v1122_v30 = vsel %vm975_vm2, %v4044_v16, %v821_v22  ;;  %vm1269_vm8 = vcmp.eq.s32.totalorder %v5594_v52, %v4068_v0  ;;  %vm1271_vm9 = vcmp.eq.s32.totalorder %v5597_v5, %v4068_v0 }
 0x188   : > { %v1124_v53 = vsel %vm977_vm3, %v4044_v16, %v823_v18  ;;  %v1416_v37 = vsel %vm1269_vm8, %v4052_v51, %v1122_v30  ;;  %vm1567_vm10 = vcmp.eq.s32.totalorder %v5594_v52, %v4087_v59  ;;  %vm1569_vm11 = vcmp.eq.s32.totalorder %v5597_v5, %v4087_v59 }
 0x189   : > { %v1418_v31 = vsel %vm1271_vm9, %v4052_v51, %v1124_v53  ;;  %v1714_v58 = vsel %vm1567_vm10, %v4090_v62, %v1416_v37  ;;  %vm1860_vm12 = vcmp.eq.s32.totalorder %v5594_v52, %v4109_v46  ;;  %vm1862_vm13 = vcmp.eq.s32.totalorder %v5597_v5, %v4109_v46 }
 0x18a   : > { %v1716_v23 = vsel %vm1569_vm11, %v4090_v62, %v1418_v31  ;;  %v2007_v28 = vsel %vm1860_vm12, %v4112_v60, %v1714_v58  ;;  %vm2154_vm14 = vcmp.eq.s32.totalorder %v5594_v52, %v4115_v25  ;;  %vm2156_vm15 = vcmp.eq.s32.totalorder %v5597_v5, %v4115_v25 }
 0x18b   : > { %v2009_v61 = vsel %vm1862_vm13, %v4112_v60, %v1716_v23  ;;  %v2301_v7 = vsel %vm2154_vm14, %v4118_v35, %v2007_v28  ;;  %vm2447_vm0 = vcmp.eq.s32.totalorder %v5594_v52, %v4141_v44  ;;  %vm2449_vm1 = vcmp.eq.s32.totalorder %v5597_v5, %v4141_v44 }
 0x18c   : > { %v2303_v17 = vsel %vm2156_vm15, %v4118_v35, %v2009_v61  ;;  %v2594_v19 = vsel %vm2447_vm0, %v4144_v36, %v2301_v7  ;;  %vm440_vm4 = vcmp.eq.s32.totalorder %v5601_v21, %v4038_v49  ;;  %vm442_vm5 = vcmp.eq.s32.totalorder %v5604_v34, %v4038_v49 }
 0x18d   : > { %v2596_v20 = vsel %vm2449_vm1, %v4144_v36, %v2303_v17  ;;  %v587_v15 = vsel %vm440_vm4, %v4021_v39, 0.0  ;;  %v589_v57 = vsel %vm442_vm5, %v4021_v39, 0.0  ;;  %vm738_vm6 = vcmp.eq.s32.totalorder %v5601_v21, %v4055_v3 }
 0x18e   : > { %v3231_v52 = vpack.c.bf16 %v2596_v20, %v2594_v19  ;;  %vm740_vm7 = vcmp.eq.s32.totalorder %v5604_v34, %v4055_v3  ;;  %v885_v5 = vsel %vm738_vm6, %v4029_v45, %v587_v15  ;;  %vm1039_vm2 = vcmp.eq.s32.totalorder %v5601_v21, %v4035_v8 }
 0x18f   : > { %v887_v1 = vsel %vm740_vm7, %v4029_v45, %v589_v57  ;;  %vm1041_vm3 = vcmp.eq.s32.totalorder %v5604_v34, %v4035_v8  ;;  %v1186_v9 = vsel %vm1039_vm2, %v4044_v16, %v885_v5  ;;  %vm1333_vm8 = vcmp.eq.s32.totalorder %v5601_v21, %v4068_v0 }
 0x190   : > { %3232 = vmatpush1.bf16.msra.mxu1 %v3231_v52  ;;  %v1188_v11 = vsel %vm1041_vm3, %v4044_v16, %v887_v1  ;;  %vm1335_vm9 = vcmp.eq.s32.totalorder %v5604_v34, %v4068_v0  ;;  %v1480_v13 = vsel %vm1333_vm8, %v4052_v51, %v1186_v9  ;;  %vm1631_vm10 = vcmp.eq.s32.totalorder %v5601_v21, %v4087_v59 }
 0x191   : > { %v1482_v14 = vsel %vm1335_vm9, %v4052_v51, %v1188_v11  ;;  %vm1633_vm11 = vcmp.eq.s32.totalorder %v5604_v34, %v4087_v59  ;;  %v1778_v33 = vsel %vm1631_vm10, %v4090_v62, %v1480_v13  ;;  %vm1924_vm12 = vcmp.eq.s32.totalorder %v5601_v21, %v4109_v46 }
 0x192   : > { %v1780_v55 = vsel %vm1633_vm11, %v4090_v62, %v1482_v14  ;;  %vm1926_vm13 = vcmp.eq.s32.totalorder %v5604_v34, %v4109_v46  ;;  %v2071_v29 = vsel %vm1924_vm12, %v4112_v60, %v1778_v33  ;;  %vm2218_vm14 = vcmp.eq.s32.totalorder %v5601_v21, %v4115_v25 }
 0x193   : > { %v2073_v50 = vsel %vm1926_vm13, %v4112_v60, %v1780_v55  ;;  %vm2220_vm15 = vcmp.eq.s32.totalorder %v5604_v34, %v4115_v25  ;;  %v2365_v38 = vsel %vm2218_vm14, %v4118_v35, %v2071_v29  ;;  %vm2511_vm0 = vcmp.eq.s32.totalorder %v5601_v21, %v4141_v44 }
 0x194   : > { %v2367_v22 = vsel %vm2220_vm15, %v4118_v35, %v2073_v50  ;;  %vm2513_vm1 = vcmp.eq.s32.totalorder %v5604_v34, %v4141_v44  ;;  %v2658_v18 = vsel %vm2511_vm0, %v4144_v36, %v2365_v38  ;;  %v5801_v30 = vadd.s32 152, %v3693_v4 }
 0x195   : > { %v2660_v53 = vsel %vm2513_vm1, %v4144_v36, %v2367_v22  ;;  %vm381_vm4 = vcmp.eq.s32.totalorder %v5607_v40, %v3845_v47  ;;  %vm679_vm5 = vcmp.eq.s32.totalorder %v5607_v40, %v3848_v54  ;;  %vm980_vm6 = vcmp.eq.s32.totalorder %v5607_v40, %v3833_v42 }
 0x196   : > { %v3295_v21 = vpack.c.bf16 %v2660_v53, %v2658_v18  ;;  %vm383_vm7 = vcmp.eq.s32.totalorder %v5801_v30, %v3845_v47  ;;  %v528_v34 = vsel %vm381_vm4, %v3786_v63, 0.0  ;;  %vm681_vm2 = vcmp.eq.s32.totalorder %v5801_v30, %v3848_v54 }
 0x197   : > { %v530_v37 = vsel %vm383_vm7, %v3786_v63, 0.0  ;;  %v826_v31 = vsel %vm679_vm5, %v3794_v2, %v528_v34  ;;  %vm982_vm3 = vcmp.eq.s32.totalorder %v5801_v30, %v3833_v42  ;;  %vm1274_vm8 = vcmp.eq.s32.totalorder %v5607_v40, %v3851_v56 }
 0x198   : > { %3296 = vmatpush1.bf16.msra.mxu0 %v3295_v21  ;;  %v828_v58 = vsel %vm681_vm2, %v3794_v2, %v530_v37  ;;  %v1127_v23 = vsel %vm980_vm6, %v3819_v27, %v826_v31  ;;  %vm1276_vm9 = vcmp.eq.s32.totalorder %v5801_v30, %v3851_v56  ;;  %vm1572_vm10 = vcmp.eq.s32.totalorder %v5607_v40, %v3881_v26 }
 0x199   : > { %v1129_v28 = vsel %vm982_vm3, %v3819_v27, %v828_v58  ;;  %v1421_v61 = vsel %vm1274_vm8, %v3836_v43, %v1127_v23  ;;  %vm1574_vm11 = vcmp.eq.s32.totalorder %v5801_v30, %v3881_v26  ;;  %vm1865_vm12 = vcmp.eq.s32.totalorder %v5607_v40, %v3907_v6 }
 0x19a   : > { %v1423_v7 = vsel %vm1276_vm9, %v3836_v43, %v1129_v28  ;;  %v1719_v17 = vsel %vm1572_vm10, %v3884_v32, %v1421_v61  ;;  %vm1867_vm13 = vcmp.eq.s32.totalorder %v5801_v30, %v3907_v6  ;;  %vm2159_vm14 = vcmp.eq.s32.totalorder %v5607_v40, %v3964_v41 }
 0x19b   : > { %v1721_v19 = vsel %vm1574_vm11, %v3884_v32, %v1423_v7  ;;  %v2012_v20 = vsel %vm1865_vm12, %v3910_v24, %v1719_v17  ;;  %vm2161_vm15 = vcmp.eq.s32.totalorder %v5801_v30, %v3964_v41  ;;  %vm2452_vm0 = vcmp.eq.s32.totalorder %v5607_v40, %v3972_v10 }
 0x19c   : > { %v2014_v15 = vsel %vm1867_vm13, %v3910_v24, %v1721_v19  ;;  %v2306_v57 = vsel %vm2159_vm14, %v3950_v48, %v2012_v20  ;;  %vm2454_vm1 = vcmp.eq.s32.totalorder %v5801_v30, %v3972_v10  ;;  %v5850_v52 = vadd.s32 400, %v3693_v4 }
 0x19d   : > { %v2308_v5 = vsel %vm2161_vm15, %v3950_v48, %v2014_v15  ;;  %v2599_v1 = vsel %vm2452_vm0, %v3958_v12, %v2306_v57  ;;  %v5855_v9 = vadd.s32 408, %v3693_v4  ;;  %vm380_vm4 = vcmp.eq.s32.totalorder %v5607_v40, %v4038_v49 }
 0x19e   : > { %v2601_v11 = vsel %vm2454_vm1, %v3958_v12, %v2308_v5  ;;  %vm445_vm5 = vcmp.eq.s32.totalorder %v5850_v52, %v3845_v47  ;;  %vm743_vm6 = vcmp.eq.s32.totalorder %v5850_v52, %v3848_v54  ;;  %vm1044_vm7 = vcmp.eq.s32.totalorder %v5850_v52, %v3833_v42 }
 0x19f   : > { %v3233_v13 = vpack.c.bf16 %v2601_v11, %v2599_v1  ;;  %vm447_vm2 = vcmp.eq.s32.totalorder %v5855_v9, %v3845_v47  ;;  %v592_v14 = vsel %vm445_vm5, %v3786_v63, 0.0  ;;  %vm745_vm3 = vcmp.eq.s32.totalorder %v5855_v9, %v3848_v54 }
 0x1a0   : > { %v594_v33 = vsel %vm447_vm2, %v3786_v63, 0.0  ;;  %v890_v55 = vsel %vm743_vm6, %v3794_v2, %v592_v14  ;;  %vm1046_vm8 = vcmp.eq.s32.totalorder %v5855_v9, %v3833_v42  ;;  %vm1338_vm9 = vcmp.eq.s32.totalorder %v5850_v52, %v3851_v56 }
 0x1a1   : > { %3234 = vmatprep.subr.bf16.mxu1 %v3233_v13  ;;  %v892_v29 = vsel %vm745_vm3, %v3794_v2, %v594_v33  ;;  %v1191_v50 = vsel %vm1044_vm7, %v3819_v27, %v890_v55  ;;  %vm1340_vm10 = vcmp.eq.s32.totalorder %v5855_v9, %v3851_v56  ;;  %vm1636_vm11 = vcmp.eq.s32.totalorder %v5850_v52, %v3881_v26 }
 0x1a2   : > { %v1193_v38 = vsel %vm1046_vm8, %v3819_v27, %v892_v29  ;;  %v1485_v22 = vsel %vm1338_vm9, %v3836_v43, %v1191_v50  ;;  %vm1638_vm12 = vcmp.eq.s32.totalorder %v5855_v9, %v3881_v26  ;;  %vm1929_vm13 = vcmp.eq.s32.totalorder %v5850_v52, %v3907_v6 }
 0x1a3   : > { %v1487_v18 = vsel %vm1340_vm10, %v3836_v43, %v1193_v38  ;;  %v1783_v53 = vsel %vm1636_vm11, %v3884_v32, %v1485_v22  ;;  %vm1931_vm14 = vcmp.eq.s32.totalorder %v5855_v9, %v3907_v6  ;;  %vm2223_vm15 = vcmp.eq.s32.totalorder %v5850_v52, %v3964_v41 }
 0x1a4   : > { %v1785_v21 = vsel %vm1638_vm12, %v3884_v32, %v1487_v18  ;;  %v2076_v34 = vsel %vm1929_vm13, %v3910_v24, %v1783_v53  ;;  %vm2225_vm0 = vcmp.eq.s32.totalorder %v5855_v9, %v3964_v41  ;;  %vm2516_vm1 = vcmp.eq.s32.totalorder %v5850_v52, %v3972_v10 }
 0x1a5   : > { %v2078_v37 = vsel %vm1931_vm14, %v3910_v24, %v1785_v21  ;;  %v2370_v31 = vsel %vm2223_vm15, %v3950_v48, %v2076_v34  ;;  %vm2518_vm5 = vcmp.eq.s32.totalorder %v5855_v9, %v3972_v10  ;;  %vm382_vm6 = vcmp.eq.s32.totalorder %v5801_v30, %v4038_v49 }
 0x1a6   : > { %v2372_v58 = vsel %vm2225_vm0, %v3950_v48, %v2078_v37  ;;  %v2663_v23 = vsel %vm2516_vm1, %v3958_v12, %v2370_v31  ;;  %v527_v28 = vsel %vm380_vm4, %v4021_v39, 0.0  ;;  %v529_v61 = vsel %vm382_vm6, %v4021_v39, 0.0 }
 0x1a7   : > { %v2665_v7 = vsel %vm2518_vm5, %v3958_v12, %v2372_v58  ;;  %vm678_vm7 = vcmp.eq.s32.totalorder %v5607_v40, %v4055_v3  ;;  %vm680_vm2 = vcmp.eq.s32.totalorder %v5801_v30, %v4055_v3  ;;  %vm979_vm3 = vcmp.eq.s32.totalorder %v5607_v40, %v4035_v8 }
 0x1a8   : > { %v3297_v17 = vpack.c.bf16 %v2665_v7, %v2663_v23  ;;  %v825_v19 = vsel %vm678_vm7, %v4029_v45, %v527_v28  ;;  %v827_v20 = vsel %vm680_vm2, %v4029_v45, %v529_v61  ;;  %vm981_vm4 = vcmp.eq.s32.totalorder %v5801_v30, %v4035_v8 }
 0x1a9   : > { %v1126_v15 = vsel %vm979_vm3, %v4044_v16, %v825_v19  ;;  %v1128_v57 = vsel %vm981_vm4, %v4044_v16, %v827_v20  ;;  %vm1273_vm8 = vcmp.eq.s32.totalorder %v5607_v40, %v4068_v0  ;;  %vm1275_vm9 = vcmp.eq.s32.totalorder %v5801_v30, %v4068_v0 }
 0x1aa   : > { %3298 = vmatprep.subr.bf16.mxu0 %v3297_v17  ;;  %v1420_v5 = vsel %vm1273_vm8, %v4052_v51, %v1126_v15  ;;  %v1422_v1 = vsel %vm1275_vm9, %v4052_v51, %v1128_v57  ;;  %vm1571_vm10 = vcmp.eq.s32.totalorder %v5607_v40, %v4087_v59  ;;  %vm1573_vm11 = vcmp.eq.s32.totalorder %v5801_v30, %v4087_v59 }
 0x1ab   : > { %v1718_v11 = vsel %vm1571_vm10, %v4090_v62, %v1420_v5  ;;  %v1720_v13 = vsel %vm1573_vm11, %v4090_v62, %v1422_v1  ;;  %vm1864_vm12 = vcmp.eq.s32.totalorder %v5607_v40, %v4109_v46  ;;  %vm1866_vm13 = vcmp.eq.s32.totalorder %v5801_v30, %v4109_v46 }
 0x1ac   : > { %v2011_v14 = vsel %vm1864_vm12, %v4112_v60, %v1718_v11  ;;  %v2013_v33 = vsel %vm1866_vm13, %v4112_v60, %v1720_v13  ;;  %vm2158_vm14 = vcmp.eq.s32.totalorder %v5607_v40, %v4115_v25  ;;  %vm2160_vm15 = vcmp.eq.s32.totalorder %v5801_v30, %v4115_v25 }
 0x1ad   : > { %v2305_v55 = vsel %vm2158_vm14, %v4118_v35, %v2011_v14  ;;  %v2307_v29 = vsel %vm2160_vm15, %v4118_v35, %v2013_v33  ;;  %vm2451_vm0 = vcmp.eq.s32.totalorder %v5607_v40, %v4141_v44  ;;  %vm2453_vm1 = vcmp.eq.s32.totalorder %v5801_v30, %v4141_v44 }
 0x1ae   : > { %v2598_v50 = vsel %vm2451_vm0, %v4144_v36, %v2305_v55  ;;  %v2600_v38 = vsel %vm2453_vm1, %v4144_v36, %v2307_v29  ;;  %vm444_vm5 = vcmp.eq.s32.totalorder %v5850_v52, %v4038_v49  ;;  %vm446_vm6 = vcmp.eq.s32.totalorder %v5855_v9, %v4038_v49 }
 0x1af   : > { %v3235_v22 = vpack.c.bf16 %v2600_v38, %v2598_v50  ;;  %v591_v18 = vsel %vm444_vm5, %v4021_v39, 0.0  ;;  %v593_v53 = vsel %vm446_vm6, %v4021_v39, 0.0  ;;  %vm742_vm7 = vcmp.eq.s32.totalorder %v5850_v52, %v4055_v3 }
 0x1b0   : > { %vm744_vm2 = vcmp.eq.s32.totalorder %v5855_v9, %v4055_v3  ;;  %v889_v40 = vsel %vm742_vm7, %v4029_v45, %v591_v18  ;;  %vm1043_vm3 = vcmp.eq.s32.totalorder %v5850_v52, %v4035_v8  ;;  %vm1045_vm4 = vcmp.eq.s32.totalorder %v5855_v9, %v4035_v8 }
 0x1b1   : > { %3236 = vmatpush1.bf16.msra.mxu1 %v3235_v22  ;;  %v891_v30 = vsel %vm744_vm2, %v4029_v45, %v593_v53  ;;  %v1190_v21 = vsel %vm1043_vm3, %v4044_v16, %v889_v40  ;;  %vm1337_vm8 = vcmp.eq.s32.totalorder %v5850_v52, %v4068_v0  ;;  %vm1339_vm9 = vcmp.eq.s32.totalorder %v5855_v9, %v4068_v0 }
 0x1b2   : > { %v1192_v34 = vsel %vm1045_vm4, %v4044_v16, %v891_v30  ;;  %v1484_v37 = vsel %vm1337_vm8, %v4052_v51, %v1190_v21  ;;  %vm1635_vm10 = vcmp.eq.s32.totalorder %v5850_v52, %v4087_v59  ;;  %vm1637_vm11 = vcmp.eq.s32.totalorder %v5855_v9, %v4087_v59 }
 0x1b3   : > { %v1486_v31 = vsel %vm1339_vm9, %v4052_v51, %v1192_v34  ;;  %v1782_v58 = vsel %vm1635_vm10, %v4090_v62, %v1484_v37  ;;  %vm1928_vm12 = vcmp.eq.s32.totalorder %v5850_v52, %v4109_v46  ;;  %vm1930_vm13 = vcmp.eq.s32.totalorder %v5855_v9, %v4109_v46 }
 0x1b4   : > { %v1784_v23 = vsel %vm1637_vm11, %v4090_v62, %v1486_v31  ;;  %v2075_v28 = vsel %vm1928_vm12, %v4112_v60, %v1782_v58  ;;  %vm2222_vm14 = vcmp.eq.s32.totalorder %v5850_v52, %v4115_v25  ;;  %vm2224_vm15 = vcmp.eq.s32.totalorder %v5855_v9, %v4115_v25 }
 0x1b5   : > { %v2077_v61 = vsel %vm1930_vm13, %v4112_v60, %v1784_v23  ;;  %v2369_v7 = vsel %vm2222_vm14, %v4118_v35, %v2075_v28  ;;  %vm2515_vm0 = vcmp.eq.s32.totalorder %v5850_v52, %v4141_v44  ;;  %vm2517_vm1 = vcmp.eq.s32.totalorder %v5855_v9, %v4141_v44 }
 0x1b6   : > { %v2371_v17 = vsel %vm2224_vm15, %v4118_v35, %v2077_v61  ;;  %v2662_v19 = vsel %vm2515_vm0, %v4144_v36, %v2369_v7  ;;  %v6005_v20 = vadd.s32 160, %v3693_v4  ;;  %v6008_v15 = vadd.s32 168, %v3693_v4 }
 0x1b7   : > { %v2664_v57 = vsel %vm2517_vm1, %v4144_v36, %v2371_v17  ;;  %v6012_v5 = vadd.s32 416, %v3693_v4  ;;  %v6015_v52 = vadd.s32 424, %v3693_v4  ;;  %v6018_v9 = vadd.s32 176, %v3693_v4 }
 0x1b8   : > { %v3299_v1 = vpack.c.bf16 %v2664_v57, %v2662_v19  ;;  %vm385_vm5 = vcmp.eq.s32.totalorder %v6005_v20, %v3845_v47  ;;  %vm387_vm6 = vcmp.eq.s32.totalorder %v6008_v15, %v3845_v47  ;;  %vm683_vm7 = vcmp.eq.s32.totalorder %v6005_v20, %v3848_v54 }
 0x1b9   : > { %v532_v11 = vsel %vm385_vm5, %v3786_v63, 0.0  ;;  %v534_v13 = vsel %vm387_vm6, %v3786_v63, 0.0  ;;  %vm685_vm2 = vcmp.eq.s32.totalorder %v6008_v15, %v3848_v54  ;;  %vm984_vm3 = vcmp.eq.s32.totalorder %v6005_v20, %v3833_v42 }
 0x1ba   : > { %3300 = vmatpush1.bf16.msra.mxu0 %v3299_v1  ;;  %v830_v14 = vsel %vm683_vm7, %v3794_v2, %v532_v11  ;;  %v832_v33 = vsel %vm685_vm2, %v3794_v2, %v534_v13  ;;  %vm986_vm4 = vcmp.eq.s32.totalorder %v6008_v15, %v3833_v42  ;;  %vm1278_vm8 = vcmp.eq.s32.totalorder %v6005_v20, %v3851_v56 }
 0x1bb   : > { %v1131_v55 = vsel %vm984_vm3, %v3819_v27, %v830_v14  ;;  %v1133_v29 = vsel %vm986_vm4, %v3819_v27, %v832_v33  ;;  %vm1280_vm9 = vcmp.eq.s32.totalorder %v6008_v15, %v3851_v56  ;;  %vm1576_vm10 = vcmp.eq.s32.totalorder %v6005_v20, %v3881_v26 }
 0x1bc   : > { %v1425_v50 = vsel %vm1278_vm8, %v3836_v43, %v1131_v55  ;;  %v1427_v38 = vsel %vm1280_vm9, %v3836_v43, %v1133_v29  ;;  %vm1578_vm11 = vcmp.eq.s32.totalorder %v6008_v15, %v3881_v26  ;;  %vm1869_vm12 = vcmp.eq.s32.totalorder %v6005_v20, %v3907_v6 }
 0x1bd   : > { %v1723_v22 = vsel %vm1576_vm10, %v3884_v32, %v1425_v50  ;;  %v1725_v18 = vsel %vm1578_vm11, %v3884_v32, %v1427_v38  ;;  %vm1871_vm13 = vcmp.eq.s32.totalorder %v6008_v15, %v3907_v6  ;;  %vm2163_vm14 = vcmp.eq.s32.totalorder %v6005_v20, %v3964_v41 }
 0x1be   : > { %v2016_v53 = vsel %vm1869_vm12, %v3910_v24, %v1723_v22  ;;  %v2018_v40 = vsel %vm1871_vm13, %v3910_v24, %v1725_v18  ;;  %vm2165_vm15 = vcmp.eq.s32.totalorder %v6008_v15, %v3964_v41  ;;  %vm2456_vm0 = vcmp.eq.s32.totalorder %v6005_v20, %v3972_v10 }
 0x1bf   : > { %v2310_v30 = vsel %vm2163_vm14, %v3950_v48, %v2016_v53  ;;  %v2312_v21 = vsel %vm2165_vm15, %v3950_v48, %v2018_v40  ;;  %vm2458_vm1 = vcmp.eq.s32.totalorder %v6008_v15, %v3972_v10  ;;  %vm449_vm5 = vcmp.eq.s32.totalorder %v6012_v5, %v3845_v47 }
 0x1c0   : > { %v2603_v34 = vsel %vm2456_vm0, %v3958_v12, %v2310_v30  ;;  %v2605_v37 = vsel %vm2458_vm1, %v3958_v12, %v2312_v21  ;;  %vm451_vm6 = vcmp.eq.s32.totalorder %v6015_v52, %v3845_v47  ;;  %v596_v31 = vsel %vm449_vm5, %v3786_v63, 0.0 }
 0x1c1   : > { %v3237_v58 = vpack.c.bf16 %v2605_v37, %v2603_v34  ;;  %v598_v23 = vsel %vm451_vm6, %v3786_v63, 0.0  ;;  %vm747_vm7 = vcmp.eq.s32.totalorder %v6012_v5, %v3848_v54  ;;  %vm749_vm2 = vcmp.eq.s32.totalorder %v6015_v52, %v3848_v54 }
 0x1c2   : > { %v894_v28 = vsel %vm747_vm7, %v3794_v2, %v596_v31  ;;  %v896_v61 = vsel %vm749_vm2, %v3794_v2, %v598_v23  ;;  %vm1048_vm3 = vcmp.eq.s32.totalorder %v6012_v5, %v3833_v42  ;;  %vm1050_vm4 = vcmp.eq.s32.totalorder %v6015_v52, %v3833_v42 }
 0x1c3   : > { %3238 = vmatprep.subr.bf16.mxu1 %v3237_v58  ;;  %v1195_v7 = vsel %vm1048_vm3, %v3819_v27, %v894_v28  ;;  %v1197_v17 = vsel %vm1050_vm4, %v3819_v27, %v896_v61  ;;  %vm1342_vm8 = vcmp.eq.s32.totalorder %v6012_v5, %v3851_v56  ;;  %vm1344_vm9 = vcmp.eq.s32.totalorder %v6015_v52, %v3851_v56 }
 0x1c4   : > { %v1489_v19 = vsel %vm1342_vm8, %v3836_v43, %v1195_v7  ;;  %v1491_v57 = vsel %vm1344_vm9, %v3836_v43, %v1197_v17  ;;  %vm1640_vm10 = vcmp.eq.s32.totalorder %v6012_v5, %v3881_v26  ;;  %vm1642_vm11 = vcmp.eq.s32.totalorder %v6015_v52, %v3881_v26 }
 0x1c5   : > { %v1787_v1 = vsel %vm1640_vm10, %v3884_v32, %v1489_v19  ;;  %v1789_v11 = vsel %vm1642_vm11, %v3884_v32, %v1491_v57  ;;  %vm1933_vm12 = vcmp.eq.s32.totalorder %v6012_v5, %v3907_v6  ;;  %vm1935_vm13 = vcmp.eq.s32.totalorder %v6015_v52, %v3907_v6 }
 0x1c6   : > { %v2080_v13 = vsel %vm1933_vm12, %v3910_v24, %v1787_v1  ;;  %v2082_v14 = vsel %vm1935_vm13, %v3910_v24, %v1789_v11  ;;  %vm2227_vm14 = vcmp.eq.s32.totalorder %v6012_v5, %v3964_v41  ;;  %vm2229_vm15 = vcmp.eq.s32.totalorder %v6015_v52, %v3964_v41 }
 0x1c7   : > { %v2374_v33 = vsel %vm2227_vm14, %v3950_v48, %v2080_v13  ;;  %v2376_v55 = vsel %vm2229_vm15, %v3950_v48, %v2082_v14  ;;  %vm2520_vm0 = vcmp.eq.s32.totalorder %v6012_v5, %v3972_v10  ;;  %vm2522_vm1 = vcmp.eq.s32.totalorder %v6015_v52, %v3972_v10 }
 0x1c8   : > { %v2667_v29 = vsel %vm2520_vm0, %v3958_v12, %v2374_v33  ;;  %v2669_v50 = vsel %vm2522_vm1, %v3958_v12, %v2376_v55  ;;  %vm384_vm5 = vcmp.eq.s32.totalorder %v6005_v20, %v4038_v49  ;;  %vm386_vm6 = vcmp.eq.s32.totalorder %v6008_v15, %v4038_v49 }
 0x1c9   : > { %v3301_v38 = vpack.c.bf16 %v2669_v50, %v2667_v29  ;;  %v531_v22 = vsel %vm384_vm5, %v4021_v39, 0.0  ;;  %v533_v18 = vsel %vm386_vm6, %v4021_v39, 0.0  ;;  %vm682_vm7 = vcmp.eq.s32.totalorder %v6005_v20, %v4055_v3 }
 0x1ca   : > { %vm684_vm2 = vcmp.eq.s32.totalorder %v6008_v15, %v4055_v3  ;;  %v829_v53 = vsel %vm682_vm7, %v4029_v45, %v531_v22  ;;  %vm983_vm3 = vcmp.eq.s32.totalorder %v6005_v20, %v4035_v8  ;;  %vm985_vm4 = vcmp.eq.s32.totalorder %v6008_v15, %v4035_v8 }
 0x1cb   : > { %3302 = vmatprep.subr.bf16.mxu0 %v3301_v38  ;;  %v831_v40 = vsel %vm684_vm2, %v4029_v45, %v533_v18  ;;  %v1130_v30 = vsel %vm983_vm3, %v4044_v16, %v829_v53  ;;  %vm1277_vm8 = vcmp.eq.s32.totalorder %v6005_v20, %v4068_v0  ;;  %vm1279_vm9 = vcmp.eq.s32.totalorder %v6008_v15, %v4068_v0 }
 0x1cc   : > { %v1132_v21 = vsel %vm985_vm4, %v4044_v16, %v831_v40  ;;  %v1424_v34 = vsel %vm1277_vm8, %v4052_v51, %v1130_v30  ;;  %vm1575_vm10 = vcmp.eq.s32.totalorder %v6005_v20, %v4087_v59  ;;  %vm1577_vm11 = vcmp.eq.s32.totalorder %v6008_v15, %v4087_v59 }
 0x1cd   : > { %v1426_v37 = vsel %vm1279_vm9, %v4052_v51, %v1132_v21  ;;  %v1722_v31 = vsel %vm1575_vm10, %v4090_v62, %v1424_v34  ;;  %vm1868_vm12 = vcmp.eq.s32.totalorder %v6005_v20, %v4109_v46  ;;  %vm1870_vm13 = vcmp.eq.s32.totalorder %v6008_v15, %v4109_v46 }
 0x1ce   : > { %v1724_v58 = vsel %vm1577_vm11, %v4090_v62, %v1426_v37  ;;  %v2015_v23 = vsel %vm1868_vm12, %v4112_v60, %v1722_v31  ;;  %vm2162_vm14 = vcmp.eq.s32.totalorder %v6005_v20, %v4115_v25  ;;  %vm2164_vm15 = vcmp.eq.s32.totalorder %v6008_v15, %v4115_v25 }
 0x1cf   : > { %v2017_v28 = vsel %vm1870_vm13, %v4112_v60, %v1724_v58  ;;  %v2309_v61 = vsel %vm2162_vm14, %v4118_v35, %v2015_v23  ;;  %vm2455_vm0 = vcmp.eq.s32.totalorder %v6005_v20, %v4141_v44  ;;  %vm2457_vm1 = vcmp.eq.s32.totalorder %v6008_v15, %v4141_v44 }
 0x1d0   : > { %v2311_v7 = vsel %vm2164_vm15, %v4118_v35, %v2017_v28  ;;  %v2602_v17 = vsel %vm2455_vm0, %v4144_v36, %v2309_v61  ;;  %vm448_vm5 = vcmp.eq.s32.totalorder %v6012_v5, %v4038_v49  ;;  %vm450_vm6 = vcmp.eq.s32.totalorder %v6015_v52, %v4038_v49 }
 0x1d1   : > { %v2604_v19 = vsel %vm2457_vm1, %v4144_v36, %v2311_v7  ;;  %v595_v57 = vsel %vm448_vm5, %v4021_v39, 0.0  ;;  %v597_v1 = vsel %vm450_vm6, %v4021_v39, 0.0  ;;  %vm746_vm7 = vcmp.eq.s32.totalorder %v6012_v5, %v4055_v3 }
 0x1d2   : > { %v3239_v20 = vpack.c.bf16 %v2604_v19, %v2602_v17  ;;  %vm748_vm2 = vcmp.eq.s32.totalorder %v6015_v52, %v4055_v3  ;;  %v893_v15 = vsel %vm746_vm7, %v4029_v45, %v595_v57  ;;  %vm1047_vm3 = vcmp.eq.s32.totalorder %v6012_v5, %v4035_v8 }
 0x1d3   : > { %v895_v11 = vsel %vm748_vm2, %v4029_v45, %v597_v1  ;;  %vm1049_vm4 = vcmp.eq.s32.totalorder %v6015_v52, %v4035_v8  ;;  %v1194_v13 = vsel %vm1047_vm3, %v4044_v16, %v893_v15  ;;  %vm1341_vm8 = vcmp.eq.s32.totalorder %v6012_v5, %v4068_v0 }
 0x1d4   : > { %3240 = vmatpush1.bf16.msra.mxu1 %v3239_v20  ;;  %v1196_v14 = vsel %vm1049_vm4, %v4044_v16, %v895_v11  ;;  %vm1343_vm9 = vcmp.eq.s32.totalorder %v6015_v52, %v4068_v0  ;;  %v1488_v33 = vsel %vm1341_vm8, %v4052_v51, %v1194_v13  ;;  %vm1639_vm10 = vcmp.eq.s32.totalorder %v6012_v5, %v4087_v59 }
 0x1d5   : > { %v1490_v55 = vsel %vm1343_vm9, %v4052_v51, %v1196_v14  ;;  %vm1641_vm11 = vcmp.eq.s32.totalorder %v6015_v52, %v4087_v59  ;;  %v1786_v29 = vsel %vm1639_vm10, %v4090_v62, %v1488_v33  ;;  %vm1932_vm12 = vcmp.eq.s32.totalorder %v6012_v5, %v4109_v46 }
 0x1d6   : > { %v1788_v50 = vsel %vm1641_vm11, %v4090_v62, %v1490_v55  ;;  %vm1934_vm13 = vcmp.eq.s32.totalorder %v6015_v52, %v4109_v46  ;;  %v2079_v38 = vsel %vm1932_vm12, %v4112_v60, %v1786_v29  ;;  %vm2226_vm14 = vcmp.eq.s32.totalorder %v6012_v5, %v4115_v25 }
 0x1d7   : > { %v2081_v22 = vsel %vm1934_vm13, %v4112_v60, %v1788_v50  ;;  %vm2228_vm15 = vcmp.eq.s32.totalorder %v6015_v52, %v4115_v25  ;;  %v2373_v18 = vsel %vm2226_vm14, %v4118_v35, %v2079_v38  ;;  %vm2519_vm0 = vcmp.eq.s32.totalorder %v6012_v5, %v4141_v44 }
 0x1d8   : > { %v2375_v53 = vsel %vm2228_vm15, %v4118_v35, %v2081_v22  ;;  %vm2521_vm1 = vcmp.eq.s32.totalorder %v6015_v52, %v4141_v44  ;;  %v2666_v40 = vsel %vm2519_vm0, %v4144_v36, %v2373_v18  ;;  %v6212_v30 = vadd.s32 184, %v3693_v4 }
 0x1d9   : > { %v2668_v21 = vsel %vm2521_vm1, %v4144_v36, %v2375_v53  ;;  %vm389_vm5 = vcmp.eq.s32.totalorder %v6018_v9, %v3845_v47  ;;  %vm687_vm6 = vcmp.eq.s32.totalorder %v6018_v9, %v3848_v54  ;;  %vm988_vm7 = vcmp.eq.s32.totalorder %v6018_v9, %v3833_v42 }
 0x1da   : > { %v3303_v5 = vpack.c.bf16 %v2668_v21, %v2666_v40  ;;  %vm391_vm2 = vcmp.eq.s32.totalorder %v6212_v30, %v3845_v47  ;;  %v536_v52 = vsel %vm389_vm5, %v3786_v63, 0.0  ;;  %vm689_vm3 = vcmp.eq.s32.totalorder %v6212_v30, %v3848_v54 }
 0x1db   : > { %v538_v34 = vsel %vm391_vm2, %v3786_v63, 0.0  ;;  %v834_v37 = vsel %vm687_vm6, %v3794_v2, %v536_v52  ;;  %vm990_vm4 = vcmp.eq.s32.totalorder %v6212_v30, %v3833_v42  ;;  %vm1282_vm8 = vcmp.eq.s32.totalorder %v6018_v9, %v3851_v56 }
 0x1dc   : > { %3304 = vmatpush1.bf16.msra.mxu0 %v3303_v5  ;;  %v836_v31 = vsel %vm689_vm3, %v3794_v2, %v538_v34  ;;  %v1135_v58 = vsel %vm988_vm7, %v3819_v27, %v834_v37  ;;  %vm1284_vm9 = vcmp.eq.s32.totalorder %v6212_v30, %v3851_v56  ;;  %vm1580_vm10 = vcmp.eq.s32.totalorder %v6018_v9, %v3881_v26 }
 0x1dd   : > { %v1137_v23 = vsel %vm990_vm4, %v3819_v27, %v836_v31  ;;  %v1429_v28 = vsel %vm1282_vm8, %v3836_v43, %v1135_v58  ;;  %vm1582_vm11 = vcmp.eq.s32.totalorder %v6212_v30, %v3881_v26  ;;  %vm1873_vm12 = vcmp.eq.s32.totalorder %v6018_v9, %v3907_v6 }
 0x1de   : > { %v1431_v61 = vsel %vm1284_vm9, %v3836_v43, %v1137_v23  ;;  %v1727_v7 = vsel %vm1580_vm10, %v3884_v32, %v1429_v28  ;;  %vm1875_vm13 = vcmp.eq.s32.totalorder %v6212_v30, %v3907_v6  ;;  %vm2167_vm14 = vcmp.eq.s32.totalorder %v6018_v9, %v3964_v41 }
 0x1df   : > { %v1729_v17 = vsel %vm1582_vm11, %v3884_v32, %v1431_v61  ;;  %v2020_v19 = vsel %vm1873_vm12, %v3910_v24, %v1727_v7  ;;  %vm2169_vm15 = vcmp.eq.s32.totalorder %v6212_v30, %v3964_v41  ;;  %vm2460_vm0 = vcmp.eq.s32.totalorder %v6018_v9, %v3972_v10 }
 0x1e0   : > { %v2022_v57 = vsel %vm1875_vm13, %v3910_v24, %v1729_v17  ;;  %v2314_v1 = vsel %vm2167_vm14, %v3950_v48, %v2020_v19  ;;  %vm2462_vm1 = vcmp.eq.s32.totalorder %v6212_v30, %v3972_v10  ;;  %v6261_v20 = vadd.s32 432, %v3693_v4 }
 0x1e1   : > { %v2316_v15 = vsel %vm2169_vm15, %v3950_v48, %v2022_v57  ;;  %v2607_v11 = vsel %vm2460_vm0, %v3958_v12, %v2314_v1  ;;  %v6266_v13 = vadd.s32 440, %v3693_v4  ;;  %vm388_vm5 = vcmp.eq.s32.totalorder %v6018_v9, %v4038_v49 }
 0x1e2   : > { %v2609_v14 = vsel %vm2462_vm1, %v3958_v12, %v2316_v15  ;;  %vm453_vm6 = vcmp.eq.s32.totalorder %v6261_v20, %v3845_v47  ;;  %vm751_vm7 = vcmp.eq.s32.totalorder %v6261_v20, %v3848_v54  ;;  %vm1052_vm2 = vcmp.eq.s32.totalorder %v6261_v20, %v3833_v42 }
 0x1e3   : > { %v3241_v33 = vpack.c.bf16 %v2609_v14, %v2607_v11  ;;  %vm455_vm3 = vcmp.eq.s32.totalorder %v6266_v13, %v3845_v47  ;;  %v600_v55 = vsel %vm453_vm6, %v3786_v63, 0.0  ;;  %vm753_vm4 = vcmp.eq.s32.totalorder %v6266_v13, %v3848_v54 }
 0x1e4   : > { %v602_v29 = vsel %vm455_vm3, %v3786_v63, 0.0  ;;  %v898_v50 = vsel %vm751_vm7, %v3794_v2, %v600_v55  ;;  %vm1054_vm8 = vcmp.eq.s32.totalorder %v6266_v13, %v3833_v42  ;;  %vm1346_vm9 = vcmp.eq.s32.totalorder %v6261_v20, %v3851_v56 }
 0x1e5   : > { %3242 = vmatprep.subr.bf16.mxu1 %v3241_v33  ;;  %v900_v38 = vsel %vm753_vm4, %v3794_v2, %v602_v29  ;;  %v1199_v22 = vsel %vm1052_vm2, %v3819_v27, %v898_v50  ;;  %vm1348_vm10 = vcmp.eq.s32.totalorder %v6266_v13, %v3851_v56  ;;  %vm1644_vm11 = vcmp.eq.s32.totalorder %v6261_v20, %v3881_v26 }
 0x1e6   : > { %v1201_v18 = vsel %vm1054_vm8, %v3819_v27, %v900_v38  ;;  %v1493_v53 = vsel %vm1346_vm9, %v3836_v43, %v1199_v22  ;;  %vm1646_vm12 = vcmp.eq.s32.totalorder %v6266_v13, %v3881_v26  ;;  %vm1937_vm13 = vcmp.eq.s32.totalorder %v6261_v20, %v3907_v6 }
 0x1e7   : > { %v1495_v40 = vsel %vm1348_vm10, %v3836_v43, %v1201_v18  ;;  %v1791_v21 = vsel %vm1644_vm11, %v3884_v32, %v1493_v53  ;;  %vm1939_vm14 = vcmp.eq.s32.totalorder %v6266_v13, %v3907_v6  ;;  %vm2231_vm15 = vcmp.eq.s32.totalorder %v6261_v20, %v3964_v41 }
 0x1e8   : > { %v1793_v5 = vsel %vm1646_vm12, %v3884_v32, %v1495_v40  ;;  %v2084_v52 = vsel %vm1937_vm13, %v3910_v24, %v1791_v21  ;;  %vm2233_vm0 = vcmp.eq.s32.totalorder %v6266_v13, %v3964_v41  ;;  %vm2524_vm1 = vcmp.eq.s32.totalorder %v6261_v20, %v3972_v10 }
 0x1e9   : > { %v2086_v34 = vsel %vm1939_vm14, %v3910_v24, %v1793_v5  ;;  %v2378_v37 = vsel %vm2231_vm15, %v3950_v48, %v2084_v52  ;;  %vm2526_vm6 = vcmp.eq.s32.totalorder %v6266_v13, %v3972_v10  ;;  %vm390_vm7 = vcmp.eq.s32.totalorder %v6212_v30, %v4038_v49 }
 0x1ea   : > { %v2380_v31 = vsel %vm2233_vm0, %v3950_v48, %v2086_v34  ;;  %v2671_v58 = vsel %vm2524_vm1, %v3958_v12, %v2378_v37  ;;  %v535_v23 = vsel %vm388_vm5, %v4021_v39, 0.0  ;;  %v537_v28 = vsel %vm390_vm7, %v4021_v39, 0.0 }
 0x1eb   : > { %v2673_v61 = vsel %vm2526_vm6, %v3958_v12, %v2380_v31  ;;  %vm686_vm2 = vcmp.eq.s32.totalorder %v6018_v9, %v4055_v3  ;;  %vm688_vm3 = vcmp.eq.s32.totalorder %v6212_v30, %v4055_v3  ;;  %vm987_vm4 = vcmp.eq.s32.totalorder %v6018_v9, %v4035_v8 }
 0x1ec   : > { %v3305_v7 = vpack.c.bf16 %v2673_v61, %v2671_v58  ;;  %v833_v17 = vsel %vm686_vm2, %v4029_v45, %v535_v23  ;;  %v835_v19 = vsel %vm688_vm3, %v4029_v45, %v537_v28  ;;  %vm989_vm5 = vcmp.eq.s32.totalorder %v6212_v30, %v4035_v8 }
 0x1ed   : > { %v1134_v57 = vsel %vm987_vm4, %v4044_v16, %v833_v17  ;;  %v1136_v1 = vsel %vm989_vm5, %v4044_v16, %v835_v19  ;;  %vm1281_vm8 = vcmp.eq.s32.totalorder %v6018_v9, %v4068_v0  ;;  %vm1283_vm9 = vcmp.eq.s32.totalorder %v6212_v30, %v4068_v0 }
 0x1ee   : > { %3306 = vmatprep.subr.bf16.mxu0 %v3305_v7  ;;  %v1428_v15 = vsel %vm1281_vm8, %v4052_v51, %v1134_v57  ;;  %v1430_v11 = vsel %vm1283_vm9, %v4052_v51, %v1136_v1  ;;  %vm1579_vm10 = vcmp.eq.s32.totalorder %v6018_v9, %v4087_v59  ;;  %vm1581_vm11 = vcmp.eq.s32.totalorder %v6212_v30, %v4087_v59 }
 0x1ef   : > { %v1726_v14 = vsel %vm1579_vm10, %v4090_v62, %v1428_v15  ;;  %v1728_v33 = vsel %vm1581_vm11, %v4090_v62, %v1430_v11  ;;  %vm1872_vm12 = vcmp.eq.s32.totalorder %v6018_v9, %v4109_v46  ;;  %vm1874_vm13 = vcmp.eq.s32.totalorder %v6212_v30, %v4109_v46 }
 0x1f0   : > { %v2019_v55 = vsel %vm1872_vm12, %v4112_v60, %v1726_v14  ;;  %v2021_v29 = vsel %vm1874_vm13, %v4112_v60, %v1728_v33  ;;  %vm2166_vm14 = vcmp.eq.s32.totalorder %v6018_v9, %v4115_v25  ;;  %vm2168_vm15 = vcmp.eq.s32.totalorder %v6212_v30, %v4115_v25 }
 0x1f1   : > { %v2313_v50 = vsel %vm2166_vm14, %v4118_v35, %v2019_v55  ;;  %v2315_v38 = vsel %vm2168_vm15, %v4118_v35, %v2021_v29  ;;  %vm2459_vm0 = vcmp.eq.s32.totalorder %v6018_v9, %v4141_v44  ;;  %vm2461_vm1 = vcmp.eq.s32.totalorder %v6212_v30, %v4141_v44 }
 0x1f2   : > { %v2606_v22 = vsel %vm2459_vm0, %v4144_v36, %v2313_v50  ;;  %v2608_v18 = vsel %vm2461_vm1, %v4144_v36, %v2315_v38  ;;  %vm452_vm6 = vcmp.eq.s32.totalorder %v6261_v20, %v4038_v49  ;;  %vm454_vm7 = vcmp.eq.s32.totalorder %v6266_v13, %v4038_v49 }
 0x1f3   : > { %v3243_v53 = vpack.c.bf16 %v2608_v18, %v2606_v22  ;;  %v599_v40 = vsel %vm452_vm6, %v4021_v39, 0.0  ;;  %v601_v21 = vsel %vm454_vm7, %v4021_v39, 0.0  ;;  %vm750_vm2 = vcmp.eq.s32.totalorder %v6261_v20, %v4055_v3 }
 0x1f4   : > { %vm752_vm3 = vcmp.eq.s32.totalorder %v6266_v13, %v4055_v3  ;;  %v897_v9 = vsel %vm750_vm2, %v4029_v45, %v599_v40  ;;  %vm1051_vm4 = vcmp.eq.s32.totalorder %v6261_v20, %v4035_v8  ;;  %vm1053_vm5 = vcmp.eq.s32.totalorder %v6266_v13, %v4035_v8 }
 0x1f5   : > { %3244 = vmatpush1.bf16.msra.mxu1 %v3243_v53  ;;  %v899_v30 = vsel %vm752_vm3, %v4029_v45, %v601_v21  ;;  %v1198_v5 = vsel %vm1051_vm4, %v4044_v16, %v897_v9  ;;  %vm1345_vm8 = vcmp.eq.s32.totalorder %v6261_v20, %v4068_v0  ;;  %vm1347_vm9 = vcmp.eq.s32.totalorder %v6266_v13, %v4068_v0 }
 0x1f6   : > { %v1200_v52 = vsel %vm1053_vm5, %v4044_v16, %v899_v30  ;;  %v1492_v34 = vsel %vm1345_vm8, %v4052_v51, %v1198_v5  ;;  %vm1643_vm10 = vcmp.eq.s32.totalorder %v6261_v20, %v4087_v59  ;;  %vm1645_vm11 = vcmp.eq.s32.totalorder %v6266_v13, %v4087_v59 }
 0x1f7   : > { %v1494_v37 = vsel %vm1347_vm9, %v4052_v51, %v1200_v52  ;;  %v1790_v31 = vsel %vm1643_vm10, %v4090_v62, %v1492_v34  ;;  %vm1936_vm12 = vcmp.eq.s32.totalorder %v6261_v20, %v4109_v46  ;;  %vm1938_vm13 = vcmp.eq.s32.totalorder %v6266_v13, %v4109_v46 }
 0x1f8   : > { %v1792_v58 = vsel %vm1645_vm11, %v4090_v62, %v1494_v37  ;;  %v2083_v23 = vsel %vm1936_vm12, %v4112_v60, %v1790_v31  ;;  %vm2230_vm14 = vcmp.eq.s32.totalorder %v6261_v20, %v4115_v25  ;;  %vm2232_vm15 = vcmp.eq.s32.totalorder %v6266_v13, %v4115_v25 }
 0x1f9   : > { %v2085_v28 = vsel %vm1938_vm13, %v4112_v60, %v1792_v58  ;;  %v2377_v61 = vsel %vm2230_vm14, %v4118_v35, %v2083_v23  ;;  %vm2523_vm0 = vcmp.eq.s32.totalorder %v6261_v20, %v4141_v44  ;;  %vm2525_vm1 = vcmp.eq.s32.totalorder %v6266_v13, %v4141_v44 }
 0x1fa   : > { %v2379_v7 = vsel %vm2232_vm15, %v4118_v35, %v2085_v28  ;;  %v2670_v17 = vsel %vm2523_vm0, %v4144_v36, %v2377_v61  ;;  %v6416_v19 = vadd.s32 192, %v3693_v4  ;;  %v6419_v57 = vadd.s32 200, %v3693_v4  ;;  %v2691_v61 = vld [vmem:[%s3682_s14 + $0x8] sm:$0xff] }
 0x1fb   : > { %v2672_v1 = vsel %vm2525_vm1, %v4144_v36, %v2379_v7  ;;  %v6423_v15 = vadd.s32 448, %v3693_v4  ;;  %v6426_v20 = vadd.s32 456, %v3693_v4  ;;  %v6429_v13 = vadd.s32 208, %v3693_v4  ;;  %v2693_v7 = vld [vmem:[%s3682_s14 + $0x18] sm:$0xff]  ;;  %2758 = vmatprep.mubr.f32.mxu1 %v2691_v61 }
 0x1fc   : > { %v3307_v11 = vpack.c.bf16 %v2672_v1, %v2670_v17  ;;  %vm393_vm6 = vcmp.eq.s32.totalorder %v6416_v19, %v3845_v47  ;;  %vm395_vm7 = vcmp.eq.s32.totalorder %v6419_v57, %v3845_v47  ;;  %vm691_vm2 = vcmp.eq.s32.totalorder %v6416_v19, %v3848_v54  ;;  %2829 = vmatprep.mubr.f32.mxu0 %v2693_v7 }
 0x1fd   : > { %v540_v14 = vsel %vm393_vm6, %v3786_v63, 0.0  ;;  %v542_v33 = vsel %vm395_vm7, %v3786_v63, 0.0  ;;  %vm693_vm3 = vcmp.eq.s32.totalorder %v6419_v57, %v3848_v54  ;;  %vm992_vm4 = vcmp.eq.s32.totalorder %v6416_v19, %v3833_v42 }
 0x1fe   : > { %3308 = vmatpush1.bf16.msra.mxu0 %v3307_v11  ;;  %v838_v55 = vsel %vm691_vm2, %v3794_v2, %v540_v14  ;;  %v840_v29 = vsel %vm693_vm3, %v3794_v2, %v542_v33  ;;  %vm994_vm5 = vcmp.eq.s32.totalorder %v6419_v57, %v3833_v42  ;;  %vm1286_vm8 = vcmp.eq.s32.totalorder %v6416_v19, %v3851_v56 }
 0x1ff   : > { %v1139_v50 = vsel %vm992_vm4, %v3819_v27, %v838_v55  ;;  %v1141_v38 = vsel %vm994_vm5, %v3819_v27, %v840_v29  ;;  %vm1288_vm9 = vcmp.eq.s32.totalorder %v6419_v57, %v3851_v56  ;;  %vm1584_vm10 = vcmp.eq.s32.totalorder %v6416_v19, %v3881_v26 }
 0x200   : > { %v1433_v22 = vsel %vm1286_vm8, %v3836_v43, %v1139_v50  ;;  %v1435_v18 = vsel %vm1288_vm9, %v3836_v43, %v1141_v38  ;;  %vm1586_vm11 = vcmp.eq.s32.totalorder %v6419_v57, %v3881_v26  ;;  %vm1877_vm12 = vcmp.eq.s32.totalorder %v6416_v19, %v3907_v6 }
 0x201   : > { %v1731_v53 = vsel %vm1584_vm10, %v3884_v32, %v1433_v22  ;;  %v1733_v40 = vsel %vm1586_vm11, %v3884_v32, %v1435_v18  ;;  %vm1879_vm13 = vcmp.eq.s32.totalorder %v6419_v57, %v3907_v6  ;;  %vm2171_vm14 = vcmp.eq.s32.totalorder %v6416_v19, %v3964_v41 }
 0x202   : > { %v2024_v21 = vsel %vm1877_vm12, %v3910_v24, %v1731_v53  ;;  %v2026_v9 = vsel %vm1879_vm13, %v3910_v24, %v1733_v40  ;;  %vm2173_vm15 = vcmp.eq.s32.totalorder %v6419_v57, %v3964_v41  ;;  %vm2464_vm0 = vcmp.eq.s32.totalorder %v6416_v19, %v3972_v10 }
 0x203   : > { %v2318_v30 = vsel %vm2171_vm14, %v3950_v48, %v2024_v21  ;;  %v2320_v5 = vsel %vm2173_vm15, %v3950_v48, %v2026_v9  ;;  %vm2466_vm1 = vcmp.eq.s32.totalorder %v6419_v57, %v3972_v10  ;;  %vm457_vm6 = vcmp.eq.s32.totalorder %v6423_v15, %v3845_v47 }
 0x204   : > { %v2611_v52 = vsel %vm2464_vm0, %v3958_v12, %v2318_v30  ;;  %v2613_v34 = vsel %vm2466_vm1, %v3958_v12, %v2320_v5  ;;  %vm459_vm7 = vcmp.eq.s32.totalorder %v6426_v20, %v3845_v47  ;;  %v604_v37 = vsel %vm457_vm6, %v3786_v63, 0.0 }
 0x205   : > { %v3245_v31 = vpack.c.bf16 %v2613_v34, %v2611_v52  ;;  %v606_v58 = vsel %vm459_vm7, %v3786_v63, 0.0  ;;  %vm755_vm2 = vcmp.eq.s32.totalorder %v6423_v15, %v3848_v54  ;;  %vm757_vm3 = vcmp.eq.s32.totalorder %v6426_v20, %v3848_v54 }
 0x206   : > { %v902_v23 = vsel %vm755_vm2, %v3794_v2, %v604_v37  ;;  %v904_v28 = vsel %vm757_vm3, %v3794_v2, %v606_v58  ;;  %vm1056_vm4 = vcmp.eq.s32.totalorder %v6423_v15, %v3833_v42  ;;  %vm1058_vm5 = vcmp.eq.s32.totalorder %v6426_v20, %v3833_v42 }
 0x207   : > { %3246 = vmatprep.subr.bf16.mxu1 %v3245_v31  ;;  %v1203_v17 = vsel %vm1056_vm4, %v3819_v27, %v902_v23  ;;  %v1205_v1 = vsel %vm1058_vm5, %v3819_v27, %v904_v28  ;;  %vm1350_vm8 = vcmp.eq.s32.totalorder %v6423_v15, %v3851_v56  ;;  %vm1352_vm9 = vcmp.eq.s32.totalorder %v6426_v20, %v3851_v56 }
 0x208   : > { %v1497_v11 = vsel %vm1350_vm8, %v3836_v43, %v1203_v17  ;;  %v1499_v14 = vsel %vm1352_vm9, %v3836_v43, %v1205_v1  ;;  %vm1648_vm10 = vcmp.eq.s32.totalorder %v6423_v15, %v3881_v26  ;;  %vm1650_vm11 = vcmp.eq.s32.totalorder %v6426_v20, %v3881_v26 }
 0x209   : > { %v1795_v33 = vsel %vm1648_vm10, %v3884_v32, %v1497_v11  ;;  %v1797_v55 = vsel %vm1650_vm11, %v3884_v32, %v1499_v14  ;;  %vm1941_vm12 = vcmp.eq.s32.totalorder %v6423_v15, %v3907_v6  ;;  %vm1943_vm13 = vcmp.eq.s32.totalorder %v6426_v20, %v3907_v6 }
 0x20a   : > { %v2088_v29 = vsel %vm1941_vm12, %v3910_v24, %v1795_v33  ;;  %v2090_v50 = vsel %vm1943_vm13, %v3910_v24, %v1797_v55  ;;  %vm2235_vm14 = vcmp.eq.s32.totalorder %v6423_v15, %v3964_v41  ;;  %vm2237_vm15 = vcmp.eq.s32.totalorder %v6426_v20, %v3964_v41 }
 0x20b   : > { %v2382_v38 = vsel %vm2235_vm14, %v3950_v48, %v2088_v29  ;;  %v2384_v22 = vsel %vm2237_vm15, %v3950_v48, %v2090_v50  ;;  %vm2528_vm0 = vcmp.eq.s32.totalorder %v6423_v15, %v3972_v10  ;;  %vm2530_vm1 = vcmp.eq.s32.totalorder %v6426_v20, %v3972_v10 }
 0x20c   : > { %v2675_v18 = vsel %vm2528_vm0, %v3958_v12, %v2382_v38  ;;  %v2677_v53 = vsel %vm2530_vm1, %v3958_v12, %v2384_v22  ;;  %vm392_vm6 = vcmp.eq.s32.totalorder %v6416_v19, %v4038_v49  ;;  %vm394_vm7 = vcmp.eq.s32.totalorder %v6419_v57, %v4038_v49 }
 0x20d   : > { %v3309_v40 = vpack.c.bf16 %v2677_v53, %v2675_v18  ;;  %v539_v21 = vsel %vm392_vm6, %v4021_v39, 0.0  ;;  %v541_v9 = vsel %vm394_vm7, %v4021_v39, 0.0  ;;  %vm690_vm2 = vcmp.eq.s32.totalorder %v6416_v19, %v4055_v3 }
 0x20e   : > { %vm692_vm3 = vcmp.eq.s32.totalorder %v6419_v57, %v4055_v3  ;;  %v837_v30 = vsel %vm690_vm2, %v4029_v45, %v539_v21  ;;  %vm991_vm4 = vcmp.eq.s32.totalorder %v6416_v19, %v4035_v8  ;;  %vm993_vm5 = vcmp.eq.s32.totalorder %v6419_v57, %v4035_v8 }
 0x20f   : > { %3310 = vmatprep.subr.bf16.mxu0 %v3309_v40  ;;  %v839_v5 = vsel %vm692_vm3, %v4029_v45, %v541_v9  ;;  %v1138_v52 = vsel %vm991_vm4, %v4044_v16, %v837_v30  ;;  %vm1285_vm8 = vcmp.eq.s32.totalorder %v6416_v19, %v4068_v0  ;;  %vm1287_vm9 = vcmp.eq.s32.totalorder %v6419_v57, %v4068_v0 }
 0x210   : > { %v1140_v34 = vsel %vm993_vm5, %v4044_v16, %v839_v5  ;;  %v1432_v37 = vsel %vm1285_vm8, %v4052_v51, %v1138_v52  ;;  %vm1583_vm10 = vcmp.eq.s32.totalorder %v6416_v19, %v4087_v59  ;;  %vm1585_vm11 = vcmp.eq.s32.totalorder %v6419_v57, %v4087_v59 }
 0x211   : > { %v1434_v31 = vsel %vm1287_vm9, %v4052_v51, %v1140_v34  ;;  %v1730_v58 = vsel %vm1583_vm10, %v4090_v62, %v1432_v37  ;;  %vm1876_vm12 = vcmp.eq.s32.totalorder %v6416_v19, %v4109_v46  ;;  %vm1878_vm13 = vcmp.eq.s32.totalorder %v6419_v57, %v4109_v46 }
 0x212   : > { %v1732_v23 = vsel %vm1585_vm11, %v4090_v62, %v1434_v31  ;;  %v2023_v28 = vsel %vm1876_vm12, %v4112_v60, %v1730_v58  ;;  %vm2170_vm14 = vcmp.eq.s32.totalorder %v6416_v19, %v4115_v25  ;;  %vm2172_vm15 = vcmp.eq.s32.totalorder %v6419_v57, %v4115_v25 }
 0x213   : > { %v2025_v61 = vsel %vm1878_vm13, %v4112_v60, %v1732_v23  ;;  %v2317_v7 = vsel %vm2170_vm14, %v4118_v35, %v2023_v28  ;;  %vm2463_vm0 = vcmp.eq.s32.totalorder %v6416_v19, %v4141_v44  ;;  %vm2465_vm1 = vcmp.eq.s32.totalorder %v6419_v57, %v4141_v44 }
 0x214   : > { %v2319_v17 = vsel %vm2172_vm15, %v4118_v35, %v2025_v61  ;;  %v2610_v1 = vsel %vm2463_vm0, %v4144_v36, %v2317_v7  ;;  %vm456_vm6 = vcmp.eq.s32.totalorder %v6423_v15, %v4038_v49  ;;  %vm458_vm7 = vcmp.eq.s32.totalorder %v6426_v20, %v4038_v49 }
 0x215   : > { %v2612_v11 = vsel %vm2465_vm1, %v4144_v36, %v2319_v17  ;;  %v603_v14 = vsel %vm456_vm6, %v4021_v39, 0.0  ;;  %v605_v33 = vsel %vm458_vm7, %v4021_v39, 0.0  ;;  %vm754_vm2 = vcmp.eq.s32.totalorder %v6423_v15, %v4055_v3 }
 0x216   : > { %v3247_v19 = vpack.c.bf16 %v2612_v11, %v2610_v1  ;;  %vm756_vm3 = vcmp.eq.s32.totalorder %v6426_v20, %v4055_v3  ;;  %v901_v57 = vsel %vm754_vm2, %v4029_v45, %v603_v14  ;;  %vm1055_vm4 = vcmp.eq.s32.totalorder %v6423_v15, %v4035_v8 }
 0x217   : > { %v903_v55 = vsel %vm756_vm3, %v4029_v45, %v605_v33  ;;  %vm1057_vm5 = vcmp.eq.s32.totalorder %v6426_v20, %v4035_v8  ;;  %v1202_v29 = vsel %vm1055_vm4, %v4044_v16, %v901_v57  ;;  %vm1349_vm8 = vcmp.eq.s32.totalorder %v6423_v15, %v4068_v0 }
 0x218   : > { %3248 = vmatpush1.bf16.msra.mxu1 %v3247_v19  ;;  %v1204_v50 = vsel %vm1057_vm5, %v4044_v16, %v903_v55  ;;  %vm1351_vm9 = vcmp.eq.s32.totalorder %v6426_v20, %v4068_v0  ;;  %v1496_v38 = vsel %vm1349_vm8, %v4052_v51, %v1202_v29  ;;  %vm1647_vm10 = vcmp.eq.s32.totalorder %v6423_v15, %v4087_v59 }
 0x219   : > { %v1498_v22 = vsel %vm1351_vm9, %v4052_v51, %v1204_v50  ;;  %vm1649_vm11 = vcmp.eq.s32.totalorder %v6426_v20, %v4087_v59  ;;  %v1794_v18 = vsel %vm1647_vm10, %v4090_v62, %v1496_v38  ;;  %vm1940_vm12 = vcmp.eq.s32.totalorder %v6423_v15, %v4109_v46 }
 0x21a   : > { %v1796_v53 = vsel %vm1649_vm11, %v4090_v62, %v1498_v22  ;;  %vm1942_vm13 = vcmp.eq.s32.totalorder %v6426_v20, %v4109_v46  ;;  %v2087_v40 = vsel %vm1940_vm12, %v4112_v60, %v1794_v18  ;;  %vm2234_vm14 = vcmp.eq.s32.totalorder %v6423_v15, %v4115_v25 }
 0x21b   : > { %v2089_v21 = vsel %vm1942_vm13, %v4112_v60, %v1796_v53  ;;  %vm2236_vm15 = vcmp.eq.s32.totalorder %v6426_v20, %v4115_v25  ;;  %v2381_v9 = vsel %vm2234_vm14, %v4118_v35, %v2087_v40  ;;  %vm2527_vm0 = vcmp.eq.s32.totalorder %v6423_v15, %v4141_v44 }
 0x21c   : > { %v2383_v30 = vsel %vm2236_vm15, %v4118_v35, %v2089_v21  ;;  %vm2529_vm1 = vcmp.eq.s32.totalorder %v6426_v20, %v4141_v44  ;;  %v2674_v5 = vsel %vm2527_vm0, %v4144_v36, %v2381_v9  ;;  %v6625_v52 = vadd.s32 216, %v3693_v4 }
 0x21d   : > { %v2676_v34 = vsel %vm2529_vm1, %v4144_v36, %v2383_v30  ;;  %vm397_vm6 = vcmp.eq.s32.totalorder %v6429_v13, %v3845_v47  ;;  %vm695_vm7 = vcmp.eq.s32.totalorder %v6429_v13, %v3848_v54  ;;  %vm996_vm2 = vcmp.eq.s32.totalorder %v6429_v13, %v3833_v42 }
 0x21e   : > { %v3311_v15 = vpack.c.bf16 %v2676_v34, %v2674_v5  ;;  %vm399_vm3 = vcmp.eq.s32.totalorder %v6625_v52, %v3845_v47  ;;  %v544_v20 = vsel %vm397_vm6, %v3786_v63, 0.0  ;;  %vm697_vm4 = vcmp.eq.s32.totalorder %v6625_v52, %v3848_v54 }
 0x21f   : > { %v546_v37 = vsel %vm399_vm3, %v3786_v63, 0.0  ;;  %v842_v31 = vsel %vm695_vm7, %v3794_v2, %v544_v20  ;;  %vm998_vm5 = vcmp.eq.s32.totalorder %v6625_v52, %v3833_v42  ;;  %vm1290_vm8 = vcmp.eq.s32.totalorder %v6429_v13, %v3851_v56 }
 0x220   : > { %3312 = vmatpush1.bf16.msra.mxu0 %v3311_v15  ;;  %v844_v58 = vsel %vm697_vm4, %v3794_v2, %v546_v37  ;;  %v1143_v23 = vsel %vm996_vm2, %v3819_v27, %v842_v31  ;;  %vm1292_vm9 = vcmp.eq.s32.totalorder %v6625_v52, %v3851_v56  ;;  %vm1588_vm10 = vcmp.eq.s32.totalorder %v6429_v13, %v3881_v26 }
 0x221   : > { %v1145_v28 = vsel %vm998_vm5, %v3819_v27, %v844_v58  ;;  %v1437_v61 = vsel %vm1290_vm8, %v3836_v43, %v1143_v23  ;;  %vm1590_vm11 = vcmp.eq.s32.totalorder %v6625_v52, %v3881_v26  ;;  %vm1881_vm12 = vcmp.eq.s32.totalorder %v6429_v13, %v3907_v6 }
 0x222   : > { %v1439_v7 = vsel %vm1292_vm9, %v3836_v43, %v1145_v28  ;;  %v1735_v17 = vsel %vm1588_vm10, %v3884_v32, %v1437_v61  ;;  %vm1883_vm13 = vcmp.eq.s32.totalorder %v6625_v52, %v3907_v6  ;;  %vm2175_vm14 = vcmp.eq.s32.totalorder %v6429_v13, %v3964_v41 }
 0x223   : > { %v1737_v1 = vsel %vm1590_vm11, %v3884_v32, %v1439_v7  ;;  %v2028_v11 = vsel %vm1881_vm12, %v3910_v24, %v1735_v17  ;;  %vm2177_vm15 = vcmp.eq.s32.totalorder %v6625_v52, %v3964_v41  ;;  %vm2468_vm0 = vcmp.eq.s32.totalorder %v6429_v13, %v3972_v10 }
 0x224   : > { %v2030_v14 = vsel %vm1883_vm13, %v3910_v24, %v1737_v1  ;;  %v2322_v33 = vsel %vm2175_vm14, %v3950_v48, %v2028_v11  ;;  %vm2470_vm1 = vcmp.eq.s32.totalorder %v6625_v52, %v3972_v10  ;;  %v6674_v19 = vadd.s32 464, %v3693_v4 }
 0x225   : > { %v2324_v57 = vsel %vm2177_vm15, %v3950_v48, %v2030_v14  ;;  %v2615_v55 = vsel %vm2468_vm0, %v3958_v12, %v2322_v33  ;;  %v6679_v29 = vadd.s32 472, %v3693_v4  ;;  %vm396_vm6 = vcmp.eq.s32.totalorder %v6429_v13, %v4038_v49 }
 0x226   : > { %v2617_v50 = vsel %vm2470_vm1, %v3958_v12, %v2324_v57  ;;  %vm461_vm7 = vcmp.eq.s32.totalorder %v6674_v19, %v3845_v47  ;;  %vm759_vm2 = vcmp.eq.s32.totalorder %v6674_v19, %v3848_v54  ;;  %vm1060_vm3 = vcmp.eq.s32.totalorder %v6674_v19, %v3833_v42 }
 0x227   : > { %v3249_v38 = vpack.c.bf16 %v2617_v50, %v2615_v55  ;;  %vm463_vm4 = vcmp.eq.s32.totalorder %v6679_v29, %v3845_v47  ;;  %v608_v22 = vsel %vm461_vm7, %v3786_v63, 0.0  ;;  %vm761_vm5 = vcmp.eq.s32.totalorder %v6679_v29, %v3848_v54 }
 0x228   : > { %v610_v18 = vsel %vm463_vm4, %v3786_v63, 0.0  ;;  %v906_v53 = vsel %vm759_vm2, %v3794_v2, %v608_v22  ;;  %vm1062_vm8 = vcmp.eq.s32.totalorder %v6679_v29, %v3833_v42  ;;  %vm1354_vm9 = vcmp.eq.s32.totalorder %v6674_v19, %v3851_v56 }
 0x229   : > { %3250 = vmatprep.subr.bf16.mxu1 %v3249_v38  ;;  %v908_v40 = vsel %vm761_vm5, %v3794_v2, %v610_v18  ;;  %v1207_v21 = vsel %vm1060_vm3, %v3819_v27, %v906_v53  ;;  %vm1356_vm10 = vcmp.eq.s32.totalorder %v6679_v29, %v3851_v56  ;;  %vm1652_vm11 = vcmp.eq.s32.totalorder %v6674_v19, %v3881_v26 }
 0x22a   : > { %v1209_v9 = vsel %vm1062_vm8, %v3819_v27, %v908_v40  ;;  %v1501_v30 = vsel %vm1354_vm9, %v3836_v43, %v1207_v21  ;;  %vm1654_vm12 = vcmp.eq.s32.totalorder %v6679_v29, %v3881_v26  ;;  %vm1945_vm13 = vcmp.eq.s32.totalorder %v6674_v19, %v3907_v6 }
 0x22b   : > { %v1503_v5 = vsel %vm1356_vm10, %v3836_v43, %v1209_v9  ;;  %v1799_v34 = vsel %vm1652_vm11, %v3884_v32, %v1501_v30  ;;  %vm1947_vm14 = vcmp.eq.s32.totalorder %v6679_v29, %v3907_v6  ;;  %vm2239_vm15 = vcmp.eq.s32.totalorder %v6674_v19, %v3964_v41 }
 0x22c   : > { %v1801_v15 = vsel %vm1654_vm12, %v3884_v32, %v1503_v5  ;;  %v2092_v20 = vsel %vm1945_vm13, %v3910_v24, %v1799_v34  ;;  %vm2241_vm0 = vcmp.eq.s32.totalorder %v6679_v29, %v3964_v41  ;;  %vm2532_vm1 = vcmp.eq.s32.totalorder %v6674_v19, %v3972_v10 }
 0x22d   : > { %v2094_v37 = vsel %vm1947_vm14, %v3910_v24, %v1801_v15  ;;  %v2386_v31 = vsel %vm2239_vm15, %v3950_v48, %v2092_v20  ;;  %vm2534_vm7 = vcmp.eq.s32.totalorder %v6679_v29, %v3972_v10  ;;  %vm398_vm2 = vcmp.eq.s32.totalorder %v6625_v52, %v4038_v49 }
 0x22e   : > { %v2388_v58 = vsel %vm2241_vm0, %v3950_v48, %v2094_v37  ;;  %v2679_v23 = vsel %vm2532_vm1, %v3958_v12, %v2386_v31  ;;  %v543_v28 = vsel %vm396_vm6, %v4021_v39, 0.0  ;;  %v545_v61 = vsel %vm398_vm2, %v4021_v39, 0.0 }
 0x22f   : > { %v2681_v7 = vsel %vm2534_vm7, %v3958_v12, %v2388_v58  ;;  %vm694_vm3 = vcmp.eq.s32.totalorder %v6429_v13, %v4055_v3  ;;  %vm696_vm4 = vcmp.eq.s32.totalorder %v6625_v52, %v4055_v3  ;;  %vm995_vm5 = vcmp.eq.s32.totalorder %v6429_v13, %v4035_v8 }
 0x230   : > { %v3313_v17 = vpack.c.bf16 %v2681_v7, %v2679_v23  ;;  %v841_v1 = vsel %vm694_vm3, %v4029_v45, %v543_v28  ;;  %v843_v11 = vsel %vm696_vm4, %v4029_v45, %v545_v61  ;;  %vm997_vm6 = vcmp.eq.s32.totalorder %v6625_v52, %v4035_v8 }
 0x231   : > { %v1142_v14 = vsel %vm995_vm5, %v4044_v16, %v841_v1  ;;  %v1144_v33 = vsel %vm997_vm6, %v4044_v16, %v843_v11  ;;  %vm1289_vm8 = vcmp.eq.s32.totalorder %v6429_v13, %v4068_v0  ;;  %vm1291_vm9 = vcmp.eq.s32.totalorder %v6625_v52, %v4068_v0 }
 0x232   : > { %3314 = vmatprep.subr.bf16.mxu0 %v3313_v17  ;;  %v1436_v57 = vsel %vm1289_vm8, %v4052_v51, %v1142_v14  ;;  %v1438_v55 = vsel %vm1291_vm9, %v4052_v51, %v1144_v33  ;;  %vm1587_vm10 = vcmp.eq.s32.totalorder %v6429_v13, %v4087_v59  ;;  %vm1589_vm11 = vcmp.eq.s32.totalorder %v6625_v52, %v4087_v59 }
 0x233   : > { %v1734_v50 = vsel %vm1587_vm10, %v4090_v62, %v1436_v57  ;;  %v1736_v38 = vsel %vm1589_vm11, %v4090_v62, %v1438_v55  ;;  %vm1880_vm12 = vcmp.eq.s32.totalorder %v6429_v13, %v4109_v46  ;;  %vm1882_vm13 = vcmp.eq.s32.totalorder %v6625_v52, %v4109_v46 }
 0x234   : > { %v2027_v22 = vsel %vm1880_vm12, %v4112_v60, %v1734_v50  ;;  %v2029_v18 = vsel %vm1882_vm13, %v4112_v60, %v1736_v38  ;;  %vm2174_vm14 = vcmp.eq.s32.totalorder %v6429_v13, %v4115_v25  ;;  %vm2176_vm15 = vcmp.eq.s32.totalorder %v6625_v52, %v4115_v25 }
 0x235   : > { %v2321_v53 = vsel %vm2174_vm14, %v4118_v35, %v2027_v22  ;;  %v2323_v40 = vsel %vm2176_vm15, %v4118_v35, %v2029_v18  ;;  %vm2467_vm0 = vcmp.eq.s32.totalorder %v6429_v13, %v4141_v44  ;;  %vm2469_vm1 = vcmp.eq.s32.totalorder %v6625_v52, %v4141_v44 }
 0x236   : > { %v2614_v21 = vsel %vm2467_vm0, %v4144_v36, %v2321_v53  ;;  %v2616_v9 = vsel %vm2469_vm1, %v4144_v36, %v2323_v40  ;;  %vm460_vm7 = vcmp.eq.s32.totalorder %v6674_v19, %v4038_v49  ;;  %vm462_vm2 = vcmp.eq.s32.totalorder %v6679_v29, %v4038_v49 }
 0x237   : > { %v3251_v30 = vpack.c.bf16 %v2616_v9, %v2614_v21  ;;  %v607_v5 = vsel %vm460_vm7, %v4021_v39, 0.0  ;;  %v609_v34 = vsel %vm462_vm2, %v4021_v39, 0.0  ;;  %vm758_vm3 = vcmp.eq.s32.totalorder %v6674_v19, %v4055_v3 }
 0x238   : > { %vm760_vm4 = vcmp.eq.s32.totalorder %v6679_v29, %v4055_v3  ;;  %v905_v13 = vsel %vm758_vm3, %v4029_v45, %v607_v5  ;;  %vm1059_vm5 = vcmp.eq.s32.totalorder %v6674_v19, %v4035_v8  ;;  %vm1061_vm6 = vcmp.eq.s32.totalorder %v6679_v29, %v4035_v8 }
 0x239   : > { %3252 = vmatpush1.bf16.msra.mxu1 %v3251_v30  ;;  %v907_v52 = vsel %vm760_vm4, %v4029_v45, %v609_v34  ;;  %v1206_v15 = vsel %vm1059_vm5, %v4044_v16, %v905_v13  ;;  %vm1353_vm8 = vcmp.eq.s32.totalorder %v6674_v19, %v4068_v0  ;;  %vm1355_vm9 = vcmp.eq.s32.totalorder %v6679_v29, %v4068_v0 }
 0x23a   : > { %v1208_v20 = vsel %vm1061_vm6, %v4044_v16, %v907_v52  ;;  %v1500_v37 = vsel %vm1353_vm8, %v4052_v51, %v1206_v15  ;;  %vm1651_vm10 = vcmp.eq.s32.totalorder %v6674_v19, %v4087_v59  ;;  %vm1653_vm11 = vcmp.eq.s32.totalorder %v6679_v29, %v4087_v59 }
 0x23b   : > { %v1502_v31 = vsel %vm1355_vm9, %v4052_v51, %v1208_v20  ;;  %v1798_v58 = vsel %vm1651_vm10, %v4090_v62, %v1500_v37  ;;  %vm1944_vm12 = vcmp.eq.s32.totalorder %v6674_v19, %v4109_v46  ;;  %vm1946_vm13 = vcmp.eq.s32.totalorder %v6679_v29, %v4109_v46 }
 0x23c   : > { %v1800_v23 = vsel %vm1653_vm11, %v4090_v62, %v1502_v31  ;;  %v2091_v28 = vsel %vm1944_vm12, %v4112_v60, %v1798_v58  ;;  %vm2238_vm14 = vcmp.eq.s32.totalorder %v6674_v19, %v4115_v25  ;;  %vm2240_vm15 = vcmp.eq.s32.totalorder %v6679_v29, %v4115_v25 }
 0x23d   : > { %v2093_v61 = vsel %vm1946_vm13, %v4112_v60, %v1800_v23  ;;  %v2385_v7 = vsel %vm2238_vm14, %v4118_v35, %v2091_v28  ;;  %vm2531_vm0 = vcmp.eq.s32.totalorder %v6674_v19, %v4141_v44  ;;  %vm2533_vm1 = vcmp.eq.s32.totalorder %v6679_v29, %v4141_v44 }
 0x23e   : > { %v2387_v17 = vsel %vm2240_vm15, %v4118_v35, %v2093_v61  ;;  %v2678_v1 = vsel %vm2531_vm0, %v4144_v36, %v2385_v7  ;;  %v6829_v11 = vadd.s32 224, %v3693_v4  ;;  %v6832_v14 = vadd.s32 232, %v3693_v4 }
 0x23f   : > { %v2680_v33 = vsel %vm2533_vm1, %v4144_v36, %v2387_v17  ;;  %v6836_v57 = vadd.s32 480, %v3693_v4  ;;  %v6839_v19 = vadd.s32 488, %v3693_v4  ;;  %v6842_v29 = vadd.s32 240, %v3693_v4 }
 0x240   : > { %v3315_v55 = vpack.c.bf16 %v2680_v33, %v2678_v1  ;;  %vm401_vm7 = vcmp.eq.s32.totalorder %v6829_v11, %v3845_v47  ;;  %vm403_vm2 = vcmp.eq.s32.totalorder %v6832_v14, %v3845_v47  ;;  %vm699_vm3 = vcmp.eq.s32.totalorder %v6829_v11, %v3848_v54 }
 0x241   : > { %v548_v50 = vsel %vm401_vm7, %v3786_v63, 0.0  ;;  %v550_v38 = vsel %vm403_vm2, %v3786_v63, 0.0  ;;  %vm701_vm4 = vcmp.eq.s32.totalorder %v6832_v14, %v3848_v54  ;;  %vm1000_vm5 = vcmp.eq.s32.totalorder %v6829_v11, %v3833_v42 }
 0x242   : > { %3316 = vmatpush1.bf16.msra.mxu0 %v3315_v55  ;;  %v846_v22 = vsel %vm699_vm3, %v3794_v2, %v548_v50  ;;  %v848_v18 = vsel %vm701_vm4, %v3794_v2, %v550_v38  ;;  %vm1002_vm6 = vcmp.eq.s32.totalorder %v6832_v14, %v3833_v42  ;;  %vm1294_vm8 = vcmp.eq.s32.totalorder %v6829_v11, %v3851_v56 }
 0x243   : > { %v1147_v53 = vsel %vm1000_vm5, %v3819_v27, %v846_v22  ;;  %v1149_v40 = vsel %vm1002_vm6, %v3819_v27, %v848_v18  ;;  %vm1296_vm9 = vcmp.eq.s32.totalorder %v6832_v14, %v3851_v56  ;;  %vm1592_vm10 = vcmp.eq.s32.totalorder %v6829_v11, %v3881_v26 }
 0x244   : > { %v1441_v21 = vsel %vm1294_vm8, %v3836_v43, %v1147_v53  ;;  %v1443_v9 = vsel %vm1296_vm9, %v3836_v43, %v1149_v40  ;;  %vm1594_vm11 = vcmp.eq.s32.totalorder %v6832_v14, %v3881_v26  ;;  %vm1885_vm12 = vcmp.eq.s32.totalorder %v6829_v11, %v3907_v6 }
 0x245   : > { %v1739_v30 = vsel %vm1592_vm10, %v3884_v32, %v1441_v21  ;;  %v1741_v5 = vsel %vm1594_vm11, %v3884_v32, %v1443_v9  ;;  %vm1887_vm13 = vcmp.eq.s32.totalorder %v6832_v14, %v3907_v6  ;;  %vm2179_vm14 = vcmp.eq.s32.totalorder %v6829_v11, %v3964_v41 }
 0x246   : > { %v2032_v34 = vsel %vm1885_vm12, %v3910_v24, %v1739_v30  ;;  %v2034_v13 = vsel %vm1887_vm13, %v3910_v24, %v1741_v5  ;;  %vm2181_vm15 = vcmp.eq.s32.totalorder %v6832_v14, %v3964_v41  ;;  %vm2472_vm0 = vcmp.eq.s32.totalorder %v6829_v11, %v3972_v10 }
 0x247   : > { %v2326_v52 = vsel %vm2179_vm14, %v3950_v48, %v2032_v34  ;;  %v2328_v15 = vsel %vm2181_vm15, %v3950_v48, %v2034_v13  ;;  %vm2474_vm1 = vcmp.eq.s32.totalorder %v6832_v14, %v3972_v10  ;;  %vm465_vm7 = vcmp.eq.s32.totalorder %v6836_v57, %v3845_v47 }
 0x248   : > { %v2619_v20 = vsel %vm2472_vm0, %v3958_v12, %v2326_v52  ;;  %v2621_v37 = vsel %vm2474_vm1, %v3958_v12, %v2328_v15  ;;  %vm467_vm2 = vcmp.eq.s32.totalorder %v6839_v19, %v3845_v47  ;;  %v612_v31 = vsel %vm465_vm7, %v3786_v63, 0.0 }
 0x249   : > { %v3253_v58 = vpack.c.bf16 %v2621_v37, %v2619_v20  ;;  %v614_v23 = vsel %vm467_vm2, %v3786_v63, 0.0  ;;  %vm763_vm3 = vcmp.eq.s32.totalorder %v6836_v57, %v3848_v54  ;;  %vm765_vm4 = vcmp.eq.s32.totalorder %v6839_v19, %v3848_v54 }
 0x24a   : > { %v910_v28 = vsel %vm763_vm3, %v3794_v2, %v612_v31  ;;  %v912_v61 = vsel %vm765_vm4, %v3794_v2, %v614_v23  ;;  %vm1064_vm5 = vcmp.eq.s32.totalorder %v6836_v57, %v3833_v42  ;;  %vm1066_vm6 = vcmp.eq.s32.totalorder %v6839_v19, %v3833_v42 }
 0x24b   : > { %3254 = vmatprep.subr.bf16.mxu1 %v3253_v58  ;;  %v1211_v7 = vsel %vm1064_vm5, %v3819_v27, %v910_v28  ;;  %v1213_v17 = vsel %vm1066_vm6, %v3819_v27, %v912_v61  ;;  %vm1358_vm8 = vcmp.eq.s32.totalorder %v6836_v57, %v3851_v56  ;;  %vm1360_vm9 = vcmp.eq.s32.totalorder %v6839_v19, %v3851_v56 }
 0x24c   : > { %v1505_v1 = vsel %vm1358_vm8, %v3836_v43, %v1211_v7  ;;  %v1507_v33 = vsel %vm1360_vm9, %v3836_v43, %v1213_v17  ;;  %vm1656_vm10 = vcmp.eq.s32.totalorder %v6836_v57, %v3881_v26  ;;  %vm1658_vm11 = vcmp.eq.s32.totalorder %v6839_v19, %v3881_v26 }
 0x24d   : > { %v1803_v55 = vsel %vm1656_vm10, %v3884_v32, %v1505_v1  ;;  %v1805_v50 = vsel %vm1658_vm11, %v3884_v32, %v1507_v33  ;;  %vm1949_vm12 = vcmp.eq.s32.totalorder %v6836_v57, %v3907_v6  ;;  %vm1951_vm13 = vcmp.eq.s32.totalorder %v6839_v19, %v3907_v6 }
 0x24e   : > { %v2096_v38 = vsel %vm1949_vm12, %v3910_v24, %v1803_v55  ;;  %v2098_v22 = vsel %vm1951_vm13, %v3910_v24, %v1805_v50  ;;  %vm2243_vm14 = vcmp.eq.s32.totalorder %v6836_v57, %v3964_v41  ;;  %vm2245_vm15 = vcmp.eq.s32.totalorder %v6839_v19, %v3964_v41 }
 0x24f   : > { %v2390_v18 = vsel %vm2243_vm14, %v3950_v48, %v2096_v38  ;;  %v2392_v53 = vsel %vm2245_vm15, %v3950_v48, %v2098_v22  ;;  %vm2536_vm0 = vcmp.eq.s32.totalorder %v6836_v57, %v3972_v10  ;;  %vm2538_vm1 = vcmp.eq.s32.totalorder %v6839_v19, %v3972_v10 }
 0x250   : > { %v2683_v40 = vsel %vm2536_vm0, %v3958_v12, %v2390_v18  ;;  %v2685_v21 = vsel %vm2538_vm1, %v3958_v12, %v2392_v53  ;;  %vm400_vm7 = vcmp.eq.s32.totalorder %v6829_v11, %v4038_v49  ;;  %vm402_vm2 = vcmp.eq.s32.totalorder %v6832_v14, %v4038_v49 }
 0x251   : > { %v3317_v9 = vpack.c.bf16 %v2685_v21, %v2683_v40  ;;  %v547_v30 = vsel %vm400_vm7, %v4021_v39, 0.0  ;;  %v549_v5 = vsel %vm402_vm2, %v4021_v39, 0.0  ;;  %vm698_vm3 = vcmp.eq.s32.totalorder %v6829_v11, %v4055_v3 }
 0x252   : > { %vm700_vm4 = vcmp.eq.s32.totalorder %v6832_v14, %v4055_v3  ;;  %v845_v34 = vsel %vm698_vm3, %v4029_v45, %v547_v30  ;;  %vm999_vm5 = vcmp.eq.s32.totalorder %v6829_v11, %v4035_v8  ;;  %vm1001_vm6 = vcmp.eq.s32.totalorder %v6832_v14, %v4035_v8 }
 0x253   : > { %3318 = vmatprep.subr.bf16.mxu0 %v3317_v9  ;;  %v847_v13 = vsel %vm700_vm4, %v4029_v45, %v549_v5  ;;  %v1146_v52 = vsel %vm999_vm5, %v4044_v16, %v845_v34  ;;  %vm1293_vm8 = vcmp.eq.s32.totalorder %v6829_v11, %v4068_v0  ;;  %vm1295_vm9 = vcmp.eq.s32.totalorder %v6832_v14, %v4068_v0 }
 0x254   : > { %v1148_v15 = vsel %vm1001_vm6, %v4044_v16, %v847_v13  ;;  %v1440_v20 = vsel %vm1293_vm8, %v4052_v51, %v1146_v52  ;;  %vm1591_vm10 = vcmp.eq.s32.totalorder %v6829_v11, %v4087_v59  ;;  %vm1593_vm11 = vcmp.eq.s32.totalorder %v6832_v14, %v4087_v59 }
 0x255   : > { %v1442_v37 = vsel %vm1295_vm9, %v4052_v51, %v1148_v15  ;;  %v1738_v31 = vsel %vm1591_vm10, %v4090_v62, %v1440_v20  ;;  %vm1884_vm12 = vcmp.eq.s32.totalorder %v6829_v11, %v4109_v46  ;;  %vm1886_vm13 = vcmp.eq.s32.totalorder %v6832_v14, %v4109_v46 }
 0x256   : > { %v1740_v58 = vsel %vm1593_vm11, %v4090_v62, %v1442_v37  ;;  %v2031_v23 = vsel %vm1884_vm12, %v4112_v60, %v1738_v31  ;;  %vm2178_vm14 = vcmp.eq.s32.totalorder %v6829_v11, %v4115_v25  ;;  %vm2180_vm15 = vcmp.eq.s32.totalorder %v6832_v14, %v4115_v25 }
 0x257   : > { %v2033_v28 = vsel %vm1886_vm13, %v4112_v60, %v1740_v58  ;;  %v2325_v61 = vsel %vm2178_vm14, %v4118_v35, %v2031_v23  ;;  %vm2471_vm0 = vcmp.eq.s32.totalorder %v6829_v11, %v4141_v44  ;;  %vm2473_vm1 = vcmp.eq.s32.totalorder %v6832_v14, %v4141_v44 }
 0x258   : > { %v2327_v7 = vsel %vm2180_vm15, %v4118_v35, %v2033_v28  ;;  %v2618_v17 = vsel %vm2471_vm0, %v4144_v36, %v2325_v61  ;;  %vm464_vm7 = vcmp.eq.s32.totalorder %v6836_v57, %v4038_v49  ;;  %vm466_vm2 = vcmp.eq.s32.totalorder %v6839_v19, %v4038_v49 }
 0x259   : > { %v2620_v1 = vsel %vm2473_vm1, %v4144_v36, %v2327_v7  ;;  %v611_v33 = vsel %vm464_vm7, %v4021_v39, 0.0  ;;  %v613_v55 = vsel %vm466_vm2, %v4021_v39, 0.0  ;;  %vm762_vm3 = vcmp.eq.s32.totalorder %v6836_v57, %v4055_v3 }
 0x25a   : > { %v3255_v11 = vpack.c.bf16 %v2620_v1, %v2618_v17  ;;  %vm764_vm4 = vcmp.eq.s32.totalorder %v6839_v19, %v4055_v3  ;;  %v909_v14 = vsel %vm762_vm3, %v4029_v45, %v611_v33  ;;  %vm1063_vm5 = vcmp.eq.s32.totalorder %v6836_v57, %v4035_v8 }
 0x25b   : > { %v911_v50 = vsel %vm764_vm4, %v4029_v45, %v613_v55  ;;  %vm1065_vm6 = vcmp.eq.s32.totalorder %v6839_v19, %v4035_v8  ;;  %v1210_v38 = vsel %vm1063_vm5, %v4044_v16, %v909_v14  ;;  %vm1357_vm8 = vcmp.eq.s32.totalorder %v6836_v57, %v4068_v0 }
 0x25c   : > { %3256 = vmatpush1.bf16.msra.mxu1 %v3255_v11  ;;  %v1212_v22 = vsel %vm1065_vm6, %v4044_v16, %v911_v50  ;;  %vm1359_vm9 = vcmp.eq.s32.totalorder %v6839_v19, %v4068_v0  ;;  %v1504_v18 = vsel %vm1357_vm8, %v4052_v51, %v1210_v38  ;;  %vm1655_vm10 = vcmp.eq.s32.totalorder %v6836_v57, %v4087_v59 }
 0x25d   : > { %v1506_v53 = vsel %vm1359_vm9, %v4052_v51, %v1212_v22  ;;  %vm1657_vm11 = vcmp.eq.s32.totalorder %v6839_v19, %v4087_v59  ;;  %v1802_v40 = vsel %vm1655_vm10, %v4090_v62, %v1504_v18  ;;  %vm1948_vm12 = vcmp.eq.s32.totalorder %v6836_v57, %v4109_v46 }
 0x25e   : > { %v1804_v21 = vsel %vm1657_vm11, %v4090_v62, %v1506_v53  ;;  %vm1950_vm13 = vcmp.eq.s32.totalorder %v6839_v19, %v4109_v46  ;;  %v2095_v9 = vsel %vm1948_vm12, %v4112_v60, %v1802_v40  ;;  %vm2242_vm14 = vcmp.eq.s32.totalorder %v6836_v57, %v4115_v25 }
 0x25f   : > { %v2097_v30 = vsel %vm1950_vm13, %v4112_v60, %v1804_v21  ;;  %vm2244_vm15 = vcmp.eq.s32.totalorder %v6839_v19, %v4115_v25  ;;  %v2389_v5 = vsel %vm2242_vm14, %v4118_v35, %v2095_v9  ;;  %vm2535_vm0 = vcmp.eq.s32.totalorder %v6836_v57, %v4141_v44 }
 0x260   : > { %v2391_v34 = vsel %vm2244_vm15, %v4118_v35, %v2097_v30  ;;  %vm2537_vm1 = vcmp.eq.s32.totalorder %v6839_v19, %v4141_v44  ;;  %v2682_v13 = vsel %vm2535_vm0, %v4144_v36, %v2389_v5  ;;  %v7036_v52 = vadd.s32 248, %v3693_v4 }
 0x261   : > { %v2684_v15 = vsel %vm2537_vm1, %v4144_v36, %v2391_v34  ;;  %vm405_vm7 = vcmp.eq.s32.totalorder %v6842_v29, %v3845_v47  ;;  %vm703_vm2 = vcmp.eq.s32.totalorder %v6842_v29, %v3848_v54  ;;  %vm1004_vm3 = vcmp.eq.s32.totalorder %v6842_v29, %v3833_v42 }
 0x262   : > { %v3319_v57 = vpack.c.bf16 %v2684_v15, %v2682_v13  ;;  %vm407_vm4 = vcmp.eq.s32.totalorder %v7036_v52, %v3845_v47  ;;  %v552_v19 = vsel %vm405_vm7, %v3786_v63, 0.0  ;;  %vm705_vm5 = vcmp.eq.s32.totalorder %v7036_v52, %v3848_v54 }
 0x263   : > { %v554_v20 = vsel %vm407_vm4, %v3786_v63, 0.0  ;;  %v850_v37 = vsel %vm703_vm2, %v3794_v2, %v552_v19  ;;  %vm1006_vm6 = vcmp.eq.s32.totalorder %v7036_v52, %v3833_v42  ;;  %vm1298_vm8 = vcmp.eq.s32.totalorder %v6842_v29, %v3851_v56 }
 0x264   : > { %3320 = vmatpush1.bf16.msra.mxu0 %v3319_v57  ;;  %v852_v31 = vsel %vm705_vm5, %v3794_v2, %v554_v20  ;;  %v1151_v58 = vsel %vm1004_vm3, %v3819_v27, %v850_v37  ;;  %vm1300_vm9 = vcmp.eq.s32.totalorder %v7036_v52, %v3851_v56  ;;  %vm1596_vm10 = vcmp.eq.s32.totalorder %v6842_v29, %v3881_v26 }
 0x265   : > { %v1153_v23 = vsel %vm1006_vm6, %v3819_v27, %v852_v31  ;;  %v1445_v28 = vsel %vm1298_vm8, %v3836_v43, %v1151_v58  ;;  %vm1598_vm11 = vcmp.eq.s32.totalorder %v7036_v52, %v3881_v26  ;;  %vm1889_vm12 = vcmp.eq.s32.totalorder %v6842_v29, %v3907_v6 }
 0x266   : > { %v1447_v61 = vsel %vm1300_vm9, %v3836_v43, %v1153_v23  ;;  %v1743_v7 = vsel %vm1596_vm10, %v3884_v32, %v1445_v28  ;;  %vm1891_vm13 = vcmp.eq.s32.totalorder %v7036_v52, %v3907_v6  ;;  %vm2183_vm14 = vcmp.eq.s32.totalorder %v6842_v29, %v3964_v41 }
 0x267   : > { %v1745_v17 = vsel %vm1598_vm11, %v3884_v32, %v1447_v61  ;;  %v2036_v1 = vsel %vm1889_vm12, %v3910_v24, %v1743_v7  ;;  %vm2185_vm15 = vcmp.eq.s32.totalorder %v7036_v52, %v3964_v41  ;;  %vm2476_vm0 = vcmp.eq.s32.totalorder %v6842_v29, %v3972_v10 }
 0x268   : > { %v2038_v33 = vsel %vm1891_vm13, %v3910_v24, %v1745_v17  ;;  %v2330_v55 = vsel %vm2183_vm14, %v3950_v48, %v2036_v1  ;;  %vm2478_vm1 = vcmp.eq.s32.totalorder %v7036_v52, %v3972_v10  ;;  %v7085_v11 = vadd.s32 496, %v3693_v4 }
 0x269   : > { %v2332_v14 = vsel %vm2185_vm15, %v3950_v48, %v2038_v33  ;;  %v2623_v50 = vsel %vm2476_vm0, %v3958_v12, %v2330_v55  ;;  %v7090_v38 = vadd.s32 504, %v3693_v4  ;;  %vm404_vm7 = vcmp.eq.s32.totalorder %v6842_v29, %v4038_v49 }
 0x26a   : > { %v2625_v22 = vsel %vm2478_vm1, %v3958_v12, %v2332_v14  ;;  %vm469_vm2 = vcmp.eq.s32.totalorder %v7085_v11, %v3845_v47  ;;  %vm767_vm3 = vcmp.eq.s32.totalorder %v7085_v11, %v3848_v54  ;;  %vm1068_vm4 = vcmp.eq.s32.totalorder %v7085_v11, %v3833_v42 }
 0x26b   : > { %v3257_v18 = vpack.c.bf16 %v2625_v22, %v2623_v50  ;;  %vm471_vm5 = vcmp.eq.s32.totalorder %v7090_v38, %v3845_v47  ;;  %v616_v4 = vsel %vm469_vm2, %v3786_v63, 0.0  ;;  %vm769_vm6 = vcmp.eq.s32.totalorder %v7090_v38, %v3848_v54 }
 0x26c   : > { %v618_v53 = vsel %vm471_vm5, %v3786_v63, 0.0  ;;  %v914_v40 = vsel %vm767_vm3, %v3794_v2, %v616_v4  ;;  %vm1070_vm8 = vcmp.eq.s32.totalorder %v7090_v38, %v3833_v42  ;;  %vm1362_vm9 = vcmp.eq.s32.totalorder %v7085_v11, %v3851_v56 }
 0x26d   : > { %3258 = vmatprep.subr.bf16.mxu1 %v3257_v18  ;;  %v916_v21 = vsel %vm769_vm6, %v3794_v2, %v618_v53  ;;  %v1215_v47 = vsel %vm1068_vm4, %v3819_v27, %v914_v40  ;;  %vm1364_vm10 = vcmp.eq.s32.totalorder %v7090_v38, %v3851_v56  ;;  %vm1660_vm11 = vcmp.eq.s32.totalorder %v7085_v11, %v3881_v26 }
 0x26e   : > { %v1217_v63 = vsel %vm1070_vm8, %v3819_v27, %v916_v21  ;;  %v1509_v54 = vsel %vm1362_vm9, %v3836_v43, %v1215_v47  ;;  %vm1662_vm12 = vcmp.eq.s32.totalorder %v7090_v38, %v3881_v26  ;;  %vm1953_vm13 = vcmp.eq.s32.totalorder %v7085_v11, %v3907_v6 }
 0x26f   : > { %v1511_v2 = vsel %vm1364_vm10, %v3836_v43, %v1217_v63  ;;  %v1807_v42 = vsel %vm1660_vm11, %v3884_v32, %v1509_v54  ;;  %vm1955_vm14 = vcmp.eq.s32.totalorder %v7090_v38, %v3907_v6  ;;  %vm2247_vm15 = vcmp.eq.s32.totalorder %v7085_v11, %v3964_v41 }
 0x270   : > { %v1809_v27 = vsel %vm1662_vm12, %v3884_v32, %v1511_v2  ;;  %v2100_v56 = vsel %vm1953_vm13, %v3910_v24, %v1807_v42  ;;  %vm2249_vm0 = vcmp.eq.s32.totalorder %v7090_v38, %v3964_v41  ;;  %vm2540_vm1 = vcmp.eq.s32.totalorder %v7085_v11, %v3972_v10 }
 0x271   : > { %v2102_v43 = vsel %vm1955_vm14, %v3910_v24, %v1809_v27  ;;  %v2394_v26 = vsel %vm2247_vm15, %v3950_v48, %v2100_v56  ;;  %vm2542_vm2 = vcmp.eq.s32.totalorder %v7090_v38, %v3972_v10  ;;  %vm406_vm3 = vcmp.eq.s32.totalorder %v7036_v52, %v4038_v49 }
 0x272   : > { %v2396_v32 = vsel %vm2249_vm0, %v3950_v48, %v2102_v43  ;;  %v2687_v6 = vsel %vm2540_vm1, %v3958_v12, %v2394_v26  ;;  %v551_v41 = vsel %vm404_vm7, %v4021_v39, 0.0  ;;  %v553_v9 = vsel %vm406_vm3, %v4021_v39, 0.0 }
 0x273   : > { %v2689_v24 = vsel %vm2542_vm2, %v3958_v12, %v2396_v32  ;;  %vm702_vm4 = vcmp.eq.s32.totalorder %v6842_v29, %v4055_v3  ;;  %vm704_vm5 = vcmp.eq.s32.totalorder %v7036_v52, %v4055_v3  ;;  %vm1003_vm6 = vcmp.eq.s32.totalorder %v6842_v29, %v4035_v8 }
 0x274   : > { %v3321_v48 = vpack.c.bf16 %v2689_v24, %v2687_v6  ;;  %v849_v10 = vsel %vm702_vm4, %v4029_v45, %v551_v41  ;;  %v851_v30 = vsel %vm704_vm5, %v4029_v45, %v553_v9  ;;  %vm1005_vm7 = vcmp.eq.s32.totalorder %v7036_v52, %v4035_v8 }
 0x275   : > { %v1150_v5 = vsel %vm1003_vm6, %v4044_v16, %v849_v10  ;;  %v1152_v12 = vsel %vm1005_vm7, %v4044_v16, %v851_v30  ;;  %vm1297_vm8 = vcmp.eq.s32.totalorder %v6842_v29, %v4068_v0  ;;  %vm1299_vm9 = vcmp.eq.s32.totalorder %v7036_v52, %v4068_v0 }
 0x276   : > { %3322 = vmatprep.subr.bf16.mxu0 %v3321_v48  ;;  %v1444_v34 = vsel %vm1297_vm8, %v4052_v51, %v1150_v5  ;;  %v1446_v13 = vsel %vm1299_vm9, %v4052_v51, %v1152_v12  ;;  %vm1595_vm10 = vcmp.eq.s32.totalorder %v6842_v29, %v4087_v59  ;;  %vm1597_vm11 = vcmp.eq.s32.totalorder %v7036_v52, %v4087_v59 }
 0x277   : > { %v1742_v15 = vsel %vm1595_vm10, %v4090_v62, %v1444_v34  ;;  %v1744_v57 = vsel %vm1597_vm11, %v4090_v62, %v1446_v13  ;;  %vm1888_vm12 = vcmp.eq.s32.totalorder %v6842_v29, %v4109_v46  ;;  %vm1890_vm13 = vcmp.eq.s32.totalorder %v7036_v52, %v4109_v46 }
 0x278   : > { %v2035_v19 = vsel %vm1888_vm12, %v4112_v60, %v1742_v15  ;;  %v2037_v20 = vsel %vm1890_vm13, %v4112_v60, %v1744_v57  ;;  %vm2182_vm14 = vcmp.eq.s32.totalorder %v6842_v29, %v4115_v25  ;;  %vm2184_vm15 = vcmp.eq.s32.totalorder %v7036_v52, %v4115_v25 }
 0x279   : > { %v2329_v37 = vsel %vm2182_vm14, %v4118_v35, %v2035_v19  ;;  %v2331_v31 = vsel %vm2184_vm15, %v4118_v35, %v2037_v20  ;;  %vm2475_vm0 = vcmp.eq.s32.totalorder %v6842_v29, %v4141_v44  ;;  %vm2477_vm1 = vcmp.eq.s32.totalorder %v7036_v52, %v4141_v44 }
 0x27a   : > { %v2622_v58 = vsel %vm2475_vm0, %v4144_v36, %v2329_v37  ;;  %v2624_v23 = vsel %vm2477_vm1, %v4144_v36, %v2331_v31  ;;  %vm468_vm2 = vcmp.eq.s32.totalorder %v7085_v11, %v4038_v49  ;;  %vm470_vm3 = vcmp.eq.s32.totalorder %v7090_v38, %v4038_v49 }
 0x27b   : > { %v3259_v28 = vpack.c.bf16 %v2624_v23, %v2622_v58  ;;  %v615_v61 = vsel %vm468_vm2, %v4021_v39, 0.0  ;;  %v617_v7 = vsel %vm470_vm3, %v4021_v39, 0.0  ;;  %vm766_vm4 = vcmp.eq.s32.totalorder %v7085_v11, %v4055_v3  ;;  %v2690_v39 = vld [vmem:[%s3682_s14] sm:$0xff] }
 0x27c   : > { %vm768_vm5 = vcmp.eq.s32.totalorder %v7090_v38, %v4055_v3  ;;  %v913_v29 = vsel %vm766_vm4, %v4029_v45, %v615_v61  ;;  %vm1067_vm6 = vcmp.eq.s32.totalorder %v7085_v11, %v4035_v8  ;;  %vm1069_vm7 = vcmp.eq.s32.totalorder %v7090_v38, %v4035_v8 }
 0x27d   : > { %3260 = vmatpush1.bf16.msra.mxu1 %v3259_v28  ;;  %v915_v49 = vsel %vm768_vm5, %v4029_v45, %v617_v7  ;;  %v1214_v52 = vsel %vm1067_vm6, %v4044_v16, %v913_v29  ;;  %vm1361_vm8 = vcmp.eq.s32.totalorder %v7085_v11, %v4068_v0  ;;  %vm1363_vm9 = vcmp.eq.s32.totalorder %v7090_v38, %v4068_v0 }
 0x27e   : > { %v1216_v3 = vsel %vm1069_vm7, %v4044_v16, %v915_v49  ;;  %v1508_v17 = vsel %vm1361_vm8, %v4052_v51, %v1214_v52  ;;  %vm1659_vm10 = vcmp.eq.s32.totalorder %v7085_v11, %v4087_v59  ;;  %vm1661_vm11 = vcmp.eq.s32.totalorder %v7090_v38, %v4087_v59 }
 0x27f   : > { %v1510_v45 = vsel %vm1363_vm9, %v4052_v51, %v1216_v3  ;;  %v1806_v8 = vsel %vm1659_vm10, %v4090_v62, %v1508_v17  ;;  %vm1952_vm12 = vcmp.eq.s32.totalorder %v7085_v11, %v4109_v46  ;;  %vm1954_vm13 = vcmp.eq.s32.totalorder %v7090_v38, %v4109_v46 }
 0x280   : > { %v1808_v16 = vsel %vm1661_vm11, %v4090_v62, %v1510_v45  ;;  %v2099_v0 = vsel %vm1952_vm12, %v4112_v60, %v1806_v8  ;;  %vm2246_vm14 = vcmp.eq.s32.totalorder %v7085_v11, %v4115_v25  ;;  %vm2248_vm15 = vcmp.eq.s32.totalorder %v7090_v38, %v4115_v25  ;;  %2759 = vmatmul.mubr.f32.vlgmr.msra.gmra.mrb[0].mxu1 %v2690_v39  ;;  %v2692_v25 = vld [vmem:[%s3682_s14 + $0x10] sm:$0xff]  ;;  %s3541_s14 = smov 32  }
 0x281   : > { %v2101_v51 = vsel %vm1954_vm13, %v4112_v60, %v1808_v16  ;;  %v2393_v59 = vsel %vm2246_vm14, %v4118_v35, %v2099_v0  ;;  %vm2539_vm0 = vcmp.eq.s32.totalorder %v7085_v11, %v4141_v44  ;;  %vm2541_vm1 = vcmp.eq.s32.totalorder %v7090_v38, %v4141_v44 }
 0x282   : > { %v2395_v62 = vsel %vm2248_vm15, %v4118_v35, %v2101_v51  ;;  %v2686_v46 = vsel %vm2539_vm0, %v4144_v36, %v2393_v59  ;;  %v3530_v14 = vmov 0.0|0.0   ;;  %vm2836_vm2 = vcmask 64512   ;;  %v300_v35 = vld [vmem:[%s7347_s2 + $0x8] sm:$0xff] }
 0x283   : > { %v2688_v1 = vsel %vm2541_vm1, %v4144_v36, %v2395_v62  ;;  %3325 = vmatprep.subr.bf16.mxu1 %v3530_v14  ;;  %vm2968_vm3 = vcmask 719872  }
 0x284   : > { %v3323_v33 = vpack.c.bf16 %v2688_v1, %v2686_v46  ;;  %3189 = vmatprep.mubr.msk.f32.mxu1 %vm2968_vm3, %v300_v35 }
 0x286   : > { %3324 = vmatpush1.bf16.msra.mxu0 %v3323_v33 }
 0x289   : > { %2830 = vmatmul.mubr.f32.vlgmr.msra.gmra.mrb[0].mxu0 %v2692_v25 }
 0x353   : > { %v2760_v55 = vpop.f32.mrb[0].mxu1 }
 0x354   : > { %v2762_v60 = vpop.f32.mrb[1].mxu1 }
 0x35c   : > { %v2831_v50 = vpop.f32.mrb[0].mxu0 }
 0x35d   : > { %v2832_v11 = vadd.f32 %v2831_v50, %v2760_v55  ;;  %v2833_v22 = vpop.f32.mrb[1].mxu0 }
 0x35e   : > { %v2834_v44 = vadd.f32 %v2833_v22, %v2762_v60 }
 0x35f   : > { %2847 = vrot.lane.b32.xlu1 %v2832_v11, %s3531_s26  ;;  %2839 = vrot.lane.b32.xlu0 %v2832_v11, %s3532_s22  ;;  %2837 = vst.msk [vmem:[#allocation2] sm:$0xff] %vm2836_vm2, %v2832_v11 }
 0x360   : > { %2899 = vst.msk [vmem:[#allocation2 + $0x80] sm:$0xff] %vm2836_vm2, %v2834_v44 }
 0x363   : > { %2851 = vrot.lane.b32.xlu1 %v2832_v11, %s3533_s23  ;;  %2843 = vrot.lane.b32.xlu0 %v2832_v11, %s3534_s25 }
 0x366   : > { %v2941_v21 = vld [vmem:[#allocation2] sm:$0xff] }
 0x367   : > { %2859 = vrot.lane.b32.xlu1 %v2832_v11, %s3535_s29  ;;  %2855 = vrot.lane.b32.xlu0 %v2832_v11, %s3536_s30  ;;  %v2957_v16 = vld [vmem:[#allocation2 + $0x80] sm:$0xff] }
 0x36b   : > { %2867 = vrot.lane.b32.xlu1 %v2832_v11, %s3537_s5  ;;  %2863 = vrot.lane.b32.xlu0 %v2832_v11, %s3538_s6 }
 0x36f   : > { %2875 = vrot.lane.b32.xlu1 %v2832_v11, %s3539_s9  ;;  %2871 = vrot.lane.b32.xlu0 %v2832_v11, %s3540_s13 }
 0x373   : > { %2883 = vrot.lane.b32.xlu1 %v2832_v11, %s3541_s14  ;;  %2879 = vrot.lane.b32.xlu0 %v2832_v11, %s3542_s8 }
 0x377   : > { %2891 = vrot.lane.b32.xlu1 %v2832_v11, %s3543_s10  ;;  %2887 = vrot.lane.b32.xlu0 %v2832_v11, %s3544_s11  ;;  %s3083_s10 = scalar_lea.sflag [#allocation5], %s3678_s7 }
 0x37b   : > { %2895 = vrot.lane.b32.xlu0 %v2832_v11, %s3545_s12  ;;  %2901 = vrot.lane.b32.xlu1 %v2834_v44, %s3532_s22 }
 0x37f   : > { %2905 = vrot.lane.b32.xlu0 %v2834_v44, %s3534_s25  ;;  %2909 = vrot.lane.b32.xlu1 %v2834_v44, %s3531_s26 }
 0x383   : > { %2913 = vrot.lane.b32.xlu0 %v2834_v44, %s3533_s23  ;;  %2917 = vrot.lane.b32.xlu1 %v2834_v44, %s3536_s30  ;;  %s3186_s23 = sshll.u32 %s3678_s7, 3  ;;  %s3192_s30 = sshll.u32 %s3594_s19, 7 }
 0x384   : > { %s7300_s8 = scalar_lea.hbm %s7349_s4, %s3192_s30  ;;  %s3547_s19 = smov [#allocation6]  }
 0x385   : > { %s3465_s12 = sshll.u32 %s3547_s19, 4  ;;  %s3466_s12 = int_to_ptr.vmem [resolvable:$false] %s3465_s12 }
 0x386   : > { %s3467_s20 = scalar_lea.vmem %s3466_s12, 256 }
 0x387   : > { %2921 = vrot.lane.b32.xlu0 %v2834_v44, %s3535_s29  ;;  %2925 = vrot.lane.b32.xlu1 %v2834_v44, %s3538_s6 }
 0x38b   : > { %2929 = vrot.lane.b32.xlu0 %v2834_v44, %s3537_s5  ;;  %2933 = vrot.lane.b32.xlu1 %v2834_v44, %s3540_s13  ;;  %s228_s5 = scalar_lea.vmem [#allocation6], %s3186_s23 }
 0x38c   : > { %s3096_s6 = sshll.u32 %s228_s5, 4  ;;  %s7302_s6 = int_to_ptr.vmem [resolvable:$true] %s3096_s6 }
 0x38d   : > { %s3461_s11 = scalar_lea.vmem %s7302_s6, 128  ;;  %p3468_p10 = scmp.lt.s32.totalorder %s7302_s6, %s3466_s12 }
 0x38e   : > { %p3462_p6 = scmp.ne.s32.totalorder %s7302_s6, %s3461_s11  ;;  %p3469_p2 = scmp.lt.s32.totalorder %s3467_s20, %s3461_s11 }
 0x38f   : > { %2937 = vrot.lane.b32.xlu0 %v2834_v44, %s3539_s9 }
 0x390   : > { %p3463_p13 = pnand %p3462_p6, %p7360_p12  ;;  %p3470_p4 = por %p3469_p2, %p3468_p10 }
 0x392   : > { %p3464_p7 = pneg %p3463_p13 }
 0x394   : > { %p3471_p5 = pnand %p3470_p4, %p3464_p7 }
 0x3d1   : > { %v2848_v36 = vpop.permute.xlu1 %2847  ;;  %v2840_v38 = vpop.permute.xlu0 %2839 }
 0x3d2   : > { %2850 = vst.msk [vmem:[#allocation2 + $0x18] sm:$0xff] %vm2836_vm2, %v2848_v36  ;;  %2842 = vst.msk [vmem:[#allocation2 + $0x8] sm:$0xff] %vm2836_vm2, %v2840_v38  ;;  %v3546_v38 = vmov 0.0  }
 0x3d5   : > { %v2852_v18 = vpop.permute.xlu1 %2851  ;;  %v2844_v4 = vpop.permute.xlu0 %2843 }
 0x3d6   : > { %2854 = vst.msk [vmem:[#allocation2 + $0x20] sm:$0xff] %vm2836_vm2, %v2852_v18  ;;  %2846 = vst.msk [vmem:[#allocation2 + $0x10] sm:$0xff] %vm2836_vm2, %v2844_v4  ;;  %v299_v18 = vld [vmem:[%s7347_s2] sm:$0xff] }
 0x3d9   : > { %v2860_v53 = vpop.permute.xlu1 %2859  ;;  %v2856_v40 = vpop.permute.xlu0 %2855  ;;  %v2942_v47 = vld [vmem:[#allocation2 + $0x8] sm:$0xff]  ;;  %v2944_v27 = vld [vmem:[#allocation2 + $0x18] sm:$0xff] }
 0x3da   : > { %2862 = vst.msk [vmem:[#allocation2 + $0x30] sm:$0xff] %vm2836_vm2, %v2860_v53  ;;  %2858 = vst.msk [vmem:[#allocation2 + $0x28] sm:$0xff] %vm2836_vm2, %v2856_v40  ;;  %v3326_v63 = vpack.c.bf16 %v2942_v47, %v2941_v21 }
 0x3dc   : > { %3327 = vmatpush1.bf16.msra.mxu1 %v3326_v63 }
 0x3dd   : > { %v2868_v54 = vpop.permute.xlu1 %2867  ;;  %v2864_v2 = vpop.permute.xlu0 %2863  ;;  %3328 = vmatprep.subr.bf16.mxu1 %v3530_v14  ;;  %v2943_v42 = vld [vmem:[#allocation2 + $0x10] sm:$0xff]  ;;  %v2945_v32 = vld [vmem:[#allocation2 + $0x20] sm:$0xff] }
 0x3de   : > { %2870 = vst.msk [vmem:[#allocation2 + $0x40] sm:$0xff] %vm2836_vm2, %v2868_v54  ;;  %2866 = vst.msk [vmem:[#allocation2 + $0x38] sm:$0xff] %vm2836_vm2, %v2864_v2  ;;  %v3329_v56 = vpack.c.bf16 %v2944_v27, %v2943_v42 }
 0x3e0   : > { %3330 = vmatpush1.bf16.msra.mxu1 %v3329_v56 }
 0x3e1   : > { %v2876_v43 = vpop.permute.xlu1 %2875  ;;  %v2872_v26 = vpop.permute.xlu0 %2871  ;;  %3331 = vmatprep.subr.bf16.mxu1 %v3530_v14  ;;  %v2946_v6 = vld [vmem:[#allocation2 + $0x28] sm:$0xff]  ;;  %v2947_v48 = vld [vmem:[#allocation2 + $0x30] sm:$0xff] }
 0x3e2   : > { %2878 = vst.msk [vmem:[#allocation2 + $0x50] sm:$0xff] %vm2836_vm2, %v2876_v43  ;;  %2874 = vst.msk [vmem:[#allocation2 + $0x48] sm:$0xff] %vm2836_vm2, %v2872_v26  ;;  %v3332_v41 = vpack.c.bf16 %v2946_v6, %v2945_v32 }
 0x3e4   : > { %3333 = vmatpush1.bf16.msra.mxu1 %v3332_v41 }
 0x3e5   : > { %v2884_v9 = vpop.permute.xlu1 %2883  ;;  %v2880_v24 = vpop.permute.xlu0 %2879  ;;  %3334 = vmatprep.subr.bf16.mxu1 %v3530_v14  ;;  %v2948_v10 = vld [vmem:[#allocation2 + $0x38] sm:$0xff]  ;;  %v2949_v34 = vld [vmem:[#allocation2 + $0x40] sm:$0xff] }
 0x3e6   : > { %2886 = vst.msk [vmem:[#allocation2 + $0x60] sm:$0xff] %vm2836_vm2, %v2884_v9  ;;  %2882 = vst.msk [vmem:[#allocation2 + $0x58] sm:$0xff] %vm2836_vm2, %v2880_v24  ;;  %v3335_v30 = vpack.c.bf16 %v2948_v10, %v2947_v48 }
 0x3e8   : > { %3336 = vmatpush1.bf16.msra.mxu1 %v3335_v30 }
 0x3e9   : > { %v2892_v5 = vpop.permute.xlu1 %2891  ;;  %v2888_v12 = vpop.permute.xlu0 %2887  ;;  %3337 = vmatprep.subr.bf16.mxu1 %v3530_v14  ;;  %v2950_v13 = vld [vmem:[#allocation2 + $0x48] sm:$0xff]  ;;  %v2951_v20 = vld [vmem:[#allocation2 + $0x50] sm:$0xff] }
 0x3ea   : > { %2894 = vst.msk [vmem:[#allocation2 + $0x70] sm:$0xff] %vm2836_vm2, %v2892_v5  ;;  %2890 = vst.msk [vmem:[#allocation2 + $0x68] sm:$0xff] %vm2836_vm2, %v2888_v12  ;;  %v3338_v15 = vpack.c.bf16 %v2950_v13, %v2949_v34 }
 0x3ec   : > { %3339 = vmatpush1.bf16.msra.mxu1 %v3338_v15 }
 0x3ed   : > { %v2896_v57 = vpop.permute.xlu0 %2895  ;;  %v2902_v19 = vpop.permute.xlu1 %2901  ;;  %3340 = vmatprep.subr.bf16.mxu1 %v3530_v14  ;;  %v2952_v37 = vld [vmem:[#allocation2 + $0x58] sm:$0xff]  ;;  %v2953_v28 = vld [vmem:[#allocation2 + $0x60] sm:$0xff] }
 0x3ee   : > { %2898 = vst.msk [vmem:[#allocation2 + $0x78] sm:$0xff] %vm2836_vm2, %v2896_v57  ;;  %2904 = vst.msk [vmem:[#allocation2 + $0x88] sm:$0xff] %vm2836_vm2, %v2902_v19  ;;  %v3341_v31 = vpack.c.bf16 %v2952_v37, %v2951_v20 }
 0x3f0   : > { %3342 = vmatpush1.bf16.msra.mxu1 %v3341_v31 }
 0x3f1   : > { %v2906_v58 = vpop.permute.xlu0 %2905  ;;  %v2910_v23 = vpop.permute.xlu1 %2909  ;;  %3343 = vmatprep.subr.bf16.mxu1 %v3530_v14  ;;  %v2954_v61 = vld [vmem:[#allocation2 + $0x68] sm:$0xff]  ;;  %v2955_v52 = vld [vmem:[#allocation2 + $0x70] sm:$0xff] }
 0x3f2   : > { %2908 = vst.msk [vmem:[#allocation2 + $0x90] sm:$0xff] %vm2836_vm2, %v2906_v58  ;;  %2912 = vst.msk [vmem:[#allocation2 + $0x98] sm:$0xff] %vm2836_vm2, %v2910_v23  ;;  %v3344_v7 = vpack.c.bf16 %v2954_v61, %v2953_v28 }
 0x3f4   : > { %3345 = vmatpush1.bf16.msra.mxu1 %v3344_v7 }
 0x3f5   : > { %v2914_v29 = vpop.permute.xlu0 %2913  ;;  %v2918_v49 = vpop.permute.xlu1 %2917  ;;  %3346 = vmatprep.subr.bf16.mxu1 %v3530_v14  ;;  %v2956_v39 = vld [vmem:[#allocation2 + $0x78] sm:$0xff]  ;;  %v2958_v17 = vld [vmem:[#allocation2 + $0x88] sm:$0xff] }
 0x3f6   : > { %2916 = vst.msk [vmem:[#allocation2 + $0xa0] sm:$0xff] %vm2836_vm2, %v2914_v29  ;;  %2920 = vst.msk [vmem:[#allocation2 + $0xa8] sm:$0xff] %vm2836_vm2, %v2918_v49  ;;  %v3347_v3 = vpack.c.bf16 %v2956_v39, %v2955_v52  ;;  %v3350_v0 = vpack.c.bf16 %v2958_v17, %v2957_v16 }
 0x3f8   : > { %3348 = vmatpush1.bf16.msra.mxu1 %v3347_v3 }
 0x3f9   : > { %v2922_v45 = vpop.permute.xlu0 %2921  ;;  %v2926_v8 = vpop.permute.xlu1 %2925  ;;  %3349 = vmatprep.subr.bf16.mxu1 %v3530_v14  ;;  %v2959_v51 = vld [vmem:[#allocation2 + $0x90] sm:$0xff]  ;;  %v2960_v59 = vld [vmem:[#allocation2 + $0x98] sm:$0xff] }
 0x3fa   : > { %2924 = vst.msk [vmem:[#allocation2 + $0xb0] sm:$0xff] %vm2836_vm2, %v2922_v45  ;;  %2928 = vst.msk [vmem:[#allocation2 + $0xb8] sm:$0xff] %vm2836_vm2, %v2926_v8  ;;  %v3353_v1 = vpack.c.bf16 %v2960_v59, %v2959_v51 }
 0x3fc   : > { %3351 = vmatpush1.bf16.msra.mxu1 %v3350_v0 }
 0x3fd   : > { %v2930_v62 = vpop.permute.xlu0 %2929  ;;  %v2934_v46 = vpop.permute.xlu1 %2933  ;;  %3352 = vmatprep.subr.bf16.mxu1 %v3530_v14  ;;  %v2961_v33 = vld [vmem:[#allocation2 + $0xa0] sm:$0xff]  ;;  %v2962_v25 = vld [vmem:[#allocation2 + $0xa8] sm:$0xff] }
 0x3fe   : > { %2932 = vst.msk [vmem:[#allocation2 + $0xc0] sm:$0xff] %vm2836_vm2, %v2930_v62  ;;  %2936 = vst.msk [vmem:[#allocation2 + $0xc8] sm:$0xff] %vm2836_vm2, %v2934_v46  ;;  %v3356_v60 = vpack.c.bf16 %v2962_v25, %v2961_v33 }
 0x400   : > { %3354 = vmatpush1.bf16.msra.mxu1 %v3353_v1 }
 0x401   : > { %v2938_v55 = vpop.permute.xlu0 %2937  ;;  %3355 = vmatprep.subr.bf16.mxu1 %v3530_v14  ;;  %v2963_v50 = vld [vmem:[#allocation2 + $0xb0] sm:$0xff]  ;;  %v2964_v11 = vld [vmem:[#allocation2 + $0xb8] sm:$0xff] }
 0x402   : > { %2940 = vst.msk [vmem:[#allocation2 + $0xd0] sm:$0xff] %vm2836_vm2, %v2938_v55  ;;  %v3359_v22 = vpack.c.bf16 %v2964_v11, %v2963_v50 }
 0x404   : > { %3357 = vmatpush1.bf16.msra.mxu1 %v3356_v60 }
 0x405   : > { %3358 = vmatprep.subr.bf16.mxu1 %v3530_v14  ;;  %v2965_v44 = vld [vmem:[#allocation2 + $0xc0] sm:$0xff]  ;;  %v2966_v35 = vld [vmem:[#allocation2 + $0xc8] sm:$0xff] }
 0x406   : > { %v3362_v36 = vpack.c.bf16 %v2966_v35, %v2965_v44 }
 0x408   : > { %3360 = vmatpush1.bf16.msra.mxu1 %v3359_v22 }
 0x409   : > { %3361 = vmatprep.subr.bf16.mxu1 %v3530_v14  ;;  %v2967_v4 = vld [vmem:[#allocation2 + $0xd0] sm:$0xff]  ;;  %v3190_v14 = vld [vmem:[%s7348_s3] ss:$0 sm:$0xff] }
 0x40c   : > { %3363 = vmatpush1.bf16.msra.mxu1 %v3362_v36 }
 0x40d   : > { %3024 = vmatprep.subr.mxu1 %v3546_v38 }
 0x410   : > { %3025 = vmatpush1.msra.mxu1 %v2967_v4 }
 0x411   : > { %3037 = vmatmul.mubr.f32.vlgmr.msra.gmra.mrb[2].mxu1 %v299_v18 }
 0x4e4   : > { %v3038_v53 = vpop.f32.mrb[2].mxu1 }
 0x4e5   : > { %3042 = vxpose.xlu1.b32.start.end [1/1] (short) (narrow) %v3038_v53, 8  ;;  %v3040_v40 = vpop.f32.mrb[3].mxu1 }
 0x565   : > { %v3058_v21 = vpop.trf.xlu1 }
 0x566   : > { %v3080_v47 = vadd.f32 %v3190_v14, %v3058_v21 }
 0x568   : > { %3081 = vst.msk [vmem:[%s228_s5] sm:$0xff] %vm2836_vm2, %v3080_v47 }
 0x569   : > { %3474 = shalt.err (!%p3471_p5)
}
 0x56a   : > { %s3475_s7 = scalar_lea.hbm %s7300_s8, 128  ;;  %s3479_s22 = scalar_lea.hbm %s7349_s4, 256 }
 0x56b   : > { %p3476_p8 = scmp.ne.s32.totalorder %s7300_s8, %s3475_s7  ;;  %p3480_p1 = scmp.lt.u32.totalorder %s7300_s8, %s7349_s4 }
 0x56c   : > { %p3481_p3 = scmp.lt.u32.totalorder %s3479_s22, %s3475_s7  ;;  %p3483_p6 = scmp.lt.u32.totalorder %s3475_s7, %s7300_s8 }
 0x56d   : > { %p3477_p9 = pnand %p3476_p8, %p7360_p12 }
 0x56e   : > { %p3482_p11 = por %p3481_p3, %p3480_p1 }
 0x56f   : > { %p3478_p0 = pneg %p3477_p9 }
 0x570   : > { %p3484_p13 = por %p3483_p6, %p3482_p11 }
 0x572   : > { %p3485_p7 = pnand %p3484_p13, %p3478_p0 }
 0x574   : > { %3488 = shalt.err (!%p3485_p7)
}
 0x575   : > { %3370 = dma.vmem_to_hbm [thread:$0]  (%p7360_p12), %s7302_s6, 128, %s7300_s8, %s3083_s10  }
 0x576 PF: > { %s3108_s29 = sand.u32 1, %s3515_s15   ;;  %p7361_p10 = scmp.ne.s32.totalorder %s7354_s28, 0 }
 0x577   : > { %p7362_p2 = scmp.ge.s32.totalorder %s3527_s18, 2  ;;  %s3109_s30 = scalar_lea.sflag [#allocation5], %s3108_s29 }
 0x579   : > { %p3377_p4 = pnand %p7362_p2, %p7361_p10 }
 0x57b   : > { %3510 = dma.done.wait (!%p3377_p4), %s3109_s30, 128  }
 0x57c   : > { %3512 = vsyncadd (!%p3377_p4), %s3109_s30, 4294967168  ;;  %p17_p5 = scmp.ge.s32.totalorder %s3598_s21, 4   ;;  %s7363_s15 = smov %s3519_s16 }
 0x57d   : > { %s7364_s16 = smov %s3523_s17  ;;  %s7365_s17 = smov %s3610_s24 }
 0x57e   : > { %s7366_s18 = smov %s3598_s21  ;;  %19 = sbr.rel (!%p17_p5) target bundleno = 5 (0x5), region = 84 }
 0x585   :  { %3114 = vsyncpa [#allocation4], 1 }
 0x586   :  { %3116 = vsyncpa [#allocation4 + $0x1], 1 }
 0x587   :  { %3117 = vsyncpa [#allocation5], 1 }
 0x588   :  { %3119 = vsyncpa [#allocation5 + $0x1], 1 }

</bundles_post_ra>
